<compile_context>
chip_gen: v6e
topology: v6e:2x2x1
jax: 0.10.0
libtpu: 0.0.40
codegen_flags: <defaults>
</compile_context>

<pallas_src>
import functools

import jax
import jax.numpy as jnp
from jax import lax
from jax.experimental import pallas as pl
from jax.experimental.pallas import tpu as pltpu


# ----------------------------------------------------------------------------
# Fused Pallas kernel: the whole conv stack for one batch item.
# ----------------------------------------------------------------------------
def _conv_env_fused_kernel(*refs, H, W, Cin, KH, KW, channels):
    # refs layout: x_ref, w_0..w_{n-1}, b_0..b_{n-1}, o_ref
    n = len(channels)
    x_ref = refs[0]
    w_refs = refs[1:1 + n]                 # each (KH*KW*Cin_l, Cout_l)
    b_refs = refs[1 + n:1 + 2 * n]         # (1, Cout_l) except last: (Cout, 1)
    o_ref = refs[1 + 2 * n]                # (1, C_last, Ho_last*Wo_last)

    h = x_ref[...][0]                      # (H, W, Cin) f32
    ch, cw, cc = H, W, Cin
    for l in range(n):
        cout = channels[l]
        ho, wo = ch - KH + 1, cw - KW + 1
        # im2col: build one (ho*wo, KH*KW*cc) patch matrix -> single MXU push.
        pieces = [h[dy:dy + ho, dx:dx + wo, :].reshape(ho * wo, cc)
                  for dy in range(KH) for dx in range(KW)]
        patches = jnp.concatenate(pieces, axis=-1)            # (ho*wo, KH*KW*cc)

        if l + 1 < n:
            acc = jnp.dot(patches, w_refs[l][...],
                          preferred_element_type=jnp.float32)  # (ho*wo, cout)
            acc = jnp.maximum(acc + b_refs[l][...], 0.0)        # bias + ReLU
            h = acc.reshape(ho, wo, cout)
        else:
            # Last layer: contract so the result is channel-major, i.e. exactly
            # the NCHW flatten order, then store one dense slab.
            acc = lax.dot_general(
                w_refs[l][...], patches,
                dimension_numbers=(((0,), (1,)), ((), ())),
                preferred_element_type=jnp.float32)             # (cout, ho*wo)
            acc = jnp.maximum(acc + b_refs[l][...], 0.0)        # bias (cout, 1)
            o_ref[...] = acc.reshape(1, cout, ho * wo).astype(o_ref.dtype)
        ch, cw, cc = ho, wo, cout


def conv_env_net_forward(x, params):
    """x: (B, H, W, C) NHWC -> (B, embedding_size), matching the PyTorch module."""
    B, H, W, Cin = x.shape
    n = len(params)
    KH, KW = params[0][0].shape[:2]
    channels = tuple(int(w.shape[-1]) for (w, _) in params)

    ho, wo = H, W
    for _ in range(n):
        ho, wo = ho - KH + 1, wo - KW + 1
    c_last = channels[-1]
    embedding_size = c_last * ho * wo

    # Flatten HWIO weights to (KH*KW*Cin_l, Cout_l): one matmul per layer.
    w_flats = [w.reshape(-1, w.shape[-1]) for (w, _) in params]
    # Bias rows broadcast over (ho*wo, cout); the last layer's result is
    # channel-major so its bias is a (cout, 1) column.
    b_blocks = [b.reshape(1, -1) for (_, b) in params[:-1]]
    b_blocks.append(params[-1][1].reshape(-1, 1))

    kernel = functools.partial(
        _conv_env_fused_kernel,
        H=H, W=W, Cin=Cin, KH=KH, KW=KW, channels=channels)

    in_specs = [pl.BlockSpec((1, H, W, Cin), lambda i: (i, 0, 0, 0))]
    in_specs += [pl.BlockSpec(wf.shape, lambda i: (0, 0)) for wf in w_flats]
    in_specs += [pl.BlockSpec(bb.shape, lambda i: (0, 0)) for bb in b_blocks]

    out = pl.pallas_call(
        kernel,
        out_shape=jax.ShapeDtypeStruct((B, c_last, ho * wo), jnp.float32),
        grid=(B,),
        in_specs=in_specs,
        out_specs=pl.BlockSpec((1, c_last, ho * wo), lambda i: (i, 0, 0)),
        compiler_params=pltpu.CompilerParams(
            dimension_semantics=("parallel",),
            vmem_limit_bytes=32 * 1024 * 1024),
    )(x, *w_flats, *b_blocks)

    # (B, C, Ho*Wo) is already the NCHW channel-major flatten order; this is a
    # contiguous (free) collapse in XLA.
    return out.reshape(B, embedding_size)


# ----------------------------------------------------------------------------
# ConvEnvNet parameters
# ----------------------------------------------------------------------------
def init_conv_env_net(key, obs_dim, channels, kernel_size):
    """Deterministic synthetic parameters (HWIO weight layout)."""
    h, w, c = obs_dim
    chans = [c, *channels]
    kh, kw = kernel_size
    params = []
    for i in range(len(chans) - 1):
        key, kw_key, kb_key = jax.random.split(key, 3)
        fan_in = chans[i] * kh * kw
        scale = 1.0 / jnp.sqrt(jnp.float32(fan_in))
        Wt = jax.random.uniform(kw_key, (kh, kw, chans[i], chans[i + 1]),
                                jnp.float32, -scale, scale)
        Bs = jax.random.uniform(kb_key, (chans[i + 1],),
                                jnp.float32, -scale, scale)
        params.append((Wt, Bs))
    num_conv = len(chans) - 1
    embedding_size = (h - num_conv) * (w - num_conv) * chans[-1]
    return params, embedding_size


# ----------------------------------------------------------------------------
# Reference in plain JAX (correctness check)
# ----------------------------------------------------------------------------
def conv_env_net_reference(x, params):
    h = x
    for (Wt, Bs) in params:
        h = lax.conv_general_dilated(
            h, Wt, window_strides=(1, 1), padding="VALID",
            dimension_numbers=("NHWC", "HWIO", "NHWC"))
        h = jnp.maximum(h + Bs, 0.0)
    h = jnp.transpose(h, (0, 3, 1, 2))
    return h.reshape(h.shape[0], -1)


if __name__ == "__main__":
    # Shapes consistent with the module: obs_dim=(16,16,4), channels=[8,16],
    # kernel_size=(2,2) (the module's embedding_size formula assumes each conv
    # shrinks spatial dims by 1), ReLU activation after every conv.
    obs_dim = (16, 16, 4)
    channels = [8, 16]
    kernel_size = (2, 2)
    batch = 2

    key = jax.random.PRNGKey(0)
    key, xkey = jax.random.split(key)
    x = jax.random.normal(xkey, (batch, *obs_dim), jnp.float32)

    params, embedding_size = init_conv_env_net(key, obs_dim, channels,
                                               kernel_size)

    out = jax.block_until_ready(conv_env_net_forward(x, params))
    assert out.shape == (batch, embedding_size), (out.shape, embedding_size)

    ref = jax.block_until_ready(conv_env_net_reference(x, params))
    assert jnp.allclose(out, ref, atol=1e-4, rtol=1e-4), \
        float(jnp.max(jnp.abs(out - ref)))

    print("KERNEL_OK")
</pallas_src>

<mosaic_0001>
module attributes {stable_mosaic.version = 11 : i64} {
  func.func @_conv_env_fused_kernel(%arg0: i32, %arg1: memref<1x16x16x4xf32, #tpu.memory_space<vmem>>, %arg2: memref<16x8xf32, #tpu.memory_space<vmem>>, %arg3: memref<32x16xf32, #tpu.memory_space<vmem>>, %arg4: memref<1x8xf32, #tpu.memory_space<vmem>>, %arg5: memref<16x1xf32, #tpu.memory_space<vmem>>, %arg6: memref<1x16x196xf32, #tpu.memory_space<vmem>>) attributes {dimension_semantics = [#tpu.dimension_semantics<parallel>], iteration_bounds = array<i64: 2>, scalar_prefetch = 0 : i64, scratch_operands = 0 : i64, tpu.core_type = #tpu.core_type<tc>, window_params = [{transform_indices = @transform_0, window_bounds = array<i64: 1, 16, 16, 4>}, {pipeline_mode = #tpu.pipeline_mode<synchronous>, transform_indices = @transform_1, window_bounds = array<i64: 16, 8>}, {pipeline_mode = #tpu.pipeline_mode<synchronous>, transform_indices = @transform_2, window_bounds = array<i64: 32, 16>}, {pipeline_mode = #tpu.pipeline_mode<synchronous>, transform_indices = @transform_3, window_bounds = array<i64: 1, 8>}, {pipeline_mode = #tpu.pipeline_mode<synchronous>, transform_indices = @transform_4, window_bounds = array<i64: 16, 1>}, {transform_indices = @transform_5, window_bounds = array<i64: 1, 16, 196>}]} {
    %c0 = arith.constant 0 : index
    %c0_0 = arith.constant 0 : index
    %c0_1 = arith.constant 0 : index
    %c0_2 = arith.constant 0 : index
    %0 = vector.load %arg1[%c0, %c0_0, %c0_1, %c0_2] : memref<1x16x16x4xf32, #tpu.memory_space<vmem>>, vector<1x16x16x4xf32>
    %1 = vector.shape_cast %0 : vector<1x16x16x4xf32> to vector<16x16x4xf32>
    %2 = vector.extract_strided_slice %1 {offsets = [0, 0, 0], sizes = [15, 15, 4], strides = [1, 1, 1]} : vector<16x16x4xf32> to vector<15x15x4xf32>
    %3 = vector.shape_cast %2 : vector<15x15x4xf32> to vector<225x4xf32>
    %4 = vector.extract_strided_slice %1 {offsets = [0, 1, 0], sizes = [15, 15, 4], strides = [1, 1, 1]} : vector<16x16x4xf32> to vector<15x15x4xf32>
    %5 = vector.shape_cast %4 : vector<15x15x4xf32> to vector<225x4xf32>
    %6 = vector.extract_strided_slice %1 {offsets = [1, 0, 0], sizes = [15, 15, 4], strides = [1, 1, 1]} : vector<16x16x4xf32> to vector<15x15x4xf32>
    %7 = vector.shape_cast %6 : vector<15x15x4xf32> to vector<225x4xf32>
    %8 = vector.extract_strided_slice %1 {offsets = [1, 1, 0], sizes = [15, 15, 4], strides = [1, 1, 1]} : vector<16x16x4xf32> to vector<15x15x4xf32>
    %9 = vector.shape_cast %8 : vector<15x15x4xf32> to vector<225x4xf32>
    %10 = tpu.concatenate %3, %5, %7, %9 in 1 : vector<225x4xf32>, vector<225x4xf32>, vector<225x4xf32>, vector<225x4xf32> -> vector<225x16xf32>
    %c0_3 = arith.constant 0 : index
    %c0_4 = arith.constant 0 : index
    %11 = vector.load %arg2[%c0_3, %c0_4] : memref<16x8xf32, #tpu.memory_space<vmem>>, vector<16x8xf32>
    %cst = arith.constant dense<0.000000e+00> : vector<225x8xf32>
    %12 = tpu.matmul %10, %11, %cst {dimension_numbers = #tpu.dot_dimension_numbers<[1], [0], [0], [1], [0, 0, 1, 1], [], []>} : vector<225x16xf32>, vector<16x8xf32>, vector<225x8xf32> -> vector<225x8xf32>
    %c0_5 = arith.constant 0 : index
    %c0_6 = arith.constant 0 : index
    %13 = vector.load %arg4[%c0_5, %c0_6] : memref<1x8xf32, #tpu.memory_space<vmem>>, vector<1x8xf32>
    %14 = vector.broadcast %13 : vector<1x8xf32> to vector<225x8xf32>
    %15 = arith.addf %12, %14 : vector<225x8xf32>
    %cst_7 = arith.constant 0.000000e+00 : f32
    %16 = vector.broadcast %cst_7 : f32 to vector<225x8xf32>
    %17 = arith.maximumf %15, %16 : vector<225x8xf32>
    %18 = vector.shape_cast %17 : vector<225x8xf32> to vector<15x15x8xf32>
    %19 = vector.extract_strided_slice %18 {offsets = [0, 0, 0], sizes = [14, 14, 8], strides = [1, 1, 1]} : vector<15x15x8xf32> to vector<14x14x8xf32>
    %20 = vector.shape_cast %19 : vector<14x14x8xf32> to vector<196x8xf32>
    %21 = vector.extract_strided_slice %18 {offsets = [0, 1, 0], sizes = [14, 14, 8], strides = [1, 1, 1]} : vector<15x15x8xf32> to vector<14x14x8xf32>
    %22 = vector.shape_cast %21 : vector<14x14x8xf32> to vector<196x8xf32>
    %23 = vector.extract_strided_slice %18 {offsets = [1, 0, 0], sizes = [14, 14, 8], strides = [1, 1, 1]} : vector<15x15x8xf32> to vector<14x14x8xf32>
    %24 = vector.shape_cast %23 : vector<14x14x8xf32> to vector<196x8xf32>
    %25 = vector.extract_strided_slice %18 {offsets = [1, 1, 0], sizes = [14, 14, 8], strides = [1, 1, 1]} : vector<15x15x8xf32> to vector<14x14x8xf32>
    %26 = vector.shape_cast %25 : vector<14x14x8xf32> to vector<196x8xf32>
    %27 = tpu.concatenate %20, %22, %24, %26 in 1 : vector<196x8xf32>, vector<196x8xf32>, vector<196x8xf32>, vector<196x8xf32> -> vector<196x32xf32>
    %c0_8 = arith.constant 0 : index
    %c0_9 = arith.constant 0 : index
    %28 = vector.load %arg3[%c0_8, %c0_9] : memref<32x16xf32, #tpu.memory_space<vmem>>, vector<32x16xf32>
    %cst_10 = arith.constant dense<0.000000e+00> : vector<16x196xf32>
    %29 = tpu.matmul %28, %27, %cst_10 {dimension_numbers = #tpu.dot_dimension_numbers<[0], [1], [1], [0], [0, 1, 1, 0], [], []>} : vector<32x16xf32>, vector<196x32xf32>, vector<16x196xf32> -> vector<16x196xf32>
    %c0_11 = arith.constant 0 : index
    %c0_12 = arith.constant 0 : index
    %30 = vector.load %arg5[%c0_11, %c0_12] : memref<16x1xf32, #tpu.memory_space<vmem>>, vector<16x1xf32>
    %31 = vector.broadcast %30 : vector<16x1xf32> to vector<16x196xf32>
    %32 = arith.addf %29, %31 : vector<16x196xf32>
    %cst_13 = arith.constant 0.000000e+00 : f32
    %33 = vector.broadcast %cst_13 : f32 to vector<16x196xf32>
    %34 = arith.maximumf %32, %33 : vector<16x196xf32>
    %35 = vector.shape_cast %34 : vector<16x196xf32> to vector<1x16x196xf32>
    %c0_14 = arith.constant 0 : index
    %c0_15 = arith.constant 0 : index
    %c0_16 = arith.constant 0 : index
    %36 = vector.load %arg6[%c0_14, %c0_15, %c0_16] : memref<1x16x196xf32, #tpu.memory_space<vmem>>, vector<1x16x196xf32>
    tpu.vector_store %arg6[%c0_14, %c0_15, %c0_16], %35 {strides = array<i32>} : memref<1x16x196xf32, #tpu.memory_space<vmem>>, vector<1x16x196xf32>,
    return
  }
  func.func @transform_0(%arg0: i32) -> (i32, i32, i32, i32) {
    %c0_i32 = arith.constant 0 : i32
    %c0_i32_0 = arith.constant 0 : i32
    %c0_i32_1 = arith.constant 0 : i32
    %c0_i32_2 = arith.constant 0 : i32
    return %arg0, %c0_i32, %c0_i32_0, %c0_i32_1 : i32, i32, i32, i32
  }
  func.func @transform_1(%arg0: i32) -> (i32, i32) {
    %c0_i32 = arith.constant 0 : i32
    %c0_i32_0 = arith.constant 0 : i32
    %c0_i32_1 = arith.constant 0 : i32
    return %c0_i32, %c0_i32_0 : i32, i32
  }
  func.func @transform_2(%arg0: i32) -> (i32, i32) {
    %c0_i32 = arith.constant 0 : i32
    %c0_i32_0 = arith.constant 0 : i32
    %c0_i32_1 = arith.constant 0 : i32
    return %c0_i32, %c0_i32_0 : i32, i32
  }
  func.func @transform_3(%arg0: i32) -> (i32, i32) {
    %c0_i32 = arith.constant 0 : i32
    %c0_i32_0 = arith.constant 0 : i32
    %c0_i32_1 = arith.constant 0 : i32
    return %c0_i32, %c0_i32_0 : i32, i32
  }
  func.func @transform_4(%arg0: i32) -> (i32, i32) {
    %c0_i32 = arith.constant 0 : i32
    %c0_i32_0 = arith.constant 0 : i32
    %c0_i32_1 = arith.constant 0 : i32
    return %c0_i32, %c0_i32_0 : i32, i32
  }
  func.func @transform_5(%arg0: i32) -> (i32, i32, i32) {
    %c0_i32 = arith.constant 0 : i32
    %c0_i32_0 = arith.constant 0 : i32
    %c0_i32_1 = arith.constant 0 : i32
    return %arg0, %c0_i32, %c0_i32_0 : i32, i32, i32
  }
}

</mosaic_0001>

<bundles_post_ra>
// kernel: tpu_custom_call.1
= control target key start
LH: loop header
LB: loop body
LE: loop exit
PB: predicated region body
PF: predicated region fallthrough
CT: control target
= control target key end

     0   :  { %10 = vsyncpa [#allocation3], 0  ;;  %s17332_s0 = inlined_call_operand.vmem [shape: f32[2,16,16,4], index: 0, kind: input, shape index: {}]   ;;  %s17333_s1 = inlined_call_operand.vmem [shape: f32[16,8], index: 1, kind: input, shape index: {}]   ;;  %s17334_s2 = inlined_call_operand.vmem [shape: f32[32,16], index: 2, kind: input, shape index: {}]   ;;  %s17335_s3 = inlined_call_operand.vmem [shape: f32[1,8], index: 3, kind: input, shape index: {}]   ;;  %s17336_s4 = inlined_call_operand.vmem [shape: f32[16,1], index: 4, kind: input, shape index: {}]   ;;  %s17337_s5 = inlined_call_operand.hbm [shape: f32[2,16,196], index: 5, kind: output, shape index: {}]  }
   0x1   :  { %12 = vsyncpa [#allocation3 + $0x1], 0  ;;  %s12205_s18 = smov 0   ;;  %s12207_s19 = smov 0  }
   0x2   :  { %s12209_s20 = smov 0   ;;  %s12211_s21 = smov 0  }
   0x3 LB: > { %s12226_s22 = sadd.s32 4294967295, %s12162_s21   ;;  %s11711_s23 = sadd.s32 4294967294, %s12162_s21   ;;  %s12162_s21 = sphi %s12211_s21, %s18062_s21   ;;  %s12158_s20 = sphi %s12209_s20, %s18061_s20   ;;  %s12154_s19 = sphi %s12207_s19, %s18060_s19   ;;  %s12150_s18 = sphi %s12205_s18, %s18059_s18  }
   0x4   : > { %s12230_s24 = sadd.s32 1, %s12162_s21   ;;  %s135_s25 = sadd.s32 1, %s12158_s20 }
   0x5   : > { %s132_s26 = ssub.s32 %s12162_s21, %s12230_s24  ;;  %p145_p0 = scmp.ne.s32.totalorder %s12158_s20, %s12154_s19 }
   0x6   : > { %p133_p1 = scmp.eq.s32.totalorder %s132_s26, 0  ;;  %p146_p2 = scmp.eq.s32.totalorder %s12226_s22, 1 }
   0x7   : > { %p151_p3 = scmp.ne.s32.totalorder %s12154_s19, %s12150_s18  ;;  %p152_p4 = scmp.eq.s32.totalorder %s11711_s23, 1 }
   0x8   : > { %s12241_s27 = scalar_select %p133_p1, %s12158_s20, %s135_s25  }
   0x9   : > { %p12243_p5 = por %p146_p2, %p145_p0  ;;  %p12247_p6 = por %p152_p4, %p151_p3 }
   0xa   : > { %p11714_p7 = scmp.ge.s32.totalorder %s12162_s21, 1  ;;  %p190_p8 = scmp.lt.s32.totalorder %s12162_s21, 3 }
   0xc   : > { %p191_p9 = pnand %p11714_p7, %p190_p8 }
   0xe   : > { %194 = sbr.rel (%p191_p9) target bundleno = 1226 (0x4ca), region = 40 }
  0x13   : > { %p218_p10 = scmp.lt.s32.totalorder %s12226_s22, 1  ;;  %v289_v0 = vlaneseq  ;;  %v12164_v1 = vmov 1966171168   ;;  %s12165_s10 = smov 4   ;;  %vm5908_vm0 = vcmask 31744   ;;  %vm5938_vm1 = vcmask 64512  }
  0x14   : > { %v287_v2 = vunpack.c.l.s4 %v12164_v1  ;;  %s12166_s11 = smov 8   ;;  %s12167_s12 = smov 12   ;;  %vm5968_vm2 = vcmask 97280   ;;  %vm12169_vm3 = vmmov 0   ;;  %vm6007_vm4 = vcmask 130048  }
  0x15   : > { %s219_s30 = scalar_select %p218_p10, %s12226_s22, 1  ;;  %v290_v3 = vshrl.u32 %v289_v0, 7  ;;  %vm11393_vm5 = vcmask 195584   ;;  %vm11467_vm6 = vcmask 261120   ;;  %vm11631_vm7 = vcmask 556032  }
  0x16   : > { %v288_v4 = vunpack.c.0.s8 %v287_v2  ;;  %s12170_s25 = smov 24   ;;  %s12171_s26 = smov 16  }
  0x17   : > { %s11894_s6 = sshll.u32 %s219_s30, 8  ;;  %s11895_s8 = sshll.u32 %s12226_s22, 9 }
  0x18   : > { %s12258_s9 = scalar_lea.vmem %s17332_s0, %s11894_s6  ;;  %v12260_v5 = vsub.s32 %v288_v4, %v290_v3  ;;  %s12173_s13 = smov [#allocation2]  }
  0x19   : > { %v226_v6 = vld [vmem:[%s12258_s9 + $0x18] sm:$0xff]  ;;  %v12264_v7 = vld [vmem:[%s12258_s9 + $0x20] sm:$0xff]  ;;  %v225_v8 = vld [vmem:[%s12258_s9 + $0x10] sm:$0xff]  ;;  %s12106_s14 = sshll.u32 %s12173_s13, 4  ;;  %s12107_s14 = int_to_ptr.vmem [resolvable:$false] %s12106_s14 }
  0x1a   : > { %v431_v9 = vcombine.high %v226_v6, %v226_v6  ;;  %v438_v10 = vrot.slane %v226_v6, %v12260_v5  ;;  %v479_v11 = vcombine.high %v12264_v7, %v12264_v7  ;;  %v486_v12 = vrot.slane %v12264_v7, %v12260_v5  ;;  %v228_v13 = vld [vmem:[%s12258_s9 + $0x28] sm:$0xff]  ;;  %v229_v53 = vld [vmem:[%s12258_s9 + $0x30] sm:$0xff]  ;;  %s12108_s15 = scalar_lea.vmem %s12107_s14, 1024 }
  0x1b   : > { %v382_v14 = vcombine.high %v225_v8, %v225_v8  ;;  %v389_v15 = vrot.slane %v225_v8, %v12260_v5  ;;  %v528_v16 = vcombine.high %v228_v13, %v228_v13  ;;  %v535_v17 = vrot.slane %v228_v13, %v12260_v5 }
  0x1c   : > { %v445_v18 = vrot.slane %v431_v9, %v12260_v5  ;;  %v446_v19 = vcombine.high %v438_v10, %v438_v10  ;;  %v12277_v20 = vrot.slane %v438_v10, %v12260_v5  ;;  %v494_v21 = vcombine.high %v486_v12, %v486_v12 }
  0x1d   : > { %v12280_v22 = vrot.slane %v486_v12, %v12260_v5  ;;  %v396_v23 = vrot.slane %v382_v14, %v12260_v5  ;;  %v397_v24 = vcombine.high %v389_v15, %v389_v15  ;;  %v12284_v25 = vrot.slane %v389_v15, %v12260_v5 }
  0x1e   : > { %v447_v26 = vcombine.high %v445_v18, %v445_v18  ;;  %v12287_v27 = vrot.slane %v445_v18, %v12260_v5  ;;  %v12290_v28 = vrot.slane %v446_v19, %v12260_v5  ;;  %v12293_v29 = vrot.slane %v494_v21, %v12260_v5  ;;  %v12378_v18 = vld [vmem:[%s12258_s9 + $0x38] sm:$0xff] }
  0x1f   : > { %v524_v30 = vcombine.high %v12280_v22, %v12280_v22  ;;  %v398_v31 = vcombine.high %v396_v23, %v396_v23  ;;  %v12298_v32 = vrot.slane %v396_v23, %v12260_v5  ;;  %v12301_v33 = vrot.slane %v397_v24, %v12260_v5 }
  0x20   : > { %v12304_v34 = vrot.slane %v447_v26, %v12260_v5  ;;  %v11744_v35 = vcombine.high %v12277_v20, %v12290_v28  ;;  %v542_v36 = vrot.slane %v528_v16, %v12260_v5  ;;  %v543_v37 = vcombine.high %v535_v17, %v535_v17 }
  0x21   : > { %v3420_v38 = vcombine.low %v12293_v29, %v524_v30  ;;  %v12311_v39 = vrot.slane %v398_v31, %v12260_v5  ;;  %v11742_v40 = vcombine.high %v12284_v25, %v12301_v33  ;;  %v4743_v41 = vcombine.low %v12284_v25, %v12301_v33 }
  0x22   : > { %v3418_v42 = vcombine.low %v12287_v27, %v12304_v34  ;;  %v11745_v43 = vcombine.high %v12287_v27, %v12304_v34  ;;  %v3427_v44 = vrot.slane %v11744_v35, %v12260_v5  ;;  %v544_v45 = vcombine.high %v542_v36, %v542_v36 }
  0x23   : > { %v12323_v46 = vrot.slane %v3420_v38, %v12260_v5  ;;  %v3369_v47 = vcombine.low %v12298_v32, %v12311_v39  ;;  %v11743_v48 = vcombine.high %v12298_v32, %v12311_v39  ;;  %v12330_v49 = vrot.slane %v11742_v40, %v12260_v5 }
  0x24   : > { %v3434_v50 = vrot.slane %v3418_v42, %v12260_v5  ;;  %v3441_v51 = vrot.slane %v11745_v43, %v12260_v5  ;;  %v4750_v52 = vrot.slane %v4743_v41, %v12260_v5  ;;  %v12337_v54 = vrot.slane %v535_v17, %v12260_v5 }
  0x25   : > { %v3385_v55 = vrot.slane %v3369_v47, %v12260_v5  ;;  %v12341_v56 = vrot.slane %v11743_v48, %v12260_v5  ;;  %v12344_v57 = vrot.slane %v542_v36, %v12260_v5  ;;  %v12347_v58 = vrot.slane %v543_v37, %v12260_v5 }
  0x26   : > { %v3449_v59 = vcombine.low %v3427_v44, %v3434_v50  ;;  %v3450_v60 = vcombine.low %v3441_v51, %v12323_v46  ;;  %v4751_v61 = vcombine.low %v4750_v52, %v12330_v49  ;;  %v12352_v62 = vrot.slane %v544_v45, %v12260_v5 }
  0x27   : > { %v4752_v63 = vcombine.low %v3385_v55, %v12341_v56  ;;  %v583_v0 = vrot.slane %v229_v53, %v12260_v5  ;;  %v11723_v1 = vcombine.high %v12337_v54, %v12347_v58  ;;  %v12360_v2 = vcombine.high %v12287_v27, %v12287_v27 }
  0x28   : > { %v3457_v3 = vrot.slane %v3449_v59, %v12260_v5  ;;  %v3464_v4 = vrot.slane %v3450_v60, %v12260_v5  ;;  %v4759_v6 = vrot.slane %v4751_v61, %v12260_v5  ;;  %v2101_v8 = vcombine.low %v12344_v57, %v12352_v62 }
  0x29   : > { %v4766_v9 = vrot.slane %v4752_v63, %v12260_v5  ;;  %v591_v10 = vcombine.high %v583_v0, %v583_v0  ;;  %v12369_v12 = vrot.slane %v583_v0, %v12260_v5  ;;  %v2110_v13 = vrot.slane %v11723_v1, %v12260_v5 }
  0x2a   : > { %v3465_v14 = vcombine.low %v3457_v3, %v3464_v4  ;;  %v2117_v15 = vrot.slane %v2101_v8, %v12260_v5  ;;  %v11773_v16 = vcombine.high %v12344_v57, %v12352_v62  ;;  %v3371_v17 = vcombine.low %v12277_v20, %v12290_v28 }
  0x2b   : > { %v4767_v19 = vcombine.low %v4759_v6, %v4766_v9  ;;  %v12381_v21 = vrot.slane %v591_v10, %v12260_v5  ;;  %v621_v23 = vcombine.high %v12369_v12, %v12369_v12  ;;  %v4768_v24 = vcombine.low %v12360_v2, %v12280_v22 }
  0x2c   : > { %4662 = vrot.lane.b32.xlu1 %v3465_v14, %s12165_s10  ;;  %v2132_v26 = vcombine.low %v2110_v13, %v2117_v15  ;;  %v5512_v30 = vrot.slane %v11773_v16, %v12260_v5  ;;  %v3399_v31 = vrot.slane %v3371_v17, %v12260_v5  ;;  %v576_v35 = vcombine.high %v229_v53, %v229_v53 }
  0x2d   : > { %5401 = vrot.lane.b32.xlu0 %v4767_v19, %s12166_s11  ;;  %v2103_v36 = vcombine.low %v12381_v21, %v621_v23  ;;  %v4775_v37 = vrot.slane %v4768_v24, %v12260_v5  ;;  %v632_v38 = vrot.slane %v12378_v18, %v12260_v5  ;;  %v11746_v40 = vcombine.high %v12369_v12, %v12381_v21 }
  0x2e   : > { %v12398_v41 = vrot.slane %v2132_v26, %v12260_v5  ;;  %v4776_v42 = vcombine.low %v3399_v31, %v3427_v44  ;;  %v590_v43 = vrot.slane %v576_v35, %v12260_v5  ;;  %v3400_v45 = vcombine.low %v12330_v49, %v3385_v55 }
  0x2f   : > { %v12403_v47 = vrot.slane %v2103_v36, %v12260_v5  ;;  %v4777_v48 = vcombine.low %v3434_v50, %v4775_v37  ;;  %v640_v51 = vcombine.high %v632_v38, %v632_v38  ;;  %v12406_v52 = vrot.slane %v632_v38, %v12260_v5 }
  0x30   : > { %v4784_v53 = vrot.slane %v4776_v42, %v12260_v5  ;;  %v592_v59 = vcombine.high %v590_v43, %v590_v43  ;;  %v12410_v60 = vrot.slane %v590_v43, %v12260_v5  ;;  %v12413_v44 = vrot.slane %v11746_v40, %v12260_v5 }
  0x31   : > { %v5513_v61 = vcombine.low %v5512_v30, %v12403_v47  ;;  %v4791_v49 = vrot.slane %v4777_v48, %v12260_v5  ;;  %v12418_v55 = vrot.slane %v640_v51, %v12260_v5  ;;  %v3401_v50 = vcombine.low %v12341_v56, %v3399_v31 }
  0x32   : > { %v12422_v63 = vrot.slane %v592_v59, %v12260_v5  ;;  %v3408_v0 = vrot.slane %v3400_v45, %v12260_v5  ;;  %v493_v1 = vrot.slane %v479_v11, %v12260_v5  ;;  %v11721_v3 = vcombine.high %v12280_v22, %v12293_v29 }
  0x33   : > { %v5520_v4 = vrot.slane %v5513_v61, %v12260_v5  ;;  %v4792_v6 = vcombine.low %v4784_v53, %v4791_v49  ;;  %v3566_v8 = vcombine.low %v12406_v52, %v12418_v55  ;;  %v3415_v56 = vrot.slane %v3401_v50, %v12260_v5 }
  0x34   : > { %v3564_v9 = vcombine.low %v12410_v60, %v12422_v63  ;;  %v11747_v10 = vcombine.high %v12410_v60, %v12422_v63  ;;  %v495_v13 = vcombine.high %v493_v1, %v493_v1  ;;  %v12440_v7 = vrot.slane %v493_v1, %v12260_v5 }
  0x35   : > { %v5521_v11 = vcombine.low %v12398_v41, %v5520_v4  ;;  %5403 = vrot.lane.b32.xlu0 %v4792_v6, %s12166_s11  ;;  %v12445_v14 = vrot.slane %v3566_v8, %v12260_v5  ;;  %v3416_v15 = vcombine.low %v3408_v0, %v3415_v56  ;;  %v2054_v16 = vcombine.low %v12337_v54, %v12347_v58 }
  0x36   : > { %v12450_v17 = vrot.slane %v3564_v9, %v12260_v5  ;;  %v12453_v19 = vrot.slane %v11747_v10, %v12260_v5  ;;  %v12456_v23 = vrot.slane %v495_v13, %v12260_v5  ;;  %v2061_v24 = vrot.slane %v11721_v3, %v12260_v5  ;;  %v224_v10 = vld [vmem:[%s12258_s9 + $0x8] sm:$0xff] }
  0x37   : > { %5827 = vrot.lane.b32.xlu1 %v5521_v11, %s12167_s12  ;;  %v2082_v26 = vrot.slane %v2054_v16, %v12260_v5  ;;  %v427_v30 = vcombine.high %v12284_v25, %v12284_v25  ;;  %v428_v31 = vcombine.high %v12298_v32, %v12298_v32  ;;  %v429_v35 = vcombine.high %v12301_v33, %v12301_v33 }
  0x38   : > { %v4835_v36 = vcombine.low %v12413_v44, %v12450_v17  ;;  %v4836_v37 = vcombine.low %v12453_v19, %v12445_v14  ;;  %v2052_v38 = vcombine.low %v12440_v7, %v12456_v23  ;;  %v11722_v40 = vcombine.high %v12440_v7, %v12456_v23 }
  0x39   : > { %4660 = vrot.lane.b32.xlu0 %v3416_v15, %s12165_s10  ;;  %v430_v42 = vcombine.high %v12311_v39, %v12311_v39  ;;  %v1953_v43 = vcombine.low %v12301_v33, %v427_v30  ;;  %v1954_v45 = vcombine.low %v429_v35, %v12298_v32  ;;  %v1955_v48 = vcombine.low %v12311_v39, %v428_v31 }
  0x3a   : > { %v4843_v51 = vrot.slane %v4835_v36, %v12260_v5  ;;  %v4850_v53 = vrot.slane %v4836_v37, %v12260_v5  ;;  %v2068_v59 = vrot.slane %v2052_v38, %v12260_v5  ;;  %v2075_v61 = vrot.slane %v11722_v40, %v12260_v5 }
  0x3b   : > { %v1956_v49 = vcombine.low %v430_v42, %v12277_v20  ;;  %v1963_v50 = vrot.slane %v1953_v43, %v12260_v5  ;;  %v1970_v0 = vrot.slane %v1954_v45, %v12260_v5  ;;  %v1977_v1 = vrot.slane %v1955_v48, %v12260_v5 }
  0x3c   : > { %v4851_v32 = vcombine.low %v4843_v51, %v4850_v53  ;;  %v2083_v3 = vcombine.low %v2061_v24, %v2068_v59  ;;  %v2084_v39 = vcombine.low %v2075_v61, %v2082_v26  ;;  %v573_v4 = vcombine.high %v12337_v54, %v12337_v54 }
  0x3d   : > { %v1984_v6 = vrot.slane %v1956_v49, %v12260_v5  ;;  %v1985_v8 = vcombine.low %v1963_v50, %v1970_v0  ;;  %v12494_v56 = vcombine.high %v12344_v57, %v12344_v57  ;;  %v575_v9 = vcombine.high %v12347_v58, %v12347_v58 }
  0x3e   : > { %5409 = vrot.lane.b32.xlu1 %v4851_v32, %s12166_s11  ;;  %v2091_v13 = vrot.slane %v2083_v3, %v12260_v5  ;;  %v2098_v11 = vrot.slane %v2084_v39, %v12260_v5  ;;  %v3469_v15 = vcombine.low %v12347_v58, %v573_v4  ;;  %v4810_v16 = vcombine.low %v12369_v12, %v12381_v21 }
  0x3f   : > { %v1986_v24 = vcombine.low %v1977_v1, %v1984_v6  ;;  %v1993_v26 = vrot.slane %v1985_v8, %v12260_v5  ;;  %v3515_v30 = vcombine.low %v575_v9, %v12344_v57  ;;  %v3516_v31 = vcombine.low %v12352_v62, %v12494_v56 }
  0x40   : > { %v12509_v35 = vcombine.low %v2091_v13, %v2098_v11  ;;  %v12512_v36 = vrot.slane %v3469_v15, %v12260_v5  ;;  %v4817_v37 = vrot.slane %v4810_v16, %v12260_v5  ;;  %v334_v38 = vcombine.high %v224_v10, %v224_v10 }
  0x41   : > { %v2000_v58 = vrot.slane %v1986_v24, %v12260_v5  ;;  %v12517_v40 = vrot.slane %v3515_v30, %v12260_v5  ;;  %v12520_v42 = vrot.slane %v3516_v31, %v12260_v5  ;;  %v341_v57 = vrot.slane %v224_v10, %v12260_v5  ;;  %v223_v10 = vld [vmem:[%s12258_s9] sm:$0xff] }
  0x42   : > { %5825 = vrot.lane.b32.xlu0 %v12509_v35, %s12167_s12  ;;  %v348_v43 = vrot.slane %v334_v38, %v12260_v5  ;;  %v476_v45 = vcombine.high %v12277_v20, %v12277_v20  ;;  %v478_v48 = vcombine.high %v12290_v28, %v12290_v28  ;;  %v1741_v51 = vcombine.high %v12304_v34, %v12304_v34 }
  0x43   : > { %v12532_v53 = vcombine.low %v1993_v26, %v2000_v58  ;;  %v4818_v59 = vcombine.low %v12512_v36, %v12517_v40  ;;  %v4819_v61 = vcombine.low %v12520_v42, %v4817_v37  ;;  %v349_v49 = vcombine.high %v341_v57, %v341_v57 }
  0x44   : > { %v350_v50 = vcombine.high %v348_v43, %v348_v43  ;;  %v12538_v0 = vrot.slane %v341_v57, %v12260_v5  ;;  %v12541_v20 = vrot.slane %v348_v43, %v12260_v5  ;;  %v2002_v1 = vcombine.low %v12290_v28, %v476_v45 }
  0x45   : > { %5821 = vrot.lane.b32.xlu1 %v12532_v53, %s12167_s12  ;;  %v4826_v32 = vrot.slane %v4818_v59, %v12260_v5  ;;  %v4833_v3 = vrot.slane %v4819_v61, %v12260_v5  ;;  %v12549_v39 = vrot.slane %v349_v49, %v12260_v5  ;;  %v2003_v4 = vcombine.low %v478_v48, %v12287_v27 }
  0x46   : > { %v12553_v6 = vrot.slane %v350_v50, %v12260_v5  ;;  %v379_v8 = vcombine.high %v12538_v0, %v12538_v0  ;;  %v12559_v28 = vcombine.high %v12541_v20, %v12541_v20  ;;  %v2004_v9 = vcombine.low %v12304_v34, %v12360_v2 }
  0x47   : > { %v4834_v13 = vcombine.low %v4826_v32, %v4833_v3  ;;  %v381_v11 = vcombine.high %v12549_v39, %v12549_v39  ;;  %v2012_v27 = vrot.slane %v2002_v1, %v12260_v5  ;;  %v2019_v15 = vrot.slane %v2003_v4, %v12260_v5 }
  0x48   : > { %v1740_v16 = vcombine.high %v12553_v6, %v12553_v6  ;;  %v3319_v24 = vcombine.low %v12549_v39, %v379_v8  ;;  %v3321_v26 = vcombine.low %v12553_v6, %v12559_v28  ;;  %v12574_v30 = vrot.slane %v2004_v9, %v12260_v5 }
  0x49   : > { %5407 = vrot.lane.b32.xlu0 %v4834_v13, %s12166_s11  ;;  %v3320_v34 = vcombine.low %v381_v11, %v12541_v20  ;;  %v2034_v2 = vcombine.low %v2012_v27, %v2019_v15  ;;  %v5488_v31 = vcombine.low %v1741_v51, %v12293_v29  ;;  %v285_v37 = vcombine.high %v223_v10, %v223_v10 }
  0x4a   : > { %v3322_v38 = vcombine.low %v1740_v16, %v12301_v33  ;;  %v3329_v58 = vrot.slane %v3319_v24, %v12260_v5  ;;  %v3343_v57 = vrot.slane %v3321_v26, %v12260_v5  ;;  %v292_v43 = vrot.slane %v223_v10, %v12260_v5 }
  0x4b   : > { %v3336_v45 = vrot.slane %v3320_v34, %v12260_v5  ;;  %v12585_v48 = vrot.slane %v2034_v2, %v12260_v5  ;;  %v5495_v59 = vrot.slane %v5488_v31, %v12260_v5  ;;  %v299_v61 = vrot.slane %v285_v37, %v12260_v5 }
  0x4c   : > { %v3350_v51 = vrot.slane %v3322_v38, %v12260_v5  ;;  %v300_v49 = vcombine.high %v292_v43, %v292_v43  ;;  %v12591_v33 = vrot.slane %v292_v43, %v12260_v5  ;;  %v525_v50 = vcombine.high %v12440_v7, %v12440_v7 }
  0x4d   : > { %v3351_v1 = vcombine.low %v3329_v58, %v3336_v45  ;;  %v5496_v32 = vcombine.low %v12574_v30, %v5495_v59  ;;  %v301_v3 = vcombine.high %v299_v61, %v299_v61  ;;  %v12597_v4 = vrot.slane %v299_v61, %v12260_v5 }
  0x4e   : > { %v3352_v8 = vcombine.low %v3343_v57, %v3350_v51  ;;  %v12600_v9 = vrot.slane %v300_v49, %v12260_v5  ;;  %v330_v10 = vcombine.high %v12591_v33, %v12591_v33  ;;  %v526_v13 = vcombine.high %v12293_v29, %v12293_v29 }
  0x4f   : > { %v3359_v11 = vrot.slane %v3351_v1, %v12260_v5  ;;  %v5503_v27 = vrot.slane %v5496_v32, %v12260_v5  ;;  %v12609_v15 = vrot.slane %v301_v3, %v12260_v5  ;;  %v331_v16 = vcombine.high %v12597_v4, %v12597_v4 }
  0x50   : > { %v3366_v24 = vrot.slane %v3352_v8, %v12260_v5  ;;  %v332_v26 = vcombine.high %v12600_v9, %v12600_v9  ;;  %v3270_v34 = vcombine.low %v12600_v9, %v330_v10  ;;  %v527_v2 = vcombine.high %v12456_v23, %v12456_v23 }
  0x51   : > { %v5504_v31 = vcombine.low %v12585_v48, %v5503_v27  ;;  %v333_v37 = vcombine.high %v12609_v15, %v12609_v15  ;;  %v3272_v38 = vcombine.low %v12609_v15, %v331_v16  ;;  %v3466_v58 = vcombine.low %v526_v13, %v12440_v7 }
  0x52   : > { %v3367_v57 = vcombine.low %v3359_v11, %v3366_v24  ;;  %v3271_v43 = vcombine.low %v332_v26, %v12597_v4  ;;  %v3280_v45 = vrot.slane %v3270_v34, %v12260_v5  ;;  %v3467_v59 = vcombine.low %v12456_v23, %v525_v50 }
  0x53   : > { %v3273_v61 = vcombine.low %v333_v37, %v12538_v0  ;;  %v3294_v51 = vrot.slane %v3272_v38, %v12260_v5  ;;  %v3468_v49 = vcombine.low %v527_v2, %v12337_v54  ;;  %v3476_v1 = vrot.slane %v3466_v58, %v12260_v5 }
  0x54   : > { %4658 = vrot.lane.b32.xlu1 %v3367_v57, %s12165_s10  ;;  %v3287_v32 = vrot.slane %v3271_v43, %v12260_v5  ;;  %v3483_v7 = vrot.slane %v3467_v59, %v12260_v5  ;;  %v622_v3 = vcombine.high %v12410_v60, %v12410_v60  ;;  %v623_v23 = vcombine.high %v12381_v21, %v12381_v21 }
  0x55   : > { %v3301_v50 = vrot.slane %v3273_v61, %v12260_v5  ;;  %v3490_v8 = vrot.slane %v3468_v49, %v12260_v5  ;;  %v4793_v54 = vcombine.low %v12323_v46, %v3476_v1  ;;  %v624_v10 = vcombine.high %v12422_v63, %v12422_v63 }
  0x56   : > { %v3302_v13 = vcombine.low %v3280_v45, %v3287_v32  ;;  %v3498_v11 = vcombine.low %v3476_v1, %v3483_v7  ;;  %v670_v27 = vcombine.high %v12406_v52, %v12406_v52  ;;  %v2149_v16 = vcombine.low %v623_v23, %v12410_v60 }
  0x57   : > { %v3303_v24 = vcombine.low %v3294_v51, %v3301_v50  ;;  %v4794_v26 = vcombine.low %v3483_v7, %v3490_v8  ;;  %v4801_v34 = vrot.slane %v4793_v54, %v12260_v5  ;;  %v3499_v2 = vcombine.low %v3490_v8, %v12512_v36 }
  0x58   : > { %5823 = vrot.lane.b32.xlu1 %v5504_v31, %s12167_s12  ;;  %v3310_v46 = vrot.slane %v3302_v13, %v12260_v5  ;;  %v3506_v37 = vrot.slane %v3498_v11, %v12260_v5  ;;  %v2150_v38 = vcombine.low %v12422_v63, %v622_v3  ;;  %v2151_v58 = vcombine.low %v624_v10, %v12406_v52  ;;  %v12663_v63 = vld [vmem:[%s12258_s9 + $0x40] sm:$0xff] }
  0x59   : > { %v3317_v57 = vrot.slane %v3303_v24, %v12260_v5  ;;  %v4808_v60 = vrot.slane %v4794_v26, %v12260_v5  ;;  %v3513_v43 = vrot.slane %v3499_v2, %v12260_v5  ;;  %v2152_v45 = vcombine.low %v12418_v55, %v670_v27 }
  0x5a   : > { %v2159_v36 = vrot.slane %v2149_v16, %v12260_v5  ;;  %v2166_v31 = vrot.slane %v2150_v38, %v12260_v5  ;;  %v2173_v59 = vrot.slane %v2151_v58, %v12260_v5  ;;  %v1742_v61 = vcombine.high %v12352_v62, %v12352_v62 }
  0x5b   : > { %v3318_v51 = vcombine.low %v3310_v46, %v3317_v57  ;;  %v4809_v49 = vcombine.low %v4801_v34, %v4808_v60  ;;  %v3514_v1 = vcombine.low %v3506_v37, %v3513_v43  ;;  %v2180_v32 = vrot.slane %v2152_v45, %v12260_v5 }
  0x5c   : > { %v2181_v7 = vcombine.low %v2159_v36, %v2166_v31  ;;  %v3517_v3 = vcombine.low %v1742_v61, %v12381_v21  ;;  %v3547_v23 = vcombine.low %v12517_v40, %v12520_v42  ;;  %v625_v50 = vcombine.high %v12378_v18, %v12378_v18 }
  0x5d   : > { %4656 = vrot.lane.b32.xlu0 %v3318_v51, %s12165_s10  ;;  %5405 = vrot.lane.b32.xlu1 %v4809_v49, %s12166_s11  ;;  %v2182_v62 = vcombine.low %v2173_v59, %v2180_v32  ;;  %v680_v8 = vrot.slane %v12663_v63, %v12260_v5  ;;  %v11748_v54 = vcombine.high %v12406_v52, %v12418_v55  ;;  %v12711_v59 = vld [vmem:[%s12258_s9 + $0x48] sm:$0xff] }
  0x5e   : > { %v2189_v10 = vrot.slane %v2181_v7, %v12260_v5  ;;  %v3539_v21 = vrot.slane %v3517_v3, %v12260_v5  ;;  %v3555_v40 = vrot.slane %v3547_v23, %v12260_v5  ;;  %v639_v42 = vrot.slane %v625_v50, %v12260_v5 }
  0x5f   : > { %v2196_v18 = vrot.slane %v2182_v62, %v12260_v5  ;;  %v688_v13 = vcombine.high %v680_v8, %v680_v8  ;;  %v12683_v11 = vrot.slane %v680_v8, %v12260_v5  ;;  %v3595_v27 = vrot.slane %v11748_v54, %v12260_v5 }
  0x60   : > { %v3548_v16 = vcombine.low %v3539_v21, %v12413_v44  ;;  %v641_v24 = vcombine.high %v639_v42, %v639_v42  ;;  %v655_v52 = vrot.slane %v639_v42, %v12260_v5  ;;  %v672_v26 = vcombine.high %v12418_v55, %v12418_v55 }
  0x61   : > { %4664 = vrot.lane.b32.xlu0 %v3514_v1, %s12165_s10  ;;  %v12691_v34 = vcombine.low %v2189_v10, %v2196_v18  ;;  %v12694_v2 = vrot.slane %v688_v13, %v12260_v5  ;;  %v718_v46 = vcombine.high %v12683_v11, %v12683_v11  ;;  %v3596_v44 = vcombine.low %v12450_v17, %v12453_v19 }
  0x62   : > { %v3562_v37 = vrot.slane %v3548_v16, %v12260_v5  ;;  %v669_v38 = vrot.slane %v641_v24, %v12260_v5  ;;  %v671_v58 = vcombine.high %v655_v52, %v655_v52  ;;  %v2198_v55 = vcombine.low %v672_v26, %v655_v52 }
  0x63   : > { %v3615_v57 = vcombine.low %v12694_v2, %v718_v46  ;;  %v11724_v60 = vcombine.high %v12683_v11, %v12694_v2  ;;  %v3597_v43 = vcombine.low %v12445_v14, %v3595_v27  ;;  %v12707_v45 = vrot.slane %v3596_v44, %v12260_v5 }
  0x64   : > { %v3563_v36 = vcombine.low %v3555_v40, %v3562_v37  ;;  %v3613_v31 = vcombine.low %v655_v52, %v669_v38  ;;  %v4852_v17 = vcombine.low %v671_v58, %v12683_v11  ;;  %v1743_v19 = vcombine.high %v669_v38, %v669_v38 }
  0x65   : > { %5829 = vrot.lane.b32.xlu0 %v12691_v34, %s12167_s12  ;;  %v12716_v61 = vrot.slane %v3615_v57, %v12260_v5  ;;  %v2199_v51 = vcombine.low %v669_v38, %v671_v58  ;;  %v2208_v49 = vrot.slane %v2198_v55, %v12260_v5  ;;  %v12720_v14 = vrot.slane %v11724_v60, %v12260_v5 }
  0x66   : > { %4666 = vrot.lane.b32.xlu1 %v3563_v36, %s12165_s10  ;;  %v3623_v1 = vrot.slane %v3613_v31, %v12260_v5  ;;  %v4859_v32 = vrot.slane %v4852_v17, %v12260_v5  ;;  %v5522_v7 = vcombine.low %v1743_v19, %v12694_v2  ;;  %v3611_v3 = vrot.slane %v3597_v43, %v12260_v5 }
  0x67   : > { %v2215_v23 = vrot.slane %v2199_v51, %v12260_v5  ;;  %v673_v50 = vcombine.high %v12663_v63, %v12663_v63  ;;  %v720_v62 = vcombine.high %v12694_v2, %v12694_v2  ;;  %v729_v8 = vrot.slane %v12711_v59, %v12260_v5 }
  0x68   : > { %v4860_v54 = vcombine.low %v3595_v27, %v3623_v1  ;;  %v4861_v10 = vcombine.low %v4859_v32, %v12716_v61  ;;  %v5529_v21 = vrot.slane %v5522_v7, %v12260_v5  ;;  %v3612_v40 = vcombine.low %v12707_v45, %v3611_v3 }
  0x69   : > { %v2230_v42 = vcombine.low %v2208_v49, %v2215_v23  ;;  %v687_v18 = vrot.slane %v673_v50, %v12260_v5  ;;  %v737_v13 = vcombine.high %v729_v8, %v729_v8  ;;  %v745_v16 = vrot.slane %v729_v8, %v12260_v5 }
  0x6a   : > { %v4868_v63 = vrot.slane %v4860_v54, %v12260_v5  ;;  %v4875_v24 = vrot.slane %v4861_v10, %v12260_v5  ;;  %v5530_v26 = vcombine.low %v5529_v21, %v12720_v14  ;;  %v11749_v46 = vcombine.high %v655_v52, %v669_v38 }
  0x6b   : > { %v12743_v27 = vrot.slane %v2230_v42, %v12260_v5  ;;  %v689_v44 = vcombine.high %v687_v18, %v687_v18  ;;  %v703_v37 = vrot.slane %v687_v18, %v12260_v5  ;;  %v759_v58 = vrot.slane %v737_v13, %v12260_v5  ;;  %v233_v42 = vld [vmem:[%s12258_s9 + $0x50] sm:$0xff] }
  0x6c   : > { %v4876_v55 = vcombine.low %v4868_v63, %v4875_v24  ;;  %v5537_v57 = vrot.slane %v5530_v26, %v12260_v5  ;;  %v767_v60 = vcombine.high %v745_v16, %v745_v16  ;;  %v3630_v43 = vrot.slane %v11749_v46, %v12260_v5 }
  0x6d   : > { %17553 = vst [vmem:[#allocation5_spill] sm:$0xff] %v12743_v27  ;;  %v717_v45 = vrot.slane %v689_v44, %v12260_v5  ;;  %v719_v36 = vcombine.high %v703_v37, %v703_v37  ;;  %v3616_v31 = vcombine.low %v720_v62, %v703_v37  ;;  %v2249_v17 = vcombine.low %v745_v16, %v759_v58 }
  0x6e   : > { %5411 = vrot.lane.b32.xlu0 %v4876_v55, %s12166_s11  ;;  %v5538_v52 = vcombine.low %v12743_v27, %v5537_v57  ;;  %v3664_v38 = vcombine.low %v759_v58, %v767_v60  ;;  %v11726_v19 = vcombine.high %v745_v16, %v759_v58  ;;  %v3645_v51 = vcombine.low %v3623_v1, %v3630_v43 }
  0x6f   : > { %v721_v49 = vcombine.high %v717_v45, %v717_v45  ;;  %v3644_v32 = vrot.slane %v3616_v31, %v12260_v5  ;;  %v3662_v7 = vcombine.low %v717_v45, %v719_v36  ;;  %v2247_v3 = vcombine.low %v703_v37, %v717_v45 }
  0x70   : > { %5831 = vrot.lane.b32.xlu1 %v5538_v52, %s12167_s12  ;;  %v12755_v23 = vrot.slane %v3664_v38, %v12260_v5  ;;  %v11725_v50 = vcombine.high %v703_v37, %v717_v45  ;;  %v2271_v62 = vrot.slane %v2249_v17, %v12260_v5  ;;  %v2278_v8 = vrot.slane %v11726_v19, %v12260_v5 }
  0x71   : > { %v3663_v54 = vcombine.low %v721_v49, %v745_v16  ;;  %v3672_v10 = vrot.slane %v3662_v7, %v12260_v5  ;;  %v2257_v1 = vrot.slane %v2247_v3, %v12260_v5  ;;  %v3646_v21 = vcombine.low %v12716_v61, %v3644_v32 }
  0x72   : > { %4668 = vrot.lane.b32.xlu0 %v3612_v40, %s12165_s10  ;;  %v2264_v18 = vrot.slane %v11725_v50, %v12260_v5  ;;  %v2280_v13 = vcombine.low %v2271_v62, %v2278_v8  ;;  %v3653_v63 = vrot.slane %v3645_v51, %v12260_v5  ;;  %v722_v24 = vcombine.high %v12711_v59, %v12711_v59 }
  0x73   : > { %v3679_v26 = vrot.slane %v3663_v54, %v12260_v5  ;;  %v4877_v16 = vcombine.low %v3644_v32, %v3672_v10  ;;  %v3660_v46 = vrot.slane %v3646_v21, %v12260_v5  ;;  %v769_v44 = vcombine.high %v759_v58, %v759_v58 }
  0x74   : > { %v2279_v37 = vcombine.low %v2257_v1, %v2264_v18  ;;  %v2294_v61 = vrot.slane %v2280_v13, %v12260_v5  ;;  %v736_v55 = vrot.slane %v722_v24, %v12260_v5  ;;  %v777_v40 = vrot.slane %v233_v42, %v12260_v5 }
  0x75   : > { %v4878_v57 = vcombine.low %v3679_v26, %v12755_v23  ;;  %v4885_v60 = vrot.slane %v4877_v16, %v12260_v5  ;;  %v3661_v43 = vcombine.low %v3653_v63, %v3660_v46  ;;  %v770_v45 = vcombine.high %v233_v42, %v233_v42 }
  0x76   : > { %v2287_v59 = vrot.slane %v2279_v37, %v12260_v5  ;;  %v738_v36 = vcombine.high %v736_v55, %v736_v55  ;;  %v752_v31 = vrot.slane %v736_v55, %v12260_v5  ;;  %v785_v17 = vcombine.high %v777_v40, %v777_v40 }
  0x77   : > { %v4892_v58 = vrot.slane %v4878_v57, %v12260_v5  ;;  %v12779_v52 = vrot.slane %v777_v40, %v12260_v5  ;;  %v784_v38 = vrot.slane %v770_v45, %v12260_v5  ;;  %v3694_v19 = vcombine.low %v3672_v10, %v3679_v26 }
  0x78   : > { %v12782_v51 = vcombine.low %v2287_v59, %v2294_v61  ;;  %v12785_v49 = vrot.slane %v738_v36, %v12260_v5  ;;  %v12787_v32 = vcombine.high %v752_v31, %v752_v31  ;;  %v12790_v7 = vrot.slane %v785_v17, %v12260_v5 }
  0x79   : > { %17554 = vst [vmem:[#allocation6_spill] sm:$0xff] %v12779_v52  ;;  %v4893_v3 = vcombine.low %v4885_v60, %v4892_v58  ;;  %v3665_v50 = vcombine.low %v769_v44, %v752_v31  ;;  %v800_v62 = vrot.slane %v784_v38, %v12260_v5  ;;  %v815_v8 = vcombine.high %v12779_v52, %v12779_v52  ;;  %v234_v44 = vld [vmem:[%s12258_s9 + $0x58] sm:$0xff] }
  0x7a   : > { %17555 = vst [vmem:[#allocation7_spill] sm:$0xff] %v12782_v51  ;;  %17556 = vst [vmem:[#allocation8_spill] sm:$0xff] %v12787_v32  ;;  %5833 = vrot.lane.b32.xlu0 %v12782_v51, %s12167_s12  ;;  %v3711_v54 = vcombine.low %v12785_v49, %v12787_v32  ;;  %v11750_v10 = vcombine.high %v12779_v52, %v12790_v7  ;;  %v4894_v1 = vcombine.low %v12779_v52, %v12790_v7 }
  0x7b   : > { %v817_v21 = vcombine.high %v12790_v7, %v12790_v7  ;;  %5413 = vrot.lane.b32.xlu1 %v4893_v3, %s12166_s11  ;;  %v3693_v42 = vrot.slane %v3665_v50, %v12260_v5  ;;  %v2296_v18 = vcombine.low %v752_v31, %v12785_v49  ;;  %v2298_v13 = vcombine.low %v12790_v7, %v815_v8 }
  0x7c   : > { %v11774_v63 = vcombine.high %v752_v31, %v12785_v49  ;;  %v12811_v24 = vrot.slane %v3711_v54, %v12260_v5  ;;  %v12814_v26 = vrot.slane %v11750_v10, %v12260_v5  ;;  %v4901_v16 = vrot.slane %v4894_v1, %v12260_v5 }
  0x7d   : > { %v2299_v46 = vcombine.low %v817_v21, %v800_v62  ;;  %v12819_v37 = vrot.slane %v2296_v18, %v12260_v5  ;;  %v2320_v61 = vrot.slane %v2298_v13, %v12260_v5  ;;  %v3695_v40 = vcombine.low %v12755_v23, %v3693_v42 }
  0x7e   : > { %v5546_v55 = vrot.slane %v11774_v63, %v12260_v5  ;;  %v4902_v57 = vcombine.low %v3693_v42, %v12811_v24  ;;  %v4903_v60 = vcombine.low %v4901_v16, %v12814_v26  ;;  %v3702_v59 = vrot.slane %v3694_v19, %v12260_v5 }
  0x7f   : > { %17557 = vst [vmem:[#allocation9_spill] sm:$0xff] %v12819_v37  ;;  %v2327_v45 = vrot.slane %v2299_v46, %v12260_v5  ;;  %4670 = vrot.lane.b32.xlu1 %v3661_v43, %s12165_s10  ;;  %v3709_v31 = vrot.slane %v3695_v40, %v12260_v5  ;;  %v786_v17 = vcombine.high %v784_v38, %v784_v38 }
  0x80   : > { %v5547_v36 = vcombine.low %v12819_v37, %v5546_v55  ;;  %v826_v58 = vrot.slane %v234_v44, %v12260_v5  ;;  %v4910_v3 = vrot.slane %v4902_v57, %v12260_v5  ;;  %v4917_v23 = vrot.slane %v4903_v60, %v12260_v5 }
  0x81   : > { %v2329_v50 = vcombine.low %v2320_v61, %v2327_v45  ;;  %v816_v8 = vcombine.high %v800_v62, %v800_v62  ;;  %v3710_v10 = vcombine.low %v3702_v59, %v3709_v31  ;;  %v814_v19 = vrot.slane %v786_v17, %v12260_v5 }
  0x82   : > { %v5554_v54 = vrot.slane %v5547_v36, %v12260_v5  ;;  %v834_v1 = vcombine.high %v826_v58, %v826_v58  ;;  %v4918_v43 = vcombine.low %v4910_v3, %v4917_v23  ;;  %v842_v38 = vrot.slane %v826_v58, %v12260_v5 }
  0x83   : > { %v12837_v21 = vrot.slane %v2329_v50, %v12260_v5  ;;  %v819_v42 = vcombine.high %v234_v44, %v234_v44  ;;  %v3714_v13 = vcombine.low %v800_v62, %v814_v19  ;;  %v11751_v63 = vcombine.high %v800_v62, %v814_v19 }
  0x84   : > { %v856_v18 = vrot.slane %v834_v1, %v12260_v5  ;;  %v818_v16 = vcombine.high %v814_v19, %v814_v19  ;;  %5415 = vrot.lane.b32.xlu0 %v4918_v43, %s12166_s11  ;;  %v864_v55 = vcombine.high %v842_v38, %v842_v38  ;;  %v2345_v40 = vcombine.low %v814_v19, %v816_v8  ;;  %v235_v1 = vld [vmem:[%s12258_s9 + $0x60] sm:$0xff] }
  0x85   : > { %17558 = vst [vmem:[#allocation10_spill] sm:$0xff] %v12837_v21  ;;  %v5555_v46 = vcombine.low %v5554_v54, %v12837_v21  ;;  %v833_v61 = vrot.slane %v819_v42, %v12260_v5  ;;  %v3742_v57 = vrot.slane %v3714_v13, %v12260_v5  ;;  %v12846_v44 = vrot.slane %v11751_v63, %v12260_v5 }
  0x86   : > { %v3761_v60 = vcombine.low %v842_v38, %v856_v18  ;;  %v11752_v45 = vcombine.high %v842_v38, %v856_v18  ;;  %v866_v59 = vcombine.high %v856_v18, %v856_v18  ;;  %v2346_v36 = vcombine.low %v818_v16, %v842_v38 }
  0x87   : > { %5835 = vrot.lane.b32.xlu1 %v5555_v46, %s12167_s12  ;;  %v12850_v62 = vrot.slane %v833_v61, %v12260_v5  ;;  %v2347_v31 = vcombine.low %v856_v18, %v864_v55  ;;  %v4919_v3 = vcombine.low %v3742_v57, %v12846_v44  ;;  %v2355_v23 = vrot.slane %v2345_v40, %v12260_v5 }
  0x88   : > { %v3777_v17 = vrot.slane %v3761_v60, %v12260_v5  ;;  %v12854_v58 = vrot.slane %v11752_v45, %v12260_v5  ;;  %4672 = vrot.lane.b32.xlu0 %v3710_v10, %s12165_s10  ;;  %v2362_v8 = vrot.slane %v2346_v36, %v12260_v5  ;;  %v1744_v19 = vcombine.high %v12785_v49, %v12785_v49 }
  0x89   : > { %v2348_v50 = vcombine.low %v866_v59, %v12850_v62  ;;  %v2369_v54 = vrot.slane %v2347_v31, %v12260_v5  ;;  %v4927_v38 = vrot.slane %v4919_v3, %v12260_v5  ;;  %v3744_v42 = vcombine.low %v12814_v26, %v3742_v57 }
  0x8a   : > { %v4920_v43 = vcombine.low %v3777_v17, %v12854_v58  ;;  %v835_v18 = vcombine.high %v833_v61, %v833_v61  ;;  %v2377_v10 = vcombine.low %v2355_v23, %v2362_v8  ;;  %v3712_v63 = vcombine.low %v1744_v19, %v12790_v7 }
  0x8b   : > { %v2376_v13 = vrot.slane %v2348_v50, %v12260_v5  ;;  %v865_v16 = vcombine.high %v12850_v62, %v12850_v62  ;;  %v3758_v49 = vrot.slane %v3744_v42, %v12260_v5  ;;  %v867_v40 = vcombine.high %v235_v1, %v235_v1 }
  0x8c   : > { %v4934_v46 = vrot.slane %v4920_v43, %v12260_v5  ;;  %v12875_v55 = vrot.slane %v835_v18, %v12260_v5  ;;  %v2385_v26 = vrot.slane %v2377_v10, %v12260_v5  ;;  %v3728_v61 = vrot.slane %v3712_v63, %v12260_v5 }
  0x8d   : > { %v2378_v60 = vcombine.low %v2369_v54, %v2376_v13  ;;  %v874_v57 = vrot.slane %v235_v1, %v12260_v5  ;;  %v881_v7 = vrot.slane %v867_v40, %v12260_v5  ;;  %v3792_v63 = vcombine.low %v12846_v44, %v3777_v17 }
  0x8e   : > { %v4935_v45 = vcombine.low %v4927_v38, %v4934_v46  ;;  %v3763_v59 = vcombine.low %v12850_v62, %v12875_v55  ;;  %v1745_v36 = vcombine.high %v12875_v55, %v12875_v55  ;;  %v3743_v3 = vcombine.low %v12811_v24, %v3728_v61 }
  0x8f   : > { %v2392_v31 = vrot.slane %v2378_v60, %v12260_v5  ;;  %v882_v23 = vcombine.high %v874_v57, %v874_v57  ;;  %v12888_v50 = vrot.slane %v874_v57, %v12260_v5  ;;  %v897_v8 = vrot.slane %v881_v7, %v12260_v5 }
  0x90   : > { %5417 = vrot.lane.b32.xlu1 %v4935_v45, %s12166_s11  ;;  %v3791_v54 = vrot.slane %v3763_v59, %v12260_v5  ;;  %v883_v19 = vcombine.high %v881_v7, %v881_v7  ;;  %v2394_v1 = vcombine.low %v12875_v55, %v865_v16  ;;  %v3751_v38 = vrot.slane %v3743_v3, %v12260_v5 }
  0x91   : > { %17559 = vst [vmem:[#allocation11_spill] sm:$0xff] %v12888_v50  ;;  %v12894_v43 = vcombine.low %v2385_v26, %v2392_v31  ;;  %v12898_v42 = vrot.slane %v882_v23, %v12260_v5  ;;  %v912_v24 = vcombine.high %v12888_v50, %v12888_v50  ;;  %v4936_v18 = vcombine.low %v865_v16, %v12888_v50 }
  0x92   : > { %v911_v13 = vrot.slane %v883_v19, %v12260_v5  ;;  %v12905_v10 = vrot.slane %v2394_v1, %v12260_v5  ;;  %v3759_v46 = vcombine.low %v3751_v38, %v3758_v49  ;;  %v3793_v44 = vcombine.low %v12854_v58, %v3791_v54  ;;  %v236_v19 = vld [vmem:[%s12258_s9 + $0x68] sm:$0xff] }
  0x93   : > { %17560 = vst [vmem:[#allocation12_spill] sm:$0xff] %v12894_v43  ;;  %17561 = vst [vmem:[#allocation13_spill] sm:$0xff] %v12898_v42  ;;  %5837 = vrot.lane.b32.xlu0 %v12894_v43, %s12167_s12  ;;  %v914_v40 = vcombine.high %v12898_v42, %v12898_v42  ;;  %v3810_v60 = vcombine.low %v12898_v42, %v912_v24  ;;  %v11727_v16 = vcombine.high %v12888_v50, %v12898_v42 }
  0x94   : > { %17562 = vst [vmem:[#allocation14_spill] sm:$0xff] %v12905_v10  ;;  %v4943_v26 = vrot.slane %v4936_v18, %v12260_v5  ;;  %v2397_v61 = vcombine.low %v897_v8, %v911_v13  ;;  %v5556_v57 = vcombine.low %v1745_v36, %v12898_v42  ;;  %4674 = vrot.lane.b32.xlu1 %v3759_v46, %s12165_s10 }
  0x95   : > { %v3811_v17 = vcombine.low %v914_v40, %v897_v8  ;;  %v3826_v49 = vrot.slane %v3810_v60, %v12260_v5  ;;  %v2418_v45 = vrot.slane %v11727_v16, %v12260_v5  ;;  %v3800_v7 = vrot.slane %v3792_v63, %v12260_v5 }
  0x96   : > { %v4944_v59 = vcombine.low %v3791_v54, %v4943_v26  ;;  %v2425_v31 = vrot.slane %v2397_v61, %v12260_v5  ;;  %v5563_v3 = vrot.slane %v5556_v57, %v12260_v5  ;;  %v3807_v23 = vrot.slane %v3793_v44, %v12260_v5 }
  0x97   : > { %v3833_v36 = vrot.slane %v3811_v17, %v12260_v5  ;;  %v913_v58 = vcombine.high %v897_v8, %v897_v8  ;;  %v915_v1 = vcombine.high %v911_v13, %v911_v13  ;;  %v916_v38 = vcombine.high %v236_v19, %v236_v19 }
  0x98   : > { %v4952_v24 = vrot.slane %v4944_v59, %v12260_v5  ;;  %v2427_v18 = vcombine.low %v2418_v45, %v2425_v31  ;;  %v5564_v46 = vcombine.low %v12905_v10, %v5563_v3  ;;  %v3808_v40 = vcombine.low %v3800_v7, %v3807_v23 }
  0x99   : > { %v4945_v63 = vcombine.low %v3826_v49, %v3833_v36  ;;  %v923_v54 = vrot.slane %v236_v19, %v12260_v5  ;;  %v930_v60 = vrot.slane %v916_v38, %v12260_v5  ;;  %v3812_v16 = vcombine.low %v911_v13, %v913_v58 }
  0x9a   : > { %v12932_v26 = vrot.slane %v2427_v18, %v12260_v5  ;;  %v5571_v61 = vrot.slane %v5564_v46, %v12260_v5  ;;  %v11728_v57 = vcombine.high %v897_v8, %v911_v13  ;;  %v11753_v44 = vcombine.high %v12850_v62, %v12875_v55 }
  0x9b   : > { %v4959_v17 = vrot.slane %v4945_v63, %v12260_v5  ;;  %v931_v45 = vcombine.high %v923_v54, %v923_v54  ;;  %v939_v7 = vrot.slane %v923_v54, %v12260_v5  ;;  %v12940_v59 = vrot.slane %v930_v60, %v12260_v5 }
  0x9c   : > { %17563 = vst [vmem:[#allocation15_spill] sm:$0xff] %v12932_v26  ;;  %v5572_v31 = vcombine.low %v5571_v61, %v12932_v26  ;;  %v3840_v3 = vrot.slane %v3812_v16, %v12260_v5  ;;  %v932_v23 = vcombine.high %v930_v60, %v930_v60  ;;  %v2453_v19 = vrot.slane %v11728_v57, %v12260_v5 }
  0x9d   : > { %v4960_v8 = vcombine.low %v4952_v24, %v4959_v17  ;;  %v953_v13 = vrot.slane %v931_v45, %v12260_v5  ;;  %v961_v62 = vcombine.high %v939_v7, %v939_v7  ;;  %v3858_v55 = vcombine.low %v915_v1, %v939_v7  ;;  %v237_v1 = vld [vmem:[%s12258_s9 + $0x70] sm:$0xff] }
  0x9e   : > { %5839 = vrot.lane.b32.xlu1 %v5572_v31, %s12167_s12  ;;  %v12948_v58 = vrot.slane %v932_v23, %v12260_v5  ;;  %v3819_v38 = vrot.slane %v11753_v44, %v12260_v5  ;;  %v3842_v18 = vcombine.low %v3833_v36, %v3840_v3  ;;  %v12953_v46 = vcombine.high %v12940_v59, %v12940_v59 }
  0x9f   : > { %5419 = vrot.lane.b32.xlu0 %v4960_v8, %s12166_s11  ;;  %v963_v63 = vcombine.high %v953_v13, %v953_v13  ;;  %v3859_v24 = vcombine.low %v953_v13, %v961_v62  ;;  %v3868_v54 = vrot.slane %v3858_v55, %v12260_v5  ;;  %v2444_v60 = vcombine.low %v939_v7, %v953_v13 }
  0xa0   : > { %17564 = vst [vmem:[#allocation16_spill] sm:$0xff] %v12953_v46  ;;  %v11729_v16 = vcombine.high %v939_v7, %v953_v13  ;;  %v2446_v61 = vcombine.low %v12940_v59, %v12948_v58  ;;  %v3841_v57 = vcombine.low %v3819_v38, %v3826_v49  ;;  %v3856_v44 = vrot.slane %v3842_v18, %v12260_v5 }
  0xa1   : > { %v3860_v36 = vcombine.low %v963_v63, %v12940_v59  ;;  %v3875_v17 = vrot.slane %v3859_v24, %v12260_v5  ;;  %v4961_v45 = vcombine.low %v3840_v3, %v3868_v54  ;;  %v2460_v31 = vrot.slane %v2444_v60, %v12260_v5 }
  0xa2   : > { %v2467_v23 = vrot.slane %v11729_v16, %v12260_v5  ;;  %v2474_v8 = vrot.slane %v2446_v61, %v12260_v5  ;;  %v3849_v62 = vrot.slane %v3841_v57, %v12260_v5  ;;  %v964_v7 = vcombine.high %v237_v1, %v237_v1 }
  0xa3   : > { %4676 = vrot.lane.b32.xlu0 %v3808_v40, %s12165_s10  ;;  %v3882_v49 = vrot.slane %v3860_v36, %v12260_v5  ;;  %v4969_v13 = vrot.slane %v4961_v45, %v12260_v5  ;;  %v2475_v55 = vcombine.low %v2453_v19, %v2460_v31  ;;  %v971_v38 = vrot.slane %v237_v1, %v12260_v5 }
  0xa4   : > { %v2476_v18 = vcombine.low %v2467_v23, %v2474_v8  ;;  %v3857_v3 = vcombine.low %v3849_v62, %v3856_v44  ;;  %v978_v63 = vrot.slane %v964_v7, %v12260_v5  ;;  %v3861_v24 = vcombine.low %v12948_v58, %v12953_v46 }
  0xa5   : > { %v4962_v60 = vcombine.low %v3875_v17, %v3882_v49  ;;  %v2483_v16 = vrot.slane %v2475_v55, %v12260_v5  ;;  %v979_v61 = vcombine.high %v971_v38, %v971_v38  ;;  %v12976_v40 = vrot.slane %v971_v38, %v12260_v5 }
  0xa6   : > { %v2490_v57 = vrot.slane %v2476_v18, %v12260_v5  ;;  %v980_v36 = vcombine.high %v978_v63, %v978_v63  ;;  %v994_v19 = vrot.slane %v978_v63, %v12260_v5  ;;  %v3889_v1 = vrot.slane %v3861_v24, %v12260_v5 }
  0xa7   : > { %17565 = vst [vmem:[#allocation17_spill] sm:$0xff] %v12976_v40  ;;  %v4976_v44 = vrot.slane %v4962_v60, %v12260_v5  ;;  %v12983_v45 = vrot.slane %v979_v61, %v12260_v5  ;;  %v1009_v31 = vcombine.high %v12976_v40, %v12976_v40  ;;  %v11775_v23 = vcombine.high %v12940_v59, %v12948_v58 }
  0xa8   : > { %v12989_v8 = vcombine.low %v2483_v16, %v2490_v57  ;;  %v1008_v62 = vrot.slane %v980_v36, %v12260_v5  ;;  %v1010_v7 = vcombine.high %v994_v19, %v994_v19  ;;  %v3890_v55 = vcombine.low %v3868_v54, %v3875_v17  ;;  %v238_v54 = vld [vmem:[%s12258_s9 + $0x78] sm:$0xff] }
  0xa9   : > { %v4977_v38 = vcombine.low %v4969_v13, %v4976_v44  ;;  %v11754_v18 = vcombine.high %v12976_v40, %v12983_v45  ;;  %v4978_v63 = vcombine.low %v12976_v40, %v12983_v45  ;;  %v1011_v24 = vcombine.high %v12983_v45, %v12983_v45 }
  0xaa   : > { %17566 = vst [vmem:[#allocation18_spill] sm:$0xff] %v12989_v8  ;;  %5841 = vrot.lane.b32.xlu0 %v12989_v8, %s12167_s12  ;;  %v3909_v59 = vcombine.low %v994_v19, %v1008_v62  ;;  %v2493_v60 = vcombine.low %v12983_v45, %v1009_v31  ;;  %v2495_v16 = vcombine.low %v1008_v62, %v1010_v7 }
  0xab   : > { %v5580_v61 = vrot.slane %v11775_v23, %v12260_v5  ;;  %5421 = vrot.lane.b32.xlu1 %v4977_v38, %s12166_s11  ;;  %v13005_v17 = vrot.slane %v11754_v18, %v12260_v5  ;;  %v4985_v13 = vrot.slane %v4978_v63, %v12260_v5  ;;  %v2494_v57 = vcombine.low %v1011_v24, %v994_v19 }
  0xac   : > { %v3891_v36 = vcombine.low %v3882_v49, %v3889_v1  ;;  %v13009_v44 = vrot.slane %v3909_v59, %v12260_v5  ;;  %v13012_v8 = vrot.slane %v2493_v60, %v12260_v5  ;;  %v2523_v31 = vrot.slane %v2495_v16, %v12260_v5 }
  0xad   : > { %v3898_v23 = vrot.slane %v3890_v55, %v12260_v5  ;;  %v4986_v7 = vcombine.low %v3889_v1, %v4985_v13  ;;  %v2516_v38 = vrot.slane %v2494_v57, %v12260_v5  ;;  %v1013_v26 = vcombine.high %v238_v54, %v238_v54 }
  0xae   : > { %17567 = vst [vmem:[#allocation19_spill] sm:$0xff] %v13012_v8  ;;  %v3905_v18 = vrot.slane %v3891_v36, %v12260_v5  ;;  %v4987_v63 = vcombine.low %v13005_v17, %v13009_v44  ;;  %v5581_v49 = vcombine.low %v5580_v61, %v13012_v8  ;;  %v1020_v24 = vrot.slane %v238_v54, %v12260_v5 }
  0xaf   : > { %v11755_v59 = vcombine.high %v994_v19, %v1008_v62  ;;  %4678 = vrot.lane.b32.xlu1 %v3857_v3, %s12165_s10  ;;  %v4994_v60 = vrot.slane %v4986_v7, %v12260_v5  ;;  %v2525_v16 = vcombine.low %v2516_v38, %v2523_v31  ;;  %v1027_v1 = vrot.slane %v1013_v26, %v12260_v5 }
  0xb0   : > { %v3906_v55 = vcombine.low %v3898_v23, %v3905_v18  ;;  %v5001_v13 = vrot.slane %v4987_v63, %v12260_v5  ;;  %v5588_v57 = vrot.slane %v5581_v49, %v12260_v5  ;;  %v1028_v36 = vcombine.high %v1020_v24, %v1020_v24 }
  0xb1   : > { %v1036_v10 = vrot.slane %v1020_v24, %v12260_v5  ;;  %v13029_v61 = vrot.slane %v2525_v16, %v12260_v5  ;;  %v1029_v54 = vcombine.high %v1027_v1, %v1027_v1  ;;  %v13032_v19 = vrot.slane %v1027_v1, %v12260_v5 }
  0xb2   : > { %v3938_v3 = vrot.slane %v11755_v59, %v12260_v5  ;;  %v5002_v31 = vcombine.low %v4994_v60, %v5001_v13  ;;  %v1050_v23 = vrot.slane %v1028_v36, %v12260_v5  ;;  %v1012_v26 = vcombine.high %v1008_v62, %v1008_v62  ;;  %v239_v36 = vld [vmem:[%s12258_s9 + $0x80] sm:$0xff] }
  0xb3   : > { %17568 = vst [vmem:[#allocation20_spill] sm:$0xff] %v13029_v61  ;;  %v1058_v7 = vcombine.high %v1036_v10, %v1036_v10  ;;  %v5589_v38 = vcombine.low %v5588_v57, %v13029_v61  ;;  %v13038_v18 = vrot.slane %v1029_v54, %v12260_v5  ;;  %v1059_v63 = vcombine.high %v13032_v19, %v13032_v19 }
  0xb4   : > { %v1746_v49 = vcombine.high %v12948_v58, %v12948_v58  ;;  %5423 = vrot.lane.b32.xlu0 %v5002_v31, %s12166_s11  ;;  %v3956_v24 = vcombine.low %v1036_v10, %v1050_v23  ;;  %v11756_v59 = vcombine.high %v1036_v10, %v1050_v23  ;;  %v1060_v60 = vcombine.high %v1050_v23, %v1050_v23 }
  0xb5   : > { %v2541_v16 = vcombine.low %v1012_v26, %v1036_v10  ;;  %5843 = vrot.lane.b32.xlu1 %v5589_v38, %s12167_s12  ;;  %v3958_v62 = vcombine.low %v13032_v19, %v13038_v18  ;;  %v2542_v1 = vcombine.low %v1050_v23, %v1058_v7  ;;  %v2544_v13 = vcombine.low %v13038_v18, %v1059_v63 }
  0xb6   : > { %v3907_v57 = vcombine.low %v1746_v49, %v12983_v45  ;;  %v13052_v54 = vrot.slane %v3956_v24, %v12260_v5  ;;  %v13055_v58 = vrot.slane %v11756_v59, %v12260_v5  ;;  %v2543_v31 = vcombine.low %v1060_v60, %v13032_v19 }
  0xb7   : > { %v2551_v10 = vrot.slane %v2541_v16, %v12260_v5  ;;  %v13060_v26 = vrot.slane %v3958_v62, %v12260_v5  ;;  %v2558_v23 = vrot.slane %v2542_v1, %v12260_v5  ;;  %v2572_v7 = vrot.slane %v2544_v13, %v12260_v5 }
  0xb8   : > { %v3917_v45 = vrot.slane %v3907_v57, %v12260_v5  ;;  %4680 = vrot.lane.b32.xlu0 %v3906_v55, %s12165_s10  ;;  %v5003_v38 = vcombine.low %v3938_v3, %v13052_v54  ;;  %v2565_v49 = vrot.slane %v2543_v31, %v12260_v5  ;;  %v3940_v24 = vcombine.low %v13009_v44, %v3938_v3 }
  0xb9   : > { %v1061_v59 = vcombine.high %v239_v36, %v239_v36  ;;  %v5004_v60 = vcombine.low %v13055_v58, %v13060_v26  ;;  %v2573_v16 = vcombine.low %v2551_v10, %v2558_v23  ;;  %v1068_v1 = vrot.slane %v239_v36, %v12260_v5 }
  0xba   : > { %v3939_v62 = vcombine.low %v3917_v45, %v13005_v17  ;;  %v5011_v13 = vrot.slane %v5003_v38, %v12260_v5  ;;  %v2574_v57 = vcombine.low %v2565_v49, %v2572_v7  ;;  %v3954_v55 = vrot.slane %v3940_v24, %v12260_v5 }
  0xbb   : > { %v1075_v61 = vrot.slane %v1061_v59, %v12260_v5  ;;  %v5018_v31 = vrot.slane %v5004_v60, %v12260_v5  ;;  %v2581_v44 = vrot.slane %v2573_v16, %v12260_v5  ;;  %v1076_v8 = vcombine.high %v1068_v1, %v1068_v1 }
  0xbc   : > { %v3947_v3 = vrot.slane %v3939_v62, %v12260_v5  ;;  %v2588_v10 = vrot.slane %v2574_v57, %v12260_v5  ;;  %v13081_v17 = vrot.slane %v1068_v1, %v12260_v5  ;;  %v1747_v49 = vcombine.high %v13038_v18, %v13038_v18 }
  0xbd   : > { %v1077_v23 = vcombine.high %v1075_v61, %v1075_v61  ;;  %v1091_v36 = vrot.slane %v1075_v61, %v12260_v5  ;;  %v5019_v7 = vcombine.low %v5011_v13, %v5018_v31  ;;  %v13085_v38 = vrot.slane %v1076_v8, %v12260_v5 }
  0xbe   : > { %17569 = vst [vmem:[#allocation21_spill] sm:$0xff] %v13081_v17  ;;  %v3955_v45 = vcombine.low %v3947_v3, %v3954_v55  ;;  %v13089_v24 = vcombine.low %v2581_v44, %v2588_v10  ;;  %v1106_v60 = vcombine.high %v13081_v17, %v13081_v17  ;;  %v5020_v8 = vcombine.low %v1059_v63, %v13081_v17 }
  0xbf   : > { %17570 = vst [vmem:[#allocation22_spill] sm:$0xff] %v13085_v38  ;;  %v1105_v59 = vrot.slane %v1077_v23, %v12260_v5  ;;  %v1107_v16 = vcombine.high %v1091_v36, %v1091_v36  ;;  %5425 = vrot.lane.b32.xlu1 %v5019_v7, %s12166_s11  ;;  %v1108_v61 = vcombine.high %v13085_v38, %v13085_v38  ;;  %v240_v23 = vld [vmem:[%s12258_s9 + $0x88] sm:$0xff] }
  0xc0   : > { %17571 = vst [vmem:[#allocation23_spill] sm:$0xff] %v13089_v24  ;;  %v11730_v62 = vcombine.high %v13081_v17, %v13085_v38  ;;  %v5590_v1 = vcombine.low %v1747_v49, %v13085_v38  ;;  %5845 = vrot.lane.b32.xlu0 %v13089_v24, %s12167_s12  ;;  %v4005_v13 = vcombine.low %v13085_v38, %v1106_v60  ;;  %v241_v17 = vld [vmem:[%s12258_s9 + $0x90] sm:$0xff] }
  0xc1   : > { %v4007_v57 = vcombine.low %v1105_v59, %v1107_v16  ;;  %v2592_v55 = vcombine.low %v1091_v36, %v1105_v59  ;;  %v11731_v31 = vcombine.high %v1091_v36, %v1105_v59  ;;  %v4006_v44 = vcombine.low %v1108_v61, %v1091_v36 }
  0xc2   : > { %v5027_v3 = vrot.slane %v5020_v8, %v12260_v5  ;;  %v13106_v10 = vrot.slane %v11730_v62, %v12260_v5  ;;  %v5597_v63 = vrot.slane %v5590_v1, %v12260_v5  ;;  %v4015_v7 = vrot.slane %v4005_v13, %v12260_v5 }
  0xc3   : > { %v13112_v49 = vrot.slane %v4007_v57, %v12260_v5  ;;  %v2614_v60 = vrot.slane %v2592_v55, %v12260_v5  ;;  %v2621_v16 = vrot.slane %v11731_v31, %v12260_v5  ;;  %4682 = vrot.lane.b32.xlu1 %v3955_v45, %s12165_s10  ;;  %v4022_v36 = vrot.slane %v4006_v44, %v12260_v5 }
  0xc4   : > { %17572 = vst [vmem:[#allocation24_spill] sm:$0xff] %v13106_v10  ;;  %v5598_v61 = vcombine.low %v5597_v63, %v13106_v10  ;;  %v11757_v8 = vcombine.high %v13032_v19, %v13038_v18  ;;  %v3988_v62 = vcombine.low %v13052_v54, %v13055_v58  ;;  %v5028_v1 = vcombine.low %v5027_v3, %v4015_v7 }
  0xc5   : > { %v2623_v13 = vcombine.low %v2614_v60, %v2621_v16  ;;  %v1109_v57 = vcombine.high %v1105_v59, %v1105_v59  ;;  %v1110_v24 = vcombine.high %v240_v23, %v240_v23  ;;  %v5029_v55 = vcombine.low %v4022_v36, %v13112_v49 }
  0xc6   : > { %v5605_v31 = vrot.slane %v5598_v61, %v12260_v5  ;;  %v3987_v45 = vrot.slane %v11757_v8, %v12260_v5  ;;  %v3996_v44 = vrot.slane %v3988_v62, %v12260_v5  ;;  %v5036_v63 = vrot.slane %v5028_v1, %v12260_v5 }
  0xc7   : > { %v13130_v19 = vrot.slane %v2623_v13, %v12260_v5  ;;  %v1117_v18 = vrot.slane %v240_v23, %v12260_v5  ;;  %v1124_v54 = vrot.slane %v1110_v24, %v12260_v5  ;;  %v5043_v58 = vrot.slane %v5029_v55, %v12260_v5 }
  0xc8   : > { %v3989_v59 = vcombine.low %v13060_v26, %v3987_v45  ;;  %v4037_v3 = vcombine.low %v4015_v7, %v4022_v36  ;;  %v1158_v60 = vcombine.high %v241_v17, %v241_v17  ;;  %v1165_v45 = vrot.slane %v241_v17, %v12260_v5 }
  0xc9   : > { %17573 = vst [vmem:[#allocation25_spill] sm:$0xff] %v13130_v19  ;;  %v5606_v16 = vcombine.low %v5605_v31, %v13130_v19  ;;  %v1125_v61 = vcombine.high %v1117_v18, %v1117_v18  ;;  %v1126_v8 = vcombine.high %v1124_v54, %v1124_v54  ;;  %v1133_v62 = vrot.slane %v1117_v18, %v12260_v5 }
  0xca   : > { %v5044_v1 = vcombine.low %v5036_v63, %v5043_v58  ;;  %v4003_v13 = vrot.slane %v3989_v59, %v12260_v5  ;;  %v1140_v10 = vrot.slane %v1124_v54, %v12260_v5  ;;  %v13141_v23 = vrot.slane %v4037_v3, %v12260_v5 }
  0xcb   : > { %5847 = vrot.lane.b32.xlu1 %v5606_v16, %s12167_s12  ;;  %v1147_v26 = vrot.slane %v1125_v61, %v12260_v5  ;;  %v13146_v24 = vrot.slane %v1126_v8, %v12260_v5  ;;  %v1155_v7 = vcombine.high %v1133_v62, %v1133_v62  ;;  %v4008_v36 = vcombine.low %v1109_v57, %v1133_v62 }
  0xcc   : > { %5427 = vrot.lane.b32.xlu0 %v5044_v1, %s12166_s11  ;;  %v4004_v55 = vcombine.low %v3996_v44, %v4003_v13  ;;  %v13149_v31 = vcombine.high %v1140_v10, %v1140_v10  ;;  %v1172_v63 = vrot.slane %v1158_v60, %v12260_v5 }
  0xcd   : > { %v1157_v18 = vcombine.high %v1147_v26, %v1147_v26  ;;  %v4036_v54 = vrot.slane %v4008_v36, %v12260_v5  ;;  %v4054_v58 = vcombine.low %v1147_v26, %v1155_v7  ;;  %v2639_v59 = vcombine.low %v1133_v62, %v1147_v26 }
  0xce   : > { %17574 = vst [vmem:[#allocation26_spill] sm:$0xff] %v13149_v31  ;;  %v4056_v3 = vcombine.low %v13146_v24, %v13149_v31  ;;  %v11732_v16 = vcombine.high %v1133_v62, %v1147_v26  ;;  %v2641_v57 = vcombine.low %v1140_v10, %v13146_v24  ;;  %v11776_v61 = vcombine.high %v1140_v10, %v13146_v24 }
  0xcf   : > { %v4055_v44 = vcombine.low %v1157_v18, %v1140_v10  ;;  %v4064_v8 = vrot.slane %v4054_v58, %v12260_v5  ;;  %v2649_v17 = vrot.slane %v2639_v59, %v12260_v5  ;;  %v4038_v60 = vcombine.low %v13112_v49, %v4036_v54 }
  0xd0   : > { %4684 = vrot.lane.b32.xlu0 %v4004_v55, %s12165_s10  ;;  %v13163_v1 = vrot.slane %v4056_v3, %v12260_v5  ;;  %v2656_v13 = vrot.slane %v11732_v16, %v12260_v5  ;;  %v13167_v62 = vrot.slane %v2641_v57, %v12260_v5  ;;  %v5614_v26 = vrot.slane %v11776_v61, %v12260_v5  ;;  %v242_v3 = vld [vmem:[%s12258_s9 + $0x98] sm:$0xff] }
  0xd1   : > { %v4071_v10 = vrot.slane %v4055_v44, %v12260_v5  ;;  %v5045_v7 = vcombine.low %v4036_v54, %v4064_v8  ;;  %v4052_v36 = vrot.slane %v4038_v60, %v12260_v5  ;;  %v1173_v18 = vcombine.high %v1165_v45, %v1165_v45 }
  0xd2   : > { %17575 = vst [vmem:[#allocation27_spill] sm:$0xff] %v13167_v62  ;;  %v2671_v58 = vcombine.low %v2649_v17, %v2656_v13  ;;  %v5615_v49 = vcombine.low %v13167_v62, %v5614_v26  ;;  %v1174_v55 = vcombine.high %v1172_v63, %v1172_v63  ;;  %v13174_v59 = vrot.slane %v1165_v45, %v12260_v5 }
  0xd3   : > { %v5046_v16 = vcombine.low %v4071_v10, %v13163_v1  ;;  %v5053_v57 = vrot.slane %v5045_v7, %v12260_v5  ;;  %v4053_v61 = vcombine.low %v13141_v23, %v4052_v36  ;;  %v1188_v44 = vrot.slane %v1172_v63, %v12260_v5 }
  0xd4   : > { %17576 = vst [vmem:[#allocation28_spill] sm:$0xff] %v13174_v59  ;;  %v13182_v54 = vrot.slane %v2671_v58, %v12260_v5  ;;  %v5622_v17 = vrot.slane %v5615_v49, %v12260_v5  ;;  %v1195_v60 = vrot.slane %v1173_v18, %v12260_v5  ;;  %v1202_v13 = vrot.slane %v1174_v55, %v12260_v5 }
  0xd5   : > { %v5060_v45 = vrot.slane %v5046_v16, %v12260_v5  ;;  %v1203_v26 = vcombine.high %v13174_v59, %v13174_v59  ;;  %v1204_v19 = vcombine.high %v1188_v44, %v1188_v44  ;;  %v1214_v7 = vrot.slane %v242_v3, %v12260_v5 }
  0xd6   : > { %17577 = vst [vmem:[#allocation29_spill] sm:$0xff] %v13182_v54  ;;  %v5623_v23 = vcombine.low %v13182_v54, %v5622_v17  ;;  %v11758_v63 = vcombine.high %v13174_v59, %v1195_v60  ;;  %v4104_v36 = vcombine.low %v1188_v44, %v1202_v13  ;;  %v11759_v58 = vcombine.high %v1188_v44, %v1202_v13 }
  0xd7   : > { %v5061_v62 = vcombine.low %v5053_v57, %v5060_v45  ;;  %v5062_v49 = vcombine.low %v13174_v59, %v1195_v60  ;;  %v1205_v18 = vcombine.high %v1195_v60, %v1195_v60  ;;  %v1206_v31 = vcombine.high %v1202_v13, %v1202_v13 }
  0xd8   : > { %5849 = vrot.lane.b32.xlu0 %v5623_v23, %s12167_s12  ;;  %v13196_v55 = vrot.slane %v11758_v63, %v12260_v5  ;;  %v13199_v16 = vrot.slane %v4104_v36, %v12260_v5  ;;  %v13202_v17 = vrot.slane %v11759_v58, %v12260_v5  ;;  %v1230_v54 = vrot.slane %v1214_v7, %v12260_v5 }
  0xd9   : > { %5429 = vrot.lane.b32.xlu1 %v5061_v62, %s12166_s11  ;;  %v5069_v57 = vrot.slane %v5062_v49, %v12260_v5  ;;  %v2688_v45 = vcombine.low %v1195_v60, %v1203_v26  ;;  %v2689_v59 = vcombine.low %v1205_v18, %v1188_v44  ;;  %v2690_v38 = vcombine.low %v1202_v13, %v1204_v19  ;;  %v13216_v49 = vld [vmem:[%s12258_s9 + $0xa0] sm:$0xff] }
  0xda   : > { %v5071_v23 = vcombine.low %v13199_v16, %v13202_v17  ;;  %v2691_v63 = vcombine.low %v1206_v31, %v1230_v54  ;;  %v1748_v36 = vcombine.high %v13146_v24, %v13146_v24  ;;  %v4086_v46 = vcombine.low %v4064_v8, %v4071_v10 }
  0xdb   : > { %v5070_v58 = vcombine.low %v5069_v57, %v13196_v55  ;;  %v2698_v40 = vrot.slane %v2688_v45, %v12260_v5  ;;  %v2705_v50 = vrot.slane %v2689_v59, %v12260_v5  ;;  %v2712_v62 = vrot.slane %v2690_v38, %v12260_v5 }
  0xdc   : > { %v5085_v19 = vrot.slane %v5071_v23, %v12260_v5  ;;  %v2719_v44 = vrot.slane %v2691_v63, %v12260_v5  ;;  %v4057_v13 = vcombine.low %v1748_v36, %v1195_v60  ;;  %v4094_v31 = vrot.slane %v4086_v46, %v12260_v5 }
  0xdd   : > { %4686 = vrot.lane.b32.xlu1 %v4053_v61, %s12165_s10  ;;  %v5078_v24 = vrot.slane %v5070_v58, %v12260_v5  ;;  %v2720_v8 = vcombine.low %v2698_v40, %v2705_v50  ;;  %v1207_v10 = vcombine.high %v242_v3, %v242_v3  ;;  %v1222_v26 = vcombine.high %v1214_v7, %v1214_v7 }
  0xde   : > { %v2721_v18 = vcombine.low %v2712_v62, %v2719_v44  ;;  %v4085_v59 = vrot.slane %v4057_v13, %v12260_v5  ;;  %v1262_v38 = vrot.slane %v13216_v49, %v12260_v5  ;;  %v1252_v57 = vcombine.high %v1230_v54, %v1230_v54 }
  0xdf   : > { %v5086_v45 = vcombine.low %v5078_v24, %v5085_v19  ;;  %v2728_v23 = vrot.slane %v2720_v8, %v12260_v5  ;;  %v1221_v60 = vrot.slane %v1207_v10, %v12260_v5  ;;  %v1244_v46 = vrot.slane %v1222_v26, %v12260_v5 }
  0xe0   : > { %v2735_v61 = vrot.slane %v2721_v18, %v12260_v5  ;;  %v4087_v50 = vcombine.low %v13163_v1, %v4085_v59  ;;  %v1270_v40 = vcombine.high %v1262_v38, %v1262_v38  ;;  %v13232_v3 = vrot.slane %v1262_v38, %v12260_v5 }
  0xe1   : > { %5431 = vrot.lane.b32.xlu0 %v5086_v45, %s12166_s11  ;;  %v1223_v7 = vcombine.high %v1221_v60, %v1221_v60  ;;  %v1237_v63 = vrot.slane %v1221_v60, %v12260_v5  ;;  %v4106_v36 = vcombine.low %v1230_v54, %v1244_v46  ;;  %v11760_v58 = vcombine.high %v1230_v54, %v1244_v46 }
  0xe2   : > { %17578 = vst [vmem:[#allocation30_spill] sm:$0xff] %v13232_v3  ;;  %v13236_v62 = vcombine.low %v2728_v23, %v2735_v61  ;;  %v4101_v19 = vrot.slane %v4087_v50, %v12260_v5  ;;  %v1254_v44 = vcombine.high %v1244_v46, %v1244_v46  ;;  %v13240_v13 = vrot.slane %v1270_v40, %v12260_v5 }
  0xe3   : > { %v1251_v1 = vrot.slane %v1223_v7, %v12260_v5  ;;  %v1253_v24 = vcombine.high %v1237_v63, %v1237_v63  ;;  %v4134_v8 = vrot.slane %v4106_v36, %v12260_v5  ;;  %v13245_v10 = vrot.slane %v11760_v58, %v12260_v5  ;;  %v244_v7 = vld [vmem:[%s12258_s9 + $0xa8] sm:$0xff]  ;;  %v13262_v36 = vpop.permute.xlu0 %5401 }
  0xe4   : > { %17579 = vst [vmem:[#allocation31_spill] sm:$0xff] %v13236_v62  ;;  %17580 = vst [vmem:[#allocation32_spill] sm:$0xff] %v13240_v13  ;;  %5851 = vrot.lane.b32.xlu1 %v13236_v62, %s12167_s12  ;;  %v4102_v54 = vcombine.low %v4094_v31, %v4101_v19  ;;  %v2737_v26 = vcombine.low %v1244_v46, %v1252_v57  ;;  %v2738_v18 = vcombine.low %v1254_v44, %v1237_v63 }
  0xe5   : > { %v4135_v59 = vcombine.low %v13196_v55, %v13199_v16  ;;  %v4153_v38 = vcombine.low %v1237_v63, %v1251_v1  ;;  %v5087_v45 = vcombine.low %v1253_v24, %v13232_v3  ;;  %v5095_v23 = vcombine.low %v4134_v8, %v13245_v10 }
  0xe6   : > { %v1749_v60 = vcombine.high %v1251_v1, %v1251_v1  ;;  %4688 = vrot.lane.b32.xlu0 %v4102_v54, %s12165_s10  ;;  %v2739_v61 = vcombine.low %v1251_v1, %v1253_v24  ;;  %v2747_v50 = vrot.slane %v2737_v26, %v12260_v5  ;;  %v2754_v40 = vrot.slane %v2738_v18, %v12260_v5 }
  0xe7   : > { %v4136_v31 = vcombine.low %v13202_v17, %v4134_v8  ;;  %v4169_v57 = vrot.slane %v4153_v38, %v12260_v5  ;;  %v5094_v46 = vrot.slane %v5087_v45, %v12260_v5  ;;  %v5103_v55 = vrot.slane %v5095_v23, %v12260_v5  ;;  %v13280_v23 = vpop.permute.xlu1 %4662  ;;  %v13293_v62 = vpop.permute.xlu0 %5403 }
  0xe8   : > { %v5624_v16 = vcombine.low %v1749_v60, %v13240_v13  ;;  %v13265_v58 = vrot.slane %v2739_v61, %v12260_v5  ;;  %v2769_v19 = vcombine.low %v2747_v50, %v2754_v40  ;;  %v4143_v44 = vrot.slane %v4135_v59, %v12260_v5 }
  0xe9   : > { %v4150_v24 = vrot.slane %v4136_v31, %v12260_v5  ;;  %v5096_v17 = vcombine.low %v4169_v57, %v5094_v46  ;;  %v1255_v54 = vcombine.high %v13216_v49, %v13216_v49  ;;  %v1300_v26 = vcombine.high %v13232_v3, %v13232_v3 }
  0xea   : > { %17581 = vst [vmem:[#allocation33_spill] sm:$0xff] %v13265_v58  ;;  %v5631_v8 = vrot.slane %v5624_v16, %v12260_v5  ;;  %v13275_v18 = vrot.slane %v2769_v19, %v12260_v5  ;;  %v1302_v45 = vcombine.high %v13240_v13, %v13240_v13  ;;  %v1311_v59 = vrot.slane %v244_v7, %v12260_v5 }
  0xeb   : > { %v4151_v38 = vcombine.low %v4143_v44, %v4150_v24  ;;  %v5110_v60 = vrot.slane %v5096_v17, %v12260_v5  ;;  %v1269_v49 = vrot.slane %v1255_v54, %v12260_v5  ;;  %v4155_v50 = vcombine.low %v13240_v13, %v1300_v26 }
  0xec   : > { %17582 = vst [vmem:[#allocation34_spill] sm:$0xff] %v13275_v18  ;;  %v5632_v61 = vcombine.low %v13265_v58, %v5631_v8  ;;  %v13287_v40 = vrot.slane %v1311_v59, %v12260_v5  ;;  %v1319_v31 = vcombine.high %v1311_v59, %v1311_v59  ;;  %v11733_v46 = vcombine.high %v13232_v3, %v13240_v13  ;;  %v13307_v58 = vpop.permute.xlu1 %5827 }
  0xed   : > { %v11761_v16 = vcombine.high %v1237_v63, %v1251_v1  ;;  %v5111_v19 = vcombine.low %v5103_v55, %v5110_v60  ;;  %v1271_v24 = vcombine.high %v1269_v49, %v1269_v49  ;;  %v1285_v17 = vrot.slane %v1269_v49, %v12260_v5 }
  0xee   : > { %v5639_v44 = vrot.slane %v5632_v61, %v12260_v5  ;;  %v4183_v8 = vrot.slane %v4155_v50, %v12260_v5  ;;  %v13297_v54 = vrot.slane %v1319_v31, %v12260_v5  ;;  %v2796_v26 = vrot.slane %v11733_v46, %v12260_v5 }
  0xef   : > { %v4176_v59 = vrot.slane %v11761_v16, %v12260_v5  ;;  %5433 = vrot.lane.b32.xlu1 %v5111_v19, %s12166_s11  ;;  %v1299_v1 = vrot.slane %v1271_v24, %v12260_v5  ;;  %v1301_v55 = vcombine.high %v1285_v17, %v1285_v17  ;;  %v4201_v60 = vcombine.low %v1302_v45, %v1285_v17 }
  0xf0   : > { %v5640_v63 = vcombine.low %v13275_v18, %v5639_v44  ;;  %v2789_v61 = vcombine.low %v13287_v40, %v13297_v54  ;;  %v4184_v49 = vcombine.low %v13245_v10, %v4169_v57  ;;  %v1304_v31 = vcombine.high %v244_v7, %v244_v7 }
  0xf1   : > { %v4185_v50 = vcombine.low %v4176_v59, %v4183_v8  ;;  %v1303_v46 = vcombine.high %v1299_v1, %v1299_v1  ;;  %v4202_v16 = vcombine.low %v1299_v1, %v1301_v55  ;;  %v13311_v19 = vrot.slane %v4201_v60, %v12260_v5  ;;  %v13326_v55 = vld [vmem:[%s12258_s9 + $0xb0] sm:$0xff] }
  0xf2   : > { %5853 = vrot.lane.b32.xlu0 %v5640_v63, %s12167_s12  ;;  %v2787_v44 = vcombine.low %v1285_v17, %v1299_v1  ;;  %v11734_v24 = vcombine.high %v1285_v17, %v1299_v1  ;;  %v2817_v45 = vrot.slane %v2789_v61, %v12260_v5  ;;  %v13315_v18 = vrot.slane %v4184_v49, %v12260_v5  ;;  %v13328_v17 = vpop.permute.xlu0 %4660 }
  0xf3   : > { %v13318_v10 = vrot.slane %v4185_v50, %v12260_v5  ;;  %4690 = vrot.lane.b32.xlu1 %v4151_v38, %s12165_s10  ;;  %v4203_v57 = vcombine.low %v1303_v46, %v13287_v40  ;;  %v4218_v7 = vrot.slane %v4202_v16, %v12260_v5  ;;  %v5112_v59 = vcombine.low %v4183_v8, %v13311_v19 }
  0xf4   : > { %v2803_v63 = vrot.slane %v2787_v44, %v12260_v5  ;;  %v2810_v1 = vrot.slane %v11734_v24, %v12260_v5  ;;  %v1318_v61 = vrot.slane %v1304_v31, %v12260_v5  ;;  %v1349_v38 = vcombine.high %v13287_v40, %v13287_v40 }
  0xf5   : > { %v4200_v60 = vcombine.low %v13315_v18, %v13318_v10  ;;  %v4225_v49 = vrot.slane %v4203_v57, %v12260_v5  ;;  %v5120_v8 = vrot.slane %v5112_v59, %v12260_v5  ;;  %v1351_v46 = vcombine.high %v13297_v54, %v13297_v54  ;;  %v13343_v10 = vpop.permute.xlu1 %5409 }
  0xf6   : > { %v2818_v50 = vcombine.low %v2796_v26, %v2803_v63  ;;  %v2819_v16 = vcombine.low %v2810_v1, %v2817_v45  ;;  %v1320_v44 = vcombine.high %v1318_v61, %v1318_v61  ;;  %v1334_v24 = vrot.slane %v1318_v61, %v12260_v5 }
  0xf7   : > { %v1359_v18 = vrot.slane %v13326_v55, %v12260_v5  ;;  %v5113_v31 = vcombine.low %v4218_v7, %v4225_v49  ;;  %v4204_v57 = vcombine.low %v13297_v54, %v1349_v38  ;;  %v11735_v26 = vcombine.high %v13287_v40, %v13297_v54  ;;  %v13360_v38 = vpop.permute.xlu0 %5825 }
  0xf8   : > { %v2826_v3 = vrot.slane %v2818_v50, %v12260_v5  ;;  %v2833_v59 = vrot.slane %v2819_v16, %v12260_v5  ;;  %v13351_v45 = vrot.slane %v1320_v44, %v12260_v5  ;;  %v13353_v63 = vcombine.high %v1334_v24, %v1334_v24 }
  0xf9   : > { %v1367_v1 = vcombine.high %v1359_v18, %v1359_v18  ;;  %v5127_v61 = vrot.slane %v5113_v31, %v12260_v5  ;;  %v13357_v13 = vrot.slane %v1359_v18, %v12260_v5  ;;  %v4232_v50 = vrot.slane %v4204_v57, %v12260_v5 }
  0xfa   : > { %17583 = vst [vmem:[#allocation35_spill] sm:$0xff] %v13353_v63  ;;  %v4250_v42 = vcombine.low %v1351_v46, %v1334_v24  ;;  %v13362_v43 = vcombine.low %v2826_v3, %v2833_v59  ;;  %v4251_v54 = vcombine.low %v13351_v45, %v13353_v63  ;;  %v2836_v16 = vcombine.low %v1334_v24, %v13351_v45 }
  0xfb   : > { %17584 = vst [vmem:[#allocation36_spill] sm:$0xff] %v13357_v13  ;;  %v13365_v40 = vrot.slane %v1367_v1, %v12260_v5  ;;  %v5128_v44 = vcombine.low %v5120_v8, %v5127_v61  ;;  %v1397_v18 = vcombine.high %v13357_v13, %v13357_v13  ;;  %v2845_v46 = vrot.slane %v11735_v26, %v12260_v5 }
  0xfc   : > { %17585 = vst [vmem:[#allocation37_spill] sm:$0xff] %v13362_v43  ;;  %v13371_v31 = vrot.slane %v4250_v42, %v12260_v5  ;;  %5855 = vrot.lane.b32.xlu1 %v13362_v43, %s12167_s12  ;;  %v4267_v3 = vrot.slane %v4251_v54, %v12260_v5  ;;  %v2852_v59 = vrot.slane %v2836_v16, %v12260_v5  ;;  %v13383_v42 = vpop.permute.xlu1 %5821 }
  0xfd   : > { %v5129_v57 = vcombine.low %v13357_v13, %v13365_v40  ;;  %v11777_v8 = vcombine.high %v1334_v24, %v13351_v45  ;;  %5435 = vrot.lane.b32.xlu0 %v5128_v44, %s12166_s11  ;;  %v2838_v26 = vcombine.low %v13365_v40, %v1397_v18  ;;  %v4233_v61 = vcombine.low %v13311_v19, %v4218_v7  ;;  %v13394_v24 = vld [vmem:[%s12258_s9 + $0xb8] sm:$0xff]  ;;  %v13402_v7 = vpop.permute.xlu0 %5407 }
  0xfe   : > { %v5137_v1 = vcombine.low %v4232_v50, %v13371_v31  ;;  %v4234_v43 = vcombine.low %v4225_v49, %v4232_v50  ;;  %v2867_v63 = vcombine.low %v2845_v46, %v2852_v59  ;;  %v2005_v16 = vcombine.low %v12280_v22, %v12293_v29 }
  0xff   : > { %v5136_v54 = vrot.slane %v5129_v57, %v12260_v5  ;;  %v5648_v21 = vrot.slane %v11777_v8, %v12260_v5  ;;  %v13398_v44 = vrot.slane %v2838_v26, %v12260_v5  ;;  %v4241_v18 = vrot.slane %v4233_v61, %v12260_v5 }
 0x100   : > { %v5145_v37 = vrot.slane %v5137_v1, %v12260_v5  ;;  %v4248_v19 = vrot.slane %v4234_v43, %v12260_v5  ;;  %v13405_v50 = vrot.slane %v2867_v63, %v12260_v5  ;;  %v2033_v46 = vrot.slane %v2005_v16, %v12260_v5 }
 0x101   : > { %17586 = vst [vmem:[#allocation38_spill] sm:$0xff] %v13398_v44  ;;  %v5138_v49 = vcombine.low %v4267_v3, %v5136_v54  ;;  %4692 = vrot.lane.b32.xlu0 %v4200_v60, %s12165_s10  ;;  %v5649_v22 = vcombine.low %v5648_v21, %v13398_v44  ;;  %v1352_v57 = vcombine.high %v13326_v55, %v13326_v55  ;;  %v13420_v60 = vpop.permute.xlu1 %4658 }
 0x102   : > { %17587 = vst [vmem:[#allocation39_spill] sm:$0xff] %v13405_v50  ;;  %v4249_v29 = vcombine.low %v4241_v18, %v4248_v19  ;;  %v1408_v43 = vrot.slane %v13394_v24, %v12260_v5  ;;  %v2035_v8 = vcombine.low %v12574_v30, %v2033_v46  ;;  %v11762_v63 = vcombine.high %v13357_v13, %v13365_v40 }
 0x103   : > { %v5152_v59 = vrot.slane %v5138_v49, %v12260_v5  ;;  %v1399_v1 = vcombine.high %v13365_v40, %v13365_v40  ;;  %v5656_v21 = vrot.slane %v5649_v22, %v12260_v5  ;;  %v1366_v26 = vrot.slane %v1352_v57, %v12260_v5  ;;  %v13436_v57 = vpop.permute.xlu0 %4656 }
 0x104   : > { %v1416_v55 = vcombine.high %v1408_v43, %v1408_v43  ;;  %v13425_v61 = vrot.slane %v1408_v43, %v12260_v5  ;;  %v2049_v16 = vrot.slane %v2035_v8, %v12260_v5  ;;  %v4281_v30 = vrot.slane %v11762_v63, %v12260_v5 }
 0x105   : > { %v5153_v54 = vcombine.low %v5145_v37, %v5152_v59  ;;  %v1750_v18 = vcombine.high %v13351_v45, %v13351_v45  ;;  %v5657_v19 = vcombine.low %v13405_v50, %v5656_v21  ;;  %v1368_v49 = vcombine.high %v1366_v26, %v1366_v26 }
 0x106   : > { %v1382_v46 = vrot.slane %v1366_v26, %v12260_v5  ;;  %v13434_v22 = vrot.slane %v1416_v55, %v12260_v5  ;;  %v2050_v37 = vcombine.low %v12585_v48, %v2049_v16  ;;  %v1446_v43 = vcombine.high %v13425_v61, %v13425_v61 }
 0x107   : > { %5437 = vrot.lane.b32.xlu1 %v5153_v54, %s12166_s11  ;;  %v4252_v59 = vcombine.low %v1750_v18, %v13365_v40  ;;  %v4282_v45 = vcombine.low %v13371_v31, %v4267_v3  ;;  %5857 = vrot.lane.b32.xlu0 %v5657_v19, %s12167_s12  ;;  %v1396_v8 = vrot.slane %v1368_v49, %v12260_v5  ;;  %v13455_v31 = vpop.permute.xlu1 %5823  ;;  %v13461_v49 = vld [vmem:[%s12258_s9 + $0xc0] sm:$0xff]  ;;  %v13471_v50 = vpop.permute.xlu0 %4664 }
 0x108   : > { %v4301_v63 = vcombine.low %v13425_v61, %v13434_v22  ;;  %v1398_v21 = vcombine.high %v1382_v46, %v1382_v46  ;;  %v2884_v26 = vcombine.low %v1399_v1, %v1382_v46  ;;  %v13450_v48 = vsel %vm5908_vm0, %v2050_v37, %v13280_v23 }
 0x109   : > { %v2887_v55 = vcombine.low %v13434_v22, %v1446_v43  ;;  %v4274_v40 = vrot.slane %v4252_v59, %v12260_v5  ;;  %v4290_v54 = vrot.slane %v4282_v45, %v12260_v5  ;;  %v4299_v3 = vcombine.low %v1382_v46, %v1396_v8 }
 0x10a   : > { %v11763_v16 = vcombine.high %v1382_v46, %v1396_v8  ;;  %v13458_v18 = vrot.slane %v4301_v63, %v12260_v5  ;;  %v1400_v19 = vcombine.high %v1396_v8, %v1396_v8  ;;  %v2885_v23 = vcombine.low %v1396_v8, %v1398_v21 }
 0x10b   : > { %4694 = vrot.lane.b32.xlu1 %v4249_v29, %s12165_s10  ;;  %v2894_v1 = vrot.slane %v2884_v26, %v12260_v5  ;;  %v2915_v37 = vrot.slane %v2887_v55, %v12260_v5  ;;  %v4283_v43 = vcombine.low %v4274_v40, %v4281_v30  ;;  %v4309_v59 = vrot.slane %v4299_v3, %v12260_v5 }
 0x10c   : > { %v4316_v45 = vrot.slane %v11763_v16, %v12260_v5  ;;  %v2886_v46 = vcombine.low %v1400_v19, %v13425_v61  ;;  %v1401_v63 = vcombine.high %v13394_v24, %v13394_v24  ;;  %v2901_v44 = vrot.slane %v2885_v23, %v12260_v5 }
 0x10d   : > { %v4297_v29 = vrot.slane %v4283_v43, %v12260_v5  ;;  %v1456_v8 = vrot.slane %v13461_v49, %v12260_v5  ;;  %v11764_v21 = vcombine.high %v13425_v61, %v13434_v22  ;;  %v5154_v26 = vcombine.low %v4281_v30, %v4309_v59  ;;  %v13485_v43 = vpop.permute.xlu1 %5405 }
 0x10e   : > { %v5155_v55 = vcombine.low %v4316_v45, %v13458_v18  ;;  %v2908_v40 = vrot.slane %v2886_v46, %v12260_v5  ;;  %v1415_v3 = vrot.slane %v1401_v63, %v12260_v5  ;;  %v2916_v24 = vcombine.low %v2894_v1, %v2901_v44 }
 0x10f   : > { %v4298_v16 = vcombine.low %v4290_v54, %v4297_v29  ;;  %v1464_v19 = vcombine.high %v1456_v8, %v1456_v8  ;;  %v13483_v23 = vrot.slane %v1456_v8, %v12260_v5  ;;  %v5162_v13 = vrot.slane %v5154_v26, %v12260_v5  ;;  %v13503_v8 = vpop.permute.xlu0 %5829 }
 0x110   : > { %v5169_v32 = vrot.slane %v5155_v55, %v12260_v5  ;;  %v2917_v61 = vcombine.low %v2908_v40, %v2915_v37  ;;  %v1417_v30 = vcombine.high %v1415_v3, %v1415_v3  ;;  %v2924_v52 = vrot.slane %v2916_v24, %v12260_v5 }
 0x111   : > { %17588 = vst [vmem:[#allocation40_spill] sm:$0xff] %v13483_v23  ;;  %v13491_v46 = vrot.slane %v1415_v3, %v12260_v5  ;;  %v13494_v44 = vrot.slane %v1464_v19, %v12260_v5  ;;  %v1494_v54 = vcombine.high %v13483_v23, %v13483_v23  ;;  %v4330_v37 = vrot.slane %v11764_v21, %v12260_v5  ;;  %v13530_v19 = vpop.permute.xlu1 %4666 }
 0x112   : > { %v5170_v1 = vcombine.low %v5162_v13, %v5169_v32  ;;  %v2931_v63 = vrot.slane %v2917_v61, %v12260_v5  ;;  %v13500_v29 = vrot.slane %v1417_v30, %v12260_v5  ;;  %v13511_v40 = vsel %vm5908_vm0, %v12532_v53, %v13328_v17 }
 0x113   : > { %17589 = vst [vmem:[#allocation41_spill] sm:$0xff] %v13494_v44  ;;  %v1447_v26 = vcombine.high %v13491_v46, %v13491_v46  ;;  %v4350_v55 = vcombine.low %v13494_v44, %v1494_v54  ;;  %v1448_v32 = vcombine.high %v13434_v22, %v13434_v22  ;;  %v11736_v24 = vcombine.high %v13483_v23, %v13494_v44 }
 0x114   : > { %5439 = vrot.lane.b32.xlu0 %v5170_v1, %s12166_s11  ;;  %v13516_v13 = vcombine.low %v2924_v52, %v2931_v63  ;;  %v4348_v21 = vcombine.low %v13491_v46, %v13500_v29  ;;  %v1751_v3 = vcombine.high %v13500_v29, %v13500_v29  ;;  %v4331_v1 = vcombine.low %v4309_v59, %v4316_v45  ;;  %v13554_v45 = vpop.permute.xlu0 %5411 }
 0x115   : > { %v13525_v53 = vrot.slane %v4350_v55, %v12260_v5  ;;  %v5171_v17 = vcombine.low %v1447_v26, %v13483_v23  ;;  %v2933_v22 = vcombine.low %v1448_v32, %v13491_v46  ;;  %v2934_v52 = vcombine.low %v13500_v29, %v1447_v26  ;;  %v13546_v23 = vld [vmem:[%s12258_s9 + $0xc8] sm:$0xff] }
 0x116   : > { %17590 = vst [vmem:[#allocation42_spill] sm:$0xff] %v13516_v13  ;;  %5859 = vrot.lane.b32.xlu1 %v13516_v13, %s12167_s12  ;;  %v13535_v61 = vrot.slane %v4348_v21, %v12260_v5  ;;  %v13538_v30 = vrot.slane %v11736_v24, %v12260_v5  ;;  %v5658_v54 = vcombine.low %v1751_v3, %v13494_v44 }
 0x117   : > { %v5178_v63 = vrot.slane %v5171_v17, %v12260_v5  ;;  %v2943_v55 = vrot.slane %v2933_v22, %v12260_v5  ;;  %v2950_v26 = vrot.slane %v2934_v52, %v12260_v5  ;;  %v4332_v32 = vcombine.low %v13458_v18, %v4330_v37 }
 0x118   : > { %17591 = vst [vmem:[#allocation43_spill] sm:$0xff] %v13538_v30  ;;  %4696 = vrot.lane.b32.xlu0 %v4298_v16, %s12165_s10  ;;  %v5179_v21 = vcombine.low %v4330_v37, %v13535_v61  ;;  %v5665_v24 = vrot.slane %v5658_v54, %v12260_v5  ;;  %v4339_v13 = vrot.slane %v4331_v1, %v12260_v5 }
 0x119   : > { %v1449_v59 = vcombine.high %v13461_v49, %v13461_v49  ;;  %v5180_v3 = vcombine.low %v5178_v63, %v13525_v53  ;;  %v2965_v17 = vcombine.low %v2943_v55, %v2950_v26  ;;  %v4346_v18 = vrot.slane %v4332_v32, %v12260_v5  ;;  %v13569_v55 = vpop.permute.xlu1 %5831 }
 0x11a   : > { %v1496_v22 = vcombine.high %v13494_v44, %v13494_v44  ;;  %v5187_v16 = vrot.slane %v5179_v21, %v12260_v5  ;;  %v5666_v37 = vcombine.low %v5665_v24, %v13538_v30  ;;  %v1505_v54 = vrot.slane %v13546_v23, %v12260_v5 }
 0x11b   : > { %v1463_v52 = vrot.slane %v1449_v59, %v12260_v5  ;;  %v5194_v49 = vrot.slane %v5180_v3, %v12260_v5  ;;  %v13567_v1 = vrot.slane %v2965_v17, %v12260_v5  ;;  %v4347_v63 = vcombine.low %v4339_v13, %v4346_v18 }
 0x11c   : > { %v5673_v26 = vrot.slane %v5666_v37, %v12260_v5  ;;  %v1513_v24 = vcombine.high %v1505_v54, %v1505_v54  ;;  %v1521_v59 = vrot.slane %v1505_v54, %v12260_v5  ;;  %v13577_v3 = vsel %vm5938_vm1, %v13450_v48, %v13402_v7 }
 0x11d   : > { %17592 = vst [vmem:[#allocation44_spill] sm:$0xff] %v13567_v1  ;;  %v1465_v32 = vcombine.high %v1463_v52, %v1463_v52  ;;  %v1479_v21 = vrot.slane %v1463_v52, %v12260_v5  ;;  %v5195_v30 = vcombine.low %v5187_v16, %v5194_v49  ;;  %v1904_v13 = vcombine.low %v12538_v0, %v12549_v39  ;;  %v13586_v52 = vpop.permute.xlu0 %4668  ;;  %v13598_v27 = vpop.permute.xlu1 %5413 }
 0x11e   : > { %v5674_v17 = vcombine.low %v13567_v1, %v5673_v26  ;;  %v13584_v44 = vrot.slane %v1513_v24, %v12260_v5  ;;  %v1543_v16 = vcombine.high %v1521_v59, %v1521_v59  ;;  %v11720_v7 = vcombine.high %v12538_v0, %v12549_v39 }
 0x11f   : > { %v1493_v18 = vrot.slane %v1465_v32, %v12260_v5  ;;  %v1495_v37 = vcombine.high %v1479_v21, %v1479_v21  ;;  %5441 = vrot.lane.b32.xlu1 %v5195_v30, %s12166_s11  ;;  %v4351_v54 = vcombine.low %v1496_v22, %v1479_v21  ;;  %v1906_v48 = vcombine.low %v12541_v20, %v12553_v6 }
 0x120   : > { %5861 = vrot.lane.b32.xlu0 %v5674_v17, %s12167_s12  ;;  %v4399_v51 = vcombine.low %v13584_v44, %v1543_v16  ;;  %v2984_v30 = vcombine.low %v1521_v59, %v13584_v44  ;;  %v11738_v22 = vcombine.high %v1521_v59, %v13584_v44 }
 0x121   : > { %v1497_v49 = vcombine.high %v1493_v18, %v1493_v18  ;;  %v4397_v26 = vcombine.low %v1493_v18, %v1495_v37  ;;  %v2982_v32 = vcombine.low %v1479_v21, %v1493_v18  ;;  %v11737_v1 = vcombine.high %v1479_v21, %v1493_v18 }
 0x122   : > { %v4379_v24 = vrot.slane %v4351_v54, %v12260_v5  ;;  %v13607_v21 = vrot.slane %v4399_v51, %v12260_v5  ;;  %v3006_v17 = vrot.slane %v2984_v30, %v12260_v5  ;;  %v3013_v18 = vrot.slane %v11738_v22, %v12260_v5 }
 0x123   : > { %v4398_v0 = vcombine.low %v1497_v49, %v1521_v59  ;;  %v13601_v39 = vrot.slane %v4397_v26, %v12260_v5  ;;  %v2992_v20 = vrot.slane %v2982_v32, %v12260_v5  ;;  %v2999_v6 = vrot.slane %v11737_v1, %v12260_v5  ;;  %4698 = vrot.lane.b32.xlu1 %v4347_v63, %s12165_s10  ;;  %v13618_v63 = vpop.permute.xlu0 %5833 }
 0x124   : > { %v1907_v37 = vcombine.low %v12559_v28, %v12284_v25  ;;  %v1914_v1 = vrot.slane %v1904_v13, %v12260_v5  ;;  %v3015_v51 = vcombine.low %v3006_v17, %v3013_v18  ;;  %v1921_v49 = vrot.slane %v11720_v7, %v12260_v5 }
 0x125   : > { %v13614_v59 = vrot.slane %v4398_v0, %v12260_v5  ;;  %v5196_v16 = vcombine.low %v4379_v24, %v13601_v39  ;;  %v3014_v54 = vcombine.low %v2992_v20, %v2999_v6  ;;  %v1928_v26 = vrot.slane %v1906_v48, %v12260_v5  ;;  %v13632_v6 = vld [vmem:[%s12258_s9 + $0xd0] sm:$0xff]  ;;  %v13634_v48 = vpop.permute.xlu1 %4670 }
 0x126   : > { %v1935_v32 = vrot.slane %v1907_v37, %v12260_v5  ;;  %v11765_v22 = vcombine.high %v13491_v46, %v13500_v29  ;;  %v3029_v13 = vrot.slane %v3015_v51, %v12260_v5  ;;  %v1936_v0 = vcombine.low %v1914_v1, %v1921_v49 }
 0x127   : > { %v5197_v25 = vcombine.low %v13614_v59, %v13607_v21  ;;  %v5204_v28 = vrot.slane %v5196_v16, %v12260_v5  ;;  %v3022_v30 = vrot.slane %v3014_v54, %v12260_v5  ;;  %v4381_v7 = vcombine.low %v13525_v53, %v4379_v24 }
 0x128   : > { %v1937_v20 = vcombine.low %v1928_v26, %v1935_v32  ;;  %v4365_v18 = vrot.slane %v11765_v22, %v12260_v5  ;;  %v1498_v37 = vcombine.high %v13546_v23, %v13546_v23  ;;  %v1545_v46 = vcombine.high %v13584_v44, %v13584_v44  ;;  %v13651_v23 = vpop.permute.xlu0 %5415  ;;  %v5999_v32 = vld [vmem:[%s17333_s1 + $0x8] sm:$0xff] }
 0x129   : > { %v5211_v17 = vrot.slane %v5197_v25, %v12260_v5  ;;  %v13642_v29 = vcombine.low %v3022_v30, %v3029_v13  ;;  %v1944_v16 = vrot.slane %v1936_v0, %v12260_v5  ;;  %v4395_v24 = vrot.slane %v4381_v7, %v12260_v5 }
 0x12a   : > { %v1951_v53 = vrot.slane %v1937_v20, %v12260_v5  ;;  %v4380_v1 = vcombine.low %v13535_v61, %v4365_v18  ;;  %v1512_v51 = vrot.slane %v1498_v37, %v12260_v5  ;;  %v1553_v49 = vrot.slane %v13632_v6, %v12260_v5 }
 0x12b   : > { %v5212_v54 = vcombine.low %v5204_v28, %v5211_v17  ;;  %5863 = vrot.lane.b32.xlu1 %v13642_v29, %s12167_s12  ;;  %v1855_v26 = vcombine.low %v12591_v33, %v12600_v9  ;;  %v17378_v0 = vmov 0.0   ;;  %v11718_v20 = vcombine.high %v12591_v33, %v12600_v9  ;;  %v13673_v17 = vpop.permute.xlu1 %5835 }
 0x12c   : > { %v1952_v44 = vcombine.low %v1944_v16, %v1951_v53  ;;  %v4388_v61 = vrot.slane %v4380_v1, %v12260_v5  ;;  %v1514_v25 = vcombine.high %v1512_v51, %v1512_v51  ;;  %v1528_v28 = vrot.slane %v1512_v51, %v12260_v5  ;;  %11927 = vmatprep.subr.mxu0 %v17378_v0  ;;  %v5998_v53 = vld [vmem:[%s17333_s1] sm:$0xff] }
 0x12d   : > { %5443 = vrot.lane.b32.xlu0 %v5212_v54, %s12166_s11  ;;  %v1561_v30 = vcombine.high %v1553_v49, %v1553_v49  ;;  %v13666_v13 = vrot.slane %v1553_v49, %v12260_v5  ;;  %v1857_v7 = vcombine.low %v12597_v4, %v12609_v15  ;;  %11928 = vmatpush3.msra.mxu0 %v5999_v32 }
 0x12e   : > { %v5910_v22 = vsel %vm5908_vm0, %v1952_v44, %v13420_v60  ;;  %v4396_v18 = vcombine.low %v4388_v61, %v4395_v24  ;;  %v13676_v37 = vrot.slane %v1514_v25, %v12260_v5  ;;  %v13678_v16 = vcombine.high %v1528_v28, %v1528_v28  ;;  %11929 = vmatprep.subr.mxu0 %v17378_v0 }
 0x12f   : > { %v13681_v60 = vrot.slane %v1561_v30, %v12260_v5  ;;  %v4400_v33 = vcombine.low %v1545_v46, %v1528_v28  ;;  %v5940_v9 = vsel %vm5938_vm1, %v5910_v22, %v13293_v62  ;;  %v11719_v24 = vcombine.high %v12597_v4, %v12609_v15  ;;  %v13703_v4 = vpop.permute.xlu0 %4672  ;;  %11930 = vmatpush3.msra.mxu0 %v5998_v53 }
 0x130   : > { %v1865_v54 = vrot.slane %v1855_v26, %v12260_v5  ;;  %v4446_v1 = vcombine.low %v13676_v37, %v13678_v16  ;;  %v13701_v62 = vsel %vm5968_vm2, %v5940_v9, %v13455_v31  ;;  %v1872_v49 = vrot.slane %v11718_v20, %v12260_v5  ;;  %11549 = vmatprep.subr.mxu1 %v17378_v0 }
 0x131   : > { %4700 = vrot.lane.b32.xlu0 %v4396_v18, %s12165_s10  ;;  %v11766_v51 = vcombine.high %v13666_v13, %v13681_v60  ;;  %v5213_v46 = vcombine.low %v13666_v13, %v13681_v60  ;;  %v4428_v15 = vrot.slane %v4400_v33, %v12260_v5  ;;  %v1879_v44 = vrot.slane %v1857_v7, %v12260_v5  ;;  %v13723_v18 = vpop.permute.xlu1 %5417 }
 0x132   : > { %v1886_v26 = vrot.slane %v11719_v24, %v12260_v5  ;;  %v13710_v32 = vrot.slane %v4446_v1, %v12260_v5  ;;  %v1546_v25 = vcombine.high %v13632_v6, %v13632_v6  ;;  %v1887_v30 = vcombine.low %v1865_v54, %v1872_v49  ;;  %11613 = vmatprep.mubr.f32.mxu1 %v17378_v0 }
 0x133   : > { %v13713_v61 = vrot.slane %v11766_v51, %v12260_v5  ;;  %v5220_v31 = vrot.slane %v5213_v46, %v12260_v5  ;;  %v1591_v20 = vcombine.high %v13666_v13, %v13666_v13  ;;  %v1593_v7 = vcombine.high %v13681_v60, %v13681_v60 }
 0x134   : > { %v1888_v22 = vcombine.low %v1879_v44, %v1886_v26  ;;  %v5221_v53 = vcombine.low %v4428_v15, %v13710_v32  ;;  %v1560_v6 = vrot.slane %v1546_v25, %v12260_v5  ;;  %v3031_v9 = vcombine.low %v1528_v28, %v13676_v37 }
 0x135   : > { %v5222_v33 = vcombine.low %v5220_v31, %v13713_v61  ;;  %v1895_v24 = vrot.slane %v1887_v30, %v12260_v5  ;;  %v3033_v1 = vcombine.low %v13681_v60, %v1591_v20  ;;  %v11778_v51 = vcombine.high %v1528_v28, %v13676_v37  ;;  %v13740_v31 = vpop.permute.xlu0 %5837 }
 0x136   : > { %v1902_v54 = vrot.slane %v1888_v22, %v12260_v5  ;;  %v5229_v46 = vrot.slane %v5221_v53, %v12260_v5  ;;  %v1576_v44 = vrot.slane %v1560_v6, %v12260_v5  ;;  %v13738_v26 = vrot.slane %v3031_v9, %v12260_v5 }
 0x137   : > { %v5236_v49 = vrot.slane %v5222_v33, %v12260_v5  ;;  %v3055_v30 = vrot.slane %v3033_v1, %v12260_v5  ;;  %v5682_v22 = vrot.slane %v11778_v51, %v12260_v5  ;;  %v17593_v28 = vmov 0.0   ;;  %v13758_v1 = vpop.permute.xlu1 %4674 }
 0x138   : > { %v1903_v25 = vcombine.low %v1895_v24, %v1902_v54  ;;  %v3034_v0 = vcombine.low %v1593_v7, %v1576_v44  ;;  %11931 = vmatprep.mubr.msk.f32.mxu0 %vm12169_vm3, %v17593_v28  ;;  %v4429_v53 = vcombine.low %v13601_v39, %v13614_v59  ;;  %v4430_v33 = vcombine.low %v13607_v21, %v4428_v15  ;;  %v250_v7 = vld [vmem:[%s12258_s9 + $0xd8] sm:$0xff] }
 0x139   : > { %v5237_v20 = vcombine.low %v5229_v46, %v5236_v49  ;;  %v5683_v24 = vcombine.low %v13738_v26, %v5682_v22  ;;  %v13755_v54 = vsel %vm5938_vm1, %v13511_v40, %v13485_v43  ;;  %v5913_v40 = vsel %vm5908_vm0, %v12509_v35, %v13471_v50 }
 0x13a   : > { %v5909_v9 = vsel %vm5908_vm0, %v1903_v25, %v13436_v57  ;;  %v3062_v21 = vrot.slane %v3034_v0, %v12260_v5  ;;  %v4437_v57 = vrot.slane %v4429_v53, %v12260_v5  ;;  %v4444_v59 = vrot.slane %v4430_v33, %v12260_v5  ;;  %v13774_v25 = vpop.permute.xlu0 %5419 }
 0x13b   : > { %5445 = vrot.lane.b32.xlu1 %v5237_v20, %s12166_s11  ;;  %v5939_v39 = vsel %vm5938_vm1, %v5909_v9, %v13262_v36  ;;  %v5690_v15 = vrot.slane %v5683_v24, %v12260_v5  ;;  %v1562_v51 = vcombine.high %v1560_v6, %v1560_v6  ;;  %v1602_v36 = vrot.slane %v250_v7, %v12260_v5 }
 0x13c   : > { %v5969_v43 = vsel %vm5968_vm2, %v5939_v39, %v13383_v42  ;;  %v3064_v46 = vcombine.low %v3055_v30, %v3062_v21  ;;  %v4445_v49 = vcombine.low %v4437_v57, %v4444_v59  ;;  %v1592_v0 = vcombine.high %v1576_v44, %v1576_v44 }
 0x13d   : > { %11932 = vmatmul.mubr.msk.f32.vlgmr.msra.gmra.mxu0 %vm6007_vm4, %v5969_v43  ;;  %v1590_v22 = vrot.slane %v1562_v51, %v12260_v5  ;;  %v1595_v20 = vcombine.high %v250_v7, %v250_v7  ;;  %v5943_v42 = vsel %vm5938_vm1, %v5913_v40, %v13343_v10  ;;  %v2102_v35 = vcombine.low %v12494_v56, %v12369_v12  ;;  %v13793_v7 = vpop.permute.xlu1 %5839 }
 0x13e   : > { %11934 = vmatprep.mubr.msk.f32.mxu0 %vm12169_vm3, %v17593_v28  ;;  %v13784_v50 = vrot.slane %v3064_v46, %v12260_v5  ;;  %v1610_v6 = vcombine.high %v1602_v36, %v1602_v36  ;;  %v1618_v30 = vrot.slane %v1602_v36, %v12260_v5  ;;  %v13790_v53 = vsel %vm5968_vm2, %v5943_v42, %v13503_v8  ;;  %v13809_v46 = vpop.permute.xlu0 %4676 }
 0x13f   : > { %4702 = vrot.lane.b32.xlu1 %v4445_v49, %s12165_s10  ;;  %v4449_v33 = vcombine.low %v1576_v44, %v1590_v22  ;;  %v11767_v9 = vcombine.high %v1576_v44, %v1590_v22  ;;  %v1594_v24 = vcombine.high %v1590_v22, %v1590_v22  ;;  %v1609_v10 = vrot.slane %v1595_v20, %v12260_v5 }
 0x140   : > { %v5691_v12 = vcombine.low %v5690_v15, %v13784_v50  ;;  %v1632_v56 = vrot.slane %v1610_v6, %v12260_v5  ;;  %v1640_v39 = vcombine.high %v1618_v30, %v1618_v30  ;;  %v3080_v21 = vcombine.low %v1590_v22, %v1592_v0 }
 0x141   : > { %11935 = vmatmul.mubr.msk.f32.gmra.mxu0 %vm6007_vm4, %v13701_v62  ;;  %v4477_v57 = vrot.slane %v4449_v33, %v12260_v5  ;;  %v13801_v8 = vrot.slane %v11767_v9, %v12260_v5  ;;  %v13804_v44 = vrot.slane %v1609_v10, %v12260_v5  ;;  %v3081_v59 = vcombine.low %v1594_v24, %v1618_v30 }
 0x142   : > { %11937 = vmatprep.mubr.msk.f32.mxu0 %vm12169_vm3, %v17593_v28  ;;  %5865 = vrot.lane.b32.xlu0 %v5691_v12, %s12167_s12  ;;  %v4496_v15 = vcombine.low %v1618_v30, %v1632_v56  ;;  %v11768_v43 = vcombine.high %v1618_v30, %v1632_v56  ;;  %v1642_v40 = vcombine.high %v1632_v56, %v1632_v56  ;;  %v13827_v12 = vpop.permute.xlu1 %5421 }
 0x143   : > { %v3082_v51 = vcombine.low %v1632_v56, %v1640_v39  ;;  %v5238_v62 = vcombine.low %v4477_v57, %v13801_v8  ;;  %v3090_v49 = vrot.slane %v3080_v21, %v12260_v5  ;;  %v3097_v36 = vrot.slane %v3081_v59, %v12260_v5  ;;  %v251_v21 = vld [vmem:[%s12258_s9 + $0xe0] sm:$0xff] }
 0x144   : > { %v2124_v0 = vrot.slane %v2102_v35, %v12260_v5  ;;  %v13816_v22 = vrot.slane %v4496_v15, %v12260_v5  ;;  %v13819_v20 = vrot.slane %v11768_v43, %v12260_v5  ;;  %v3083_v42 = vcombine.low %v1642_v40, %v13804_v44 }
 0x145   : > { %v3104_v6 = vrot.slane %v3082_v51, %v12260_v5  ;;  %v5246_v30 = vrot.slane %v5238_v62, %v12260_v5  ;;  %v3112_v33 = vcombine.low %v3090_v49, %v3097_v36  ;;  %v1752_v24 = vcombine.high %v13676_v37, %v13676_v37 }
 0x146   : > { %v2133_v9 = vcombine.low %v2124_v0, %v12403_v47  ;;  %v5239_v35 = vcombine.low %v13816_v22, %v13819_v20  ;;  %v3111_v56 = vrot.slane %v3083_v42, %v12260_v5  ;;  %v4479_v39 = vcombine.low %v13713_v61, %v4477_v57  ;;  %v13844_v61 = vpop.permute.xlu0 %5841 }
 0x147   : > { %v1611_v59 = vcombine.high %v1609_v10, %v1609_v10  ;;  %v3120_v15 = vrot.slane %v3112_v33, %v12260_v5  ;;  %v4447_v47 = vcombine.low %v1752_v24, %v13681_v60  ;;  %v1641_v37 = vcombine.high %v13804_v44, %v13804_v44 }
 0x148   : > { %v2147_v43 = vrot.slane %v2133_v9, %v12260_v5  ;;  %v5253_v40 = vrot.slane %v5239_v35, %v12260_v5  ;;  %v3113_v51 = vcombine.low %v3104_v6, %v3111_v56  ;;  %v4493_v62 = vrot.slane %v4479_v39, %v12260_v5 }
 0x149   : > { %v13842_v49 = vrot.slane %v1611_v59, %v12260_v5  ;;  %v4463_v57 = vrot.slane %v4447_v47, %v12260_v5  ;;  %v1643_v36 = vcombine.high %v251_v21, %v251_v21  ;;  %v1650_v60 = vrot.slane %v251_v21, %v12260_v5 }
 0x14a   : > { %v2148_v10 = vcombine.low %v12398_v41, %v2147_v43  ;;  %v5254_v0 = vcombine.low %v5246_v30, %v5253_v40  ;;  %v3127_v42 = vrot.slane %v3113_v51, %v12260_v5  ;;  %v5971_v33 = vsel %vm5968_vm2, %v13755_v54, %v13360_v38  ;;  %v13860_v30 = vpop.permute.xlu1 %4678  ;;  %v13891_v40 = vpop.permute.xlu0 %5423 }
 0x14b   : > { %v4498_v6 = vcombine.low %v13804_v44, %v13842_v49  ;;  %v4478_v41 = vcombine.low %v13710_v32, %v4463_v57  ;;  %v1657_v24 = vrot.slane %v1643_v36, %v12260_v5  ;;  %v1658_v35 = vcombine.high %v1650_v60, %v1650_v60  ;;  %11938 = vmatmul.mubr.msk.f32.gmra.mxu0 %vm6007_vm4, %v5971_v33 }
 0x14c   : > { %v5914_v9 = vsel %vm5908_vm0, %v2148_v10, %v13530_v19  ;;  %5447 = vrot.lane.b32.xlu0 %v5254_v0, %s12166_s11  ;;  %v13863_v56 = vcombine.low %v3120_v15, %v3127_v42  ;;  %v13866_v39 = vrot.slane %v1650_v60, %v12260_v5  ;;  %11940 = vmatprep.mubr.msk.f32.mxu0 %vm12169_vm3, %v17593_v28 }
 0x14d   : > { %v4526_v38 = vrot.slane %v4498_v6, %v12260_v5  ;;  %v5944_v19 = vsel %vm5938_vm1, %v5914_v9, %v13554_v45  ;;  %v4486_v32 = vrot.slane %v4478_v41, %v12260_v5  ;;  %v13873_v54 = vrot.slane %v1657_v24, %v12260_v5 }
 0x14e   : > { %v13876_v21 = vrot.slane %v1658_v35, %v12260_v5  ;;  %v13880_v59 = vsel %vm5968_vm2, %v5944_v19, %v13569_v55  ;;  %5867 = vrot.lane.b32.xlu1 %v13863_v56, %s12167_s12  ;;  %v1688_v45 = vcombine.high %v13866_v39, %v13866_v39  ;;  %v5255_v15 = vcombine.low %v1641_v37, %v13866_v39  ;;  %v13910_v9 = vpop.permute.xlu1 %5843 }
 0x14f   : > { %v1659_v43 = vcombine.high %v1657_v24, %v1657_v24  ;;  %v1753_v47 = vcombine.high %v13842_v49, %v13842_v49  ;;  %v4494_v51 = vcombine.low %v4486_v32, %v4493_v62  ;;  %v3129_v10 = vcombine.low %v13842_v49, %v1641_v37 }
 0x150   : > { %v1690_v55 = vcombine.high %v13876_v21, %v13876_v21  ;;  %v11739_v57 = vcombine.high %v13866_v39, %v13876_v21  ;;  %v4545_v36 = vcombine.low %v13876_v21, %v1688_v45  ;;  %v5262_v60 = vrot.slane %v5255_v15, %v12260_v5 }
 0x151   : > { %v1687_v0 = vrot.slane %v1659_v43, %v12260_v5  ;;  %v5692_v42 = vcombine.low %v1753_v47, %v13876_v21  ;;  %4704 = vrot.lane.b32.xlu0 %v4494_v51, %s12165_s10  ;;  %v13905_v6 = vrot.slane %v3129_v10, %v12260_v5  ;;  %v4527_v33 = vcombine.low %v13801_v8, %v13816_v22  ;;  %v252_v22 = vld [vmem:[%s12258_s9 + $0xe8] sm:$0xff] }
 0x152   : > { %v4546_v62 = vcombine.low %v1690_v55, %v13873_v54  ;;  %v3153_v37 = vrot.slane %v11739_v57, %v12260_v5  ;;  %v13913_v41 = vrot.slane %v4545_v36, %v12260_v5  ;;  %v5263_v24 = vcombine.low %v4526_v38, %v5262_v60 }
 0x153   : > { %v3132_v35 = vcombine.low %v13873_v54, %v1687_v0  ;;  %v5699_v19 = vrot.slane %v5692_v42, %v12260_v5  ;;  %v4528_v45 = vcombine.low %v13819_v20, %v4526_v38  ;;  %v4535_v15 = vrot.slane %v4527_v33, %v12260_v5  ;;  %v13933_v20 = vpop.permute.xlu0 %4680 }
 0x154   : > { %v13918_v32 = vrot.slane %v4546_v62, %v12260_v5  ;;  %v5972_v8 = vsel %vm5968_vm2, %v13577_v3, %v13307_v58  ;;  %v5271_v43 = vrot.slane %v5263_v24, %v12260_v5  ;;  %v5915_v55 = vsel %vm5908_vm0, %v12691_v34, %v13586_v52  ;;  %v13947_v24 = vpop.permute.xlu1 %5425 }
 0x155   : > { %v3160_v47 = vrot.slane %v3132_v35, %v12260_v5  ;;  %v5700_v51 = vcombine.low %v13905_v6, %v5699_v19  ;;  %11941 = vmatmul.mubr.msk.f32.gmra.mxu0 %vm6007_vm4, %v5972_v8  ;;  %v4542_v58 = vrot.slane %v4528_v45, %v12260_v5  ;;  %v5945_v3 = vsel %vm5938_vm1, %v5915_v55, %v13598_v27 }
 0x156   : > { %v5264_v38 = vcombine.low %v13913_v41, %v13918_v32  ;;  %v1689_v10 = vcombine.high %v13873_v54, %v13873_v54  ;;  %11943 = vmatprep.mubr.msk.f32.mxu0 %vm12169_vm3, %v17593_v28  ;;  %v1691_v34 = vcombine.high %v1687_v0, %v1687_v0  ;;  %v1692_v52 = vcombine.high %v252_v22, %v252_v22 }
 0x157   : > { %v3162_v57 = vcombine.low %v3153_v37, %v3160_v47  ;;  %v5707_v36 = vrot.slane %v5700_v51, %v12260_v5  ;;  %v4543_v42 = vcombine.low %v4535_v15, %v4542_v58  ;;  %v1699_v62 = vrot.slane %v252_v22, %v12260_v5 }
 0x158   : > { %v5278_v60 = vrot.slane %v5264_v38, %v12260_v5  ;;  %v4547_v33 = vcombine.low %v1687_v0, %v1689_v10  ;;  %v1706_v35 = vrot.slane %v1692_v52, %v12260_v5  ;;  %v11740_v19 = vcombine.high %v13873_v54, %v1687_v0  ;;  %v13967_v0 = vpop.permute.xlu0 %5845 }
 0x159   : > { %v13950_v27 = vrot.slane %v3162_v57, %v12260_v5  ;;  %11944 = vmatmul.mubr.msk.f32.gmra.mxu0 %vm6007_vm4, %v13790_v53  ;;  %v5975_v37 = vsel %vm5968_vm2, %v5945_v3, %v13618_v63  ;;  %v1707_v15 = vcombine.high %v1699_v62, %v1699_v62  ;;  %v1715_v8 = vrot.slane %v1699_v62, %v12260_v5 }
 0x15a   : > { %v5279_v45 = vcombine.low %v5271_v43, %v5278_v60  ;;  %v4575_v22 = vrot.slane %v4547_v33, %v12260_v5  ;;  %11946 = vmatprep.mubr.msk.f32.mxu0 %vm12169_vm3, %v17593_v28  ;;  %v13964_v51 = vrot.slane %v1706_v35, %v12260_v5  ;;  %v1708_v54 = vcombine.high %v1706_v35, %v1706_v35 }
 0x15b   : > { %v5708_v47 = vcombine.low %v5707_v36, %v13950_v27  ;;  %v3188_v53 = vrot.slane %v11740_v19, %v12260_v5  ;;  %v1729_v63 = vrot.slane %v1707_v15, %v12260_v5  ;;  %v1737_v43 = vcombine.high %v1715_v8, %v1715_v8 }
 0x15c   : > { %5449 = vrot.lane.b32.xlu1 %v5279_v45, %s12166_s11  ;;  %v4593_v55 = vcombine.low %v1691_v34, %v1715_v8  ;;  %v2200_v38 = vcombine.low %v12683_v11, %v12694_v2  ;;  %v13975_v58 = vrot.slane %v1708_v54, %v12260_v5  ;;  %v11769_v3 = vcombine.high %v13804_v44, %v13842_v49  ;;  %v13987_v11 = vpop.permute.xlu1 %4682 }
 0x15d   : > { %5869 = vrot.lane.b32.xlu0 %v5708_v47, %s12167_s12  ;;  %v4577_v10 = vcombine.low %v13918_v32, %v4575_v22  ;;  %11947 = vmatmul.mubr.msk.f32.gmra.mxu0 %vm6007_vm4, %v13880_v59  ;;  %v1739_v57 = vcombine.high %v1729_v63, %v1729_v63  ;;  %v4594_v36 = vcombine.low %v1729_v63, %v1737_v43 }
 0x15e   : > { %v13983_v34 = vrot.slane %v4593_v55, %v12260_v5  ;;  %v3179_v52 = vcombine.low %v1715_v8, %v1729_v63  ;;  %11949 = vmatprep.mubr.msk.f32.mxu0 %vm12169_vm3, %v17593_v28  ;;  %v11741_v2 = vcombine.high %v1715_v8, %v1729_v63  ;;  %v3181_v44 = vcombine.low %v13964_v51, %v13975_v58  ;;  %v253_v8 = vld [vmem:[%s12258_s9 + $0xf0] sm:$0xff] }
 0x15f   : > { %v2222_v49 = vrot.slane %v2200_v38, %v12260_v5  ;;  %v4554_v59 = vrot.slane %v11769_v3, %v12260_v5  ;;  %v4595_v32 = vcombine.low %v1739_v57, %v13964_v51  ;;  %v4610_v60 = vrot.slane %v4594_v36, %v12260_v5  ;;  %v17594_v36 = vld [vmem:[#allocation5_spill] sm:$0xff] }
 0x160   : > { %4706 = vrot.lane.b32.xlu1 %v4543_v42, %s12165_s10  ;;  %v5280_v62 = vcombine.low %v4575_v22, %v13983_v34  ;;  %v3195_v33 = vrot.slane %v3179_v52, %v12260_v5  ;;  %v3202_v35 = vrot.slane %v11741_v2, %v12260_v5  ;;  %v3209_v19 = vrot.slane %v3181_v44, %v12260_v5  ;;  %v14004_v42 = vpop.permute.xlu0 %5427  ;;  %v14019_v57 = vpop.permute.xlu1 %5847 }
 0x161   : > { %v2231_v45 = vcombine.low %v2222_v49, %v12720_v14  ;;  %v4576_v15 = vcombine.low %v4554_v59, %v13913_v41  ;;  %11950 = vmatmul.mubr.msk.f32.gmra.mxu0 %vm6007_vm4, %v5975_v37  ;;  %v4617_v47 = vrot.slane %v4595_v32, %v12260_v5  ;;  %v4591_v63 = vrot.slane %v4577_v10, %v12260_v5 }
 0x162   : > { %v5288_v54 = vrot.slane %v5280_v62, %v12260_v5  ;;  %v3210_v22 = vcombine.low %v3188_v53, %v3195_v33  ;;  %11952 = vmatprep.mubr.msk.f32.mxu0 %vm12169_vm3, %v17593_v28  ;;  %v3211_v43 = vcombine.low %v3202_v35, %v3209_v19  ;;  %v14015_v37 = vcombine.high %v13964_v51, %v13964_v51 }
 0x163   : > { %v2245_v14 = vrot.slane %v2231_v45, %v12260_v5  ;;  %v4584_v41 = vrot.slane %v4576_v15, %v12260_v5  ;;  %v5281_v55 = vcombine.low %v4610_v60, %v4617_v47  ;;  %v1757_v3 = vcombine.high %v253_v8, %v253_v8 }
 0x164   : > { %v3218_v38 = vrot.slane %v3210_v22, %v12260_v5  ;;  %v1764_v53 = vrot.slane %v253_v8, %v12260_v5  ;;  %v3225_v10 = vrot.slane %v3211_v43, %v12260_v5  ;;  %v4596_v44 = vcombine.low %v13975_v58, %v14015_v37  ;;  %v14035_v15 = vpop.permute.xlu0 %4684 }
 0x165   : > { %v2246_v52 = vcombine.low %v17594_v36, %v2245_v14  ;;  %v4592_v2 = vcombine.low %v4584_v41, %v4591_v63  ;;  %v5295_v49 = vrot.slane %v5281_v55, %v12260_v5  ;;  %v1771_v59 = vrot.slane %v1757_v3, %v12260_v5  ;;  %v17595_v55 = vld [vmem:[#allocation7_spill] sm:$0xff] }
 0x166   : > { %v1772_v32 = vcombine.high %v1764_v53, %v1764_v53  ;;  %v1780_v62 = vrot.slane %v1764_v53, %v12260_v5  ;;  %v14028_v33 = vcombine.low %v3218_v38, %v3225_v10  ;;  %v4624_v19 = vrot.slane %v4596_v44, %v12260_v5  ;;  %v14054_v53 = vpop.permute.xlu1 %5429 }
 0x167   : > { %v5916_v35 = vsel %vm5908_vm0, %v2246_v52, %v13634_v48  ;;  %v11779_v45 = vcombine.high %v13964_v51, %v13975_v58  ;;  %v5296_v8 = vcombine.low %v5288_v54, %v5295_v49  ;;  %v1773_v63 = vcombine.high %v1771_v59, %v1771_v59 }
 0x168   : > { %v5946_v22 = vsel %vm5938_vm1, %v5916_v35, %v13651_v23  ;;  %v1787_v43 = vrot.slane %v1771_v59, %v12260_v5  ;;  %5871 = vrot.lane.b32.xlu1 %v14028_v33, %s12167_s12  ;;  %v1794_v14 = vrot.slane %v1772_v32, %v12260_v5  ;;  %v1802_v41 = vcombine.high %v1780_v62, %v1780_v62  ;;  %v254_v35 = vld [vmem:[%s12258_s9 + $0xf8] sm:$0xff] }
 0x169   : > { %v5976_v48 = vsel %vm5968_vm2, %v5946_v22, %v13673_v17  ;;  %v5719_v51 = vrot.slane %v11779_v45, %v12260_v5  ;;  %5451 = vrot.lane.b32.xlu0 %v5296_v8, %s12166_s11  ;;  %v14048_v54 = vrot.slane %v1773_v63, %v12260_v5  ;;  %v5917_v38 = vsel %vm5908_vm0, %v17595_v55, %v13703_v4  ;;  %v14068_v45 = vpop.permute.xlu0 %5849 }
 0x16a   : > { %v1803_v23 = vcombine.high %v1787_v43, %v1787_v43  ;;  %v4625_v3 = vcombine.low %v13983_v34, %v4610_v60  ;;  %v5297_v10 = vcombine.low %v1780_v62, %v1794_v14  ;;  %v11770_v17 = vcombine.high %v1780_v62, %v1794_v14  ;;  %11953 = vmatmul.mubr.msk.f32.gmra.mxu0 %vm6007_vm4, %v5976_v48 }
 0x16b   : > { %v1804_v36 = vcombine.high %v1794_v14, %v1794_v14  ;;  %v5710_v52 = vcombine.low %v1794_v14, %v1802_v41  ;;  %v5299_v44 = vcombine.low %v1787_v43, %v14048_v54  ;;  %v4626_v59 = vcombine.low %v4617_v47, %v4624_v19  ;;  %11955 = vmatprep.mubr.msk.f32.mxu0 %vm12169_vm3, %v17593_v28 }
 0x16c   : > { %v5712_v49 = vcombine.low %v14048_v54, %v1803_v23  ;;  %v14060_v32 = vrot.slane %v4625_v3, %v12260_v5  ;;  %v5306_v4 = vrot.slane %v5297_v10, %v12260_v5  ;;  %v5313_v34 = vrot.slane %v11770_v17, %v12260_v5  ;;  %v14080_v17 = vpop.permute.xlu1 %4686 }
 0x16d   : > { %v5711_v60 = vcombine.low %v1804_v36, %v1787_v43  ;;  %v5726_v62 = vrot.slane %v5710_v52, %v12260_v5  ;;  %4708 = vrot.lane.b32.xlu0 %v4592_v2, %s12165_s10  ;;  %v5320_v47 = vrot.slane %v5299_v44, %v12260_v5  ;;  %v4640_v22 = vrot.slane %v4626_v59, %v12260_v5 }
 0x16e   : > { %v5740_v8 = vrot.slane %v5712_v49, %v12260_v5  ;;  %v5947_v63 = vsel %vm5938_vm1, %v5917_v38, %v13723_v18  ;;  %v5321_v14 = vcombine.low %v4624_v19, %v5306_v4  ;;  %v1806_v23 = vcombine.high %v254_v35, %v254_v35  ;;  %v14092_v4 = vpop.permute.xlu0 %5431 }
 0x16f   : > { %v5733_v48 = vrot.slane %v5711_v60, %v12260_v5  ;;  %v5741_v41 = vcombine.low %v5719_v51, %v5726_v62  ;;  %v5322_v55 = vcombine.low %v5313_v34, %v5320_v47  ;;  %v4641_v3 = vcombine.low %v14060_v32, %v4640_v22 }
 0x170   : > { %v1813_v10 = vrot.slane %v254_v35, %v12260_v5  ;;  %v11771_v2 = vcombine.high %v1787_v43, %v14048_v54  ;;  %v5329_v36 = vrot.slane %v5321_v14, %v12260_v5  ;;  %v1820_v18 = vrot.slane %v1806_v23, %v12260_v5 }
 0x171   : > { %v5742_v52 = vcombine.low %v5733_v48, %v5740_v8  ;;  %v5749_v44 = vrot.slane %v5741_v41, %v12260_v5  ;;  %v5336_v19 = vrot.slane %v5322_v55, %v12260_v5  ;;  %v5977_v35 = vsel %vm5968_vm2, %v5947_v63, %v13740_v31  ;;  %v17596_v48 = vld [vmem:[#allocation6_spill] sm:$0xff]  ;;  %v17597_v41 = vld [vmem:[#allocation8_spill] sm:$0xff] }
 0x172   : > { %v1821_v51 = vcombine.high %v1813_v10, %v1813_v10  ;;  %v1829_v38 = vrot.slane %v1813_v10, %v12260_v5  ;;  %v5348_v49 = vrot.slane %v11771_v2, %v12260_v5  ;;  %v1822_v32 = vcombine.high %v1820_v18, %v1820_v18  ;;  %11956 = vmatmul.mubr.msk.f32.gmra.mxu0 %vm6007_vm4, %v5977_v35 }
 0x173   : > { %v5756_v59 = vrot.slane %v5742_v52, %v12260_v5  ;;  %v1836_v43 = vrot.slane %v1820_v18, %v12260_v5  ;;  %v5337_v34 = vcombine.low %v5329_v36, %v5336_v19  ;;  %v1805_v62 = vcombine.high %v14048_v54, %v14048_v54  ;;  %11958 = vmatprep.mubr.msk.f32.mxu0 %vm12169_vm3, %v17593_v28  ;;  %v14104_v54 = vpop.permute.xlu1 %5851 }
 0x174   : > { %v1843_v60 = vrot.slane %v1821_v51, %v12260_v5  ;;  %v1851_v47 = vcombine.high %v1829_v38, %v1829_v38  ;;  %v1850_v22 = vrot.slane %v1822_v32, %v12260_v5  ;;  %v2297_v23 = vcombine.low %v17597_v41, %v17596_v48 }
 0x175   : > { %v5757_v8 = vcombine.low %v5749_v44, %v5756_v59  ;;  %v1852_v14 = vcombine.high %v1836_v43, %v1836_v43  ;;  %5453 = vrot.lane.b32.xlu1 %v5337_v34, %s12166_s11  ;;  %v5758_v10 = vcombine.low %v1805_v62, %v1829_v38  ;;  %v17598_v34 = vld [vmem:[#allocation9_spill] sm:$0xff] }
 0x176   : > { %v5339_v31 = vcombine.low %v1829_v38, %v1843_v60  ;;  %v11772_v63 = vcombine.high %v1829_v38, %v1843_v60  ;;  %v1853_v55 = vcombine.high %v1843_v60, %v1843_v60  ;;  %v5341_v2 = vcombine.low %v1836_v43, %v1850_v22 }
 0x177   : > { %5873 = vrot.lane.b32.xlu0 %v5757_v8, %s12167_s12  ;;  %v5759_v36 = vcombine.low %v1843_v60, %v1851_v47  ;;  %v5761_v52 = vcombine.low %v1850_v22, %v1852_v14  ;;  %v2313_v44 = vrot.slane %v2297_v23, %v12260_v5  ;;  %v5768_v59 = vrot.slane %v5758_v10, %v12260_v5  ;;  %v14115_v8 = vpop.permute.xlu0 %4688  ;;  %v14124_v10 = vpop.permute.xlu1 %5433 }
 0x178   : > { %v5355_v18 = vrot.slane %v5339_v31, %v12260_v5  ;;  %v5362_v19 = vrot.slane %v11772_v63, %v12260_v5  ;;  %v5760_v51 = vcombine.low %v1853_v55, %v1836_v43  ;;  %v5369_v32 = vrot.slane %v5341_v2, %v12260_v5 }
 0x179   : > { %v5775_v38 = vrot.slane %v5759_v36, %v12260_v5  ;;  %v5789_v35 = vrot.slane %v5761_v52, %v12260_v5  ;;  %v2328_v62 = vcombine.low %v17598_v34, %v2313_v44  ;;  %4710 = vrot.lane.b32.xlu1 %v4641_v3, %s12165_s10  ;;  %v1754_v43 = vcombine.high %v13975_v58, %v13975_v58 }
 0x17a   : > { %v5370_v60 = vcombine.low %v5348_v49, %v5355_v18  ;;  %v5782_v47 = vrot.slane %v5760_v51, %v12260_v5  ;;  %v5371_v48 = vcombine.low %v5362_v19, %v5369_v32  ;;  %v17599_v49 = vld [vmem:[#allocation10_spill] sm:$0xff]  ;;  %v5393_v58 = vrot.slane %v1852_v14, %v12260_v5  ;;  %v17600_v51 = vld [vmem:[#allocation12_spill] sm:$0xff]  ;;  %v17601_v32 = vld [vmem:[#allocation13_spill] sm:$0xff] }
 0x17b   : > { %v5790_v41 = vcombine.low %v5768_v59, %v5775_v38  ;;  %v2336_v23 = vrot.slane %v2328_v62, %v12260_v5  ;;  %v4648_v55 = vrot.slane %v1754_v43, %v12260_v5  ;;  %v1854_v44 = vcombine.high %v1850_v22, %v1850_v22  ;;  %v17602_v38 = vld [vmem:[#allocation11_spill] sm:$0xff]  ;;  %v14138_v34 = vpop.permute.xlu0 %5853  ;;  %v17604_v43 = vld [vmem:[#allocation16_spill] sm:$0xff] }
 0x17c   : > { %v5378_v31 = vrot.slane %v5370_v60, %v12260_v5  ;;  %v5791_v63 = vcombine.low %v5782_v47, %v5789_v35  ;;  %v5385_v2 = vrot.slane %v5371_v48, %v12260_v5  ;;  %v5919_v59 = vsel %vm5908_vm0, %v17600_v51, %v13809_v46  ;;  %v17603_v47 = vld [vmem:[#allocation17_spill] sm:$0xff] }
 0x17d   : > { %v5798_v3 = vrot.slane %v5790_v41, %v12260_v5  ;;  %v2344_v36 = vcombine.low %v2336_v23, %v17599_v49  ;;  %v2395_v35 = vcombine.low %v17602_v38, %v17601_v32  ;;  %v4655_v14 = vrot.slane %v4648_v55, %v12260_v5  ;;  %v17605_v23 = vld [vmem:[#allocation22_spill] sm:$0xff] }
 0x17e   : > { %v5805_v52 = vrot.slane %v5791_v63, %v12260_v5  ;;  %v5386_v18 = vcombine.low %v5378_v31, %v5385_v2  ;;  %v5813_v22 = vrot.slane %v1854_v44, %v12260_v5  ;;  %v2492_v48 = vcombine.low %v17604_v43, %v17603_v47  ;;  %v17606_v31 = vld [vmem:[#allocation21_spill] sm:$0xff]  ;;  %v17607_v2 = vld [vmem:[#allocation14_spill] sm:$0xff] }
 0x17f   : > { %v5918_v19 = vsel %vm5908_vm0, %v2344_v36, %v13758_v1  ;;  %v2411_v46 = vrot.slane %v2395_v35, %v12260_v5  ;;  %v5949_v41 = vsel %vm5938_vm1, %v5919_v59, %v13827_v12  ;;  %v2590_v63 = vcombine.low %v17606_v31, %v17605_v23  ;;  %v14172_v51 = vpop.permute.xlu0 %5435  ;;  %v17611_v59 = vld [vmem:[#allocation15_spill] sm:$0xff]  ;;  %v17612_v35 = vld [vmem:[#allocation24_spill] sm:$0xff] }
 0x180   : > { %v5806_v62 = vcombine.low %v5798_v3, %v5805_v52  ;;  %v5948_v60 = vsel %vm5938_vm1, %v5918_v19, %v13774_v25  ;;  %5455 = vrot.lane.b32.xlu0 %v5386_v18, %s12166_s11  ;;  %v5400_v25 = vrot.slane %v5393_v58, %v12260_v5  ;;  %v5979_v55 = vsel %vm5968_vm2, %v5949_v41, %v13844_v61  ;;  %v17608_v58 = vld [vmem:[#allocation19_spill] sm:$0xff]  ;;  %v17609_v18 = vld [vmem:[#allocation28_spill] sm:$0xff]  ;;  %v17610_v19 = vld [vmem:[#allocation26_spill] sm:$0xff] }
 0x181   : > { %v5978_v1 = vsel %vm5968_vm2, %v5948_v60, %v13793_v7  ;;  %v14157_v7 = vpop.permute.xlu1 %4690  ;;  %v2426_v3 = vcombine.low %v17607_v2, %v2411_v46  ;;  %v2502_v49 = vrot.slane %v2492_v48, %v12260_v5  ;;  %v2600_v36 = vrot.slane %v2590_v63, %v12260_v5  ;;  %v17614_v46 = vld [vmem:[#allocation20_spill] sm:$0xff] }
 0x182   : > { %5875 = vrot.lane.b32.xlu1 %v5806_v62, %s12167_s12  ;;  %11959 = vmatmul.mubr.msk.f32.gmra.mxu0 %vm6007_vm4, %v5978_v1  ;;  %v5820_v12 = vrot.slane %v5813_v22, %v12260_v5  ;;  %v2642_v61 = vcombine.low %v17610_v19, %v17609_v18  ;;  %v17613_v1 = vld [vmem:[#allocation18_spill] sm:$0xff]  ;;  %v17621_v19 = vld [vmem:[#allocation35_spill] sm:$0xff] }
 0x183   : > { %11961 = vmatprep.mubr.msk.f32.mxu0 %vm12169_vm3, %v17593_v28  ;;  %v2434_v52 = vrot.slane %v2426_v3, %v12260_v5  ;;  %v2524_v44 = vcombine.low %v2502_v49, %v17608_v58  ;;  %v2622_v62 = vcombine.low %v2600_v36, %v17612_v35  ;;  %v5921_v22 = vsel %vm5908_vm0, %v17613_v1, %v13933_v20  ;;  %v17618_v49 = vld [vmem:[#allocation25_spill] sm:$0xff] }
 0x184   : > { %4712 = vrot.lane.b32.xlu0 %v4655_v14, %s12165_s10  ;;  %v2670_v43 = vrot.slane %v2642_v61, %v12260_v5  ;;  %v5951_v20 = vsel %vm5938_vm1, %v5921_v22, %v13947_v24  ;;  %v3130_v24 = vcombine.low %v13866_v39, %v13876_v21  ;;  %v17620_v21 = vld [vmem:[#allocation36_spill] sm:$0xff] }
 0x185   : > { %v2442_v32 = vcombine.low %v2434_v52, %v17611_v59  ;;  %v2532_v38 = vrot.slane %v2524_v44, %v12260_v5  ;;  %v14181_v60 = vpop.permute.xlu1 %5855  ;;  %v2630_v23 = vrot.slane %v2622_v62, %v12260_v5  ;;  %v5981_v31 = vsel %vm5968_vm2, %v5951_v20, %v13967_v0  ;;  %v17627_v20 = vld [vmem:[#allocation40_spill] sm:$0xff] }
 0x186   : > { %5457 = vrot.lane.b32.xlu1 %v5400_v25, %s12166_s11  ;;  %11962 = vmatmul.mubr.msk.f32.gmra.mxu0 %vm6007_vm4, %v5979_v55  ;;  %v17617_v55 = vld [vmem:[#allocation30_spill] sm:$0xff]  ;;  %v3146_v18 = vrot.slane %v3130_v24, %v12260_v5  ;;  %v17630_v24 = vld [vmem:[#allocation39_spill] sm:$0xff] }
 0x187   : > { %11964 = vmatprep.mubr.msk.f32.mxu0 %vm12169_vm3, %v17593_v28  ;;  %v5920_v14 = vsel %vm5908_vm0, %v2442_v32, %v13860_v30  ;;  %v2540_v47 = vcombine.low %v2532_v38, %v17614_v46  ;;  %v4693_v30 = vpop.permute.xlu0 %4692  ;;  %v2638_v36 = vcombine.low %v2630_v23, %v17618_v49  ;;  %v17622_v38 = vld [vmem:[#allocation29_spill] sm:$0xff] }
 0x188   : > { %5877 = vrot.lane.b32.xlu0 %v5820_v12, %s12167_s12  ;;  %v5950_v48 = vsel %vm5938_vm1, %v5920_v14, %v13891_v40  ;;  %v17615_v40 = vld [vmem:[#allocation27_spill] sm:$0xff]  ;;  %v17626_v23 = vld [vmem:[#allocation41_spill] sm:$0xff] }
 0x189   : > { %v5980_v25 = vsel %vm5968_vm2, %v5950_v48, %v13910_v9  ;;  %v5922_v41 = vsel %vm5908_vm0, %v2540_v47, %v13987_v11  ;;  %v2672_v63 = vcombine.low %v17615_v40, %v2670_v43  ;;  %v17616_v9 = vld [vmem:[#allocation32_spill] sm:$0xff]  ;;  %v5438_v3 = vpop.permute.xlu1 %5437  ;;  %v17619_v12 = vld [vmem:[#allocation23_spill] sm:$0xff]  ;;  %v5924_v39 = vsel %vm5908_vm0, %v2638_v36, %v14080_v17  ;;  %v17623_v17 = vld [vmem:[#allocation33_spill] sm:$0xff] }
 0x18a   : > { %11965 = vmatmul.mubr.msk.f32.gmra.mxu0 %vm6007_vm4, %v5980_v25  ;;  %v2740_v2 = vcombine.low %v17617_v55, %v17616_v9  ;;  %v5952_v11 = vsel %vm5938_vm1, %v5922_v41, %v14004_v42  ;;  %v5923_v52 = vsel %vm5908_vm0, %v17619_v12, %v14035_v15  ;;  %v3161_v15 = vcombine.low %v13905_v6, %v3146_v18  ;;  %v17624_v43 = vld [vmem:[#allocation31_spill] sm:$0xff]  ;;  %v17625_v25 = vld [vmem:[#allocation38_spill] sm:$0xff]  ;;  %v17629_v49 = vld [vmem:[#allocation37_spill] sm:$0xff] }
 0x18b   : > { %11967 = vmatprep.mubr.msk.f32.mxu0 %vm12169_vm3, %v17593_v28  ;;  %v5982_v0 = vsel %vm5968_vm2, %v5952_v11, %v14019_v57  ;;  %v2686_v42 = vrot.slane %v2672_v63, %v12260_v5  ;;  %v5858_v44 = vpop.permute.xlu0 %5857  ;;  %v2837_v57 = vcombine.low %v17621_v19, %v17620_v21  ;;  %v5953_v61 = vsel %vm5938_vm1, %v5923_v52, %v14054_v53  ;;  %v17628_v40 = vld [vmem:[#allocation34_spill] sm:$0xff]  ;;  %v17631_v52 = vld [vmem:[#allocation43_spill] sm:$0xff] }
 0x18c   : > { %v2768_v58 = vrot.slane %v2740_v2, %v12260_v5  ;;  %v5983_v32 = vsel %vm5968_vm2, %v5953_v61, %v14068_v45  ;;  %v5954_v14 = vsel %vm5938_vm1, %v5924_v39, %v14092_v4  ;;  %v14241_v1 = vrot.slane %v3161_v15, %v12260_v5  ;;  %v17632_v19 = vld [vmem:[#allocation42_spill] sm:$0xff] }
 0x18d   : > { %v4695_v59 = vpop.permute.xlu1 %4694  ;;  %v2687_v35 = vcombine.low %v17622_v38, %v2686_v42  ;;  %v2859_v22 = vrot.slane %v2837_v57, %v12260_v5  ;;  %v5984_v45 = vsel %vm5968_vm2, %v5954_v14, %v14104_v54  ;;  %v5926_v48 = vsel %vm5908_vm0, %v17624_v43, %v14157_v7 }
 0x18e   : > { %11968 = vmatmul.mubr.msk.f32.gmra.mxu0 %vm6007_vm4, %v5981_v31  ;;  %v2770_v62 = vcombine.low %v17623_v17, %v2768_v58  ;;  %v3177_v6 = vcombine.low %v14241_v1, %v13950_v27  ;;  %v2935_v31 = vcombine.low %v17627_v20, %v17626_v23  ;;  %v5956_v7 = vsel %vm5938_vm1, %v5926_v48, %v14172_v51 }
 0x18f   : > { %11970 = vmatprep.mubr.msk.f32.mxu0 %vm12169_vm3, %v17593_v28  ;;  %v5440_v53 = vpop.permute.xlu0 %5439  ;;  %v5925_v4 = vsel %vm5908_vm0, %v2687_v35, %v14115_v8  ;;  %v2868_v41 = vcombine.low %v2859_v22, %v17625_v25  ;;  %v5986_v11 = vsel %vm5968_vm2, %v5956_v7, %v14181_v60  ;;  %v5928_v36 = vsel %vm5908_vm0, %v17629_v49, %v4695_v59  ;;  %v17633_v59 = vld [vmem:[#allocation44_spill] sm:$0xff] }
 0x190   : > { %v2784_v46 = vrot.slane %v2770_v62, %v12260_v5  ;;  %v5955_v54 = vsel %vm5938_vm1, %v5925_v4, %v14124_v10  ;;  %v2957_v2 = vrot.slane %v2935_v31, %v12260_v5  ;;  %v5958_v60 = vsel %vm5938_vm1, %v5928_v36, %v5440_v53 }
 0x191   : > { %v5860_v47 = vpop.permute.xlu1 %5859  ;;  %v5985_v8 = vsel %vm5968_vm2, %v5955_v54, %v14138_v34  ;;  %v2882_v55 = vrot.slane %v2868_v41, %v12260_v5  ;;  %v3032_v4 = vcombine.low %v13678_v16, %v13666_v13 }
 0x192   : > { %11971 = vmatmul.mubr.msk.f32.gmra.mxu0 %vm6007_vm4, %v5982_v0  ;;  %v2785_v63 = vcombine.low %v17628_v40, %v2784_v46  ;;  %v2966_v42 = vcombine.low %v2957_v2, %v17631_v52  ;;  %v5988_v21 = vsel %vm5968_vm2, %v5958_v60, %v5860_v47 }
 0x193   : > { %11973 = vmatprep.mubr.msk.f32.mxu0 %vm12169_vm3, %v17593_v28  ;;  %v4697_v9 = vpop.permute.xlu0 %4696  ;;  %v2883_v51 = vcombine.low %v17630_v24, %v2882_v55  ;;  %v3048_v47 = vrot.slane %v3032_v4, %v12260_v5 }
 0x194   : > { %v5927_v34 = vsel %vm5908_vm0, %v2785_v63, %v4693_v30  ;;  %v2980_v39 = vrot.slane %v2966_v42, %v12260_v5 }
 0x195   : > { %v5442_v10 = vpop.permute.xlu1 %5441  ;;  %v5957_v12 = vsel %vm5938_vm1, %v5927_v34, %v5438_v3  ;;  %v5929_v18 = vsel %vm5908_vm0, %v2883_v51, %v4697_v9  ;;  %v3063_v41 = vcombine.low %v13738_v26, %v3048_v47  ;;  %v3233_v51 = vrot.slane %v14015_v37, %v12260_v5 }
 0x196   : > { %11974 = vmatmul.mubr.msk.f32.gmra.mxu0 %vm6007_vm4, %v5983_v32  ;;  %v5987_v58 = vsel %vm5968_vm2, %v5957_v12, %v5858_v44  ;;  %v5959_v44 = vsel %vm5938_vm1, %v5929_v18, %v5442_v10  ;;  %v2981_v15 = vcombine.low %v17633_v59, %v2980_v39 }
 0x197   : > { %11976 = vmatprep.mubr.msk.f32.mxu0 %vm12169_vm3, %v17593_v28  ;;  %v5862_v0 = vpop.permute.xlu0 %5861  ;;  %v3071_v13 = vrot.slane %v3063_v41, %v12260_v5  ;;  %v3240_v12 = vrot.slane %v3233_v51, %v12260_v5 }
 0x198   : > { %v5989_v32 = vsel %vm5968_vm2, %v5959_v44, %v5862_v0 }
 0x199   : > { %v4699_v30 = vpop.permute.xlu1 %4698  ;;  %v3079_v16 = vcombine.low %v3071_v13, %v13784_v50 }
 0x19a   : > { %11977 = vmatmul.mubr.msk.f32.gmra.mxu0 %vm6007_vm4, %v5984_v45  ;;  %v5930_v57 = vsel %vm5908_vm0, %v17632_v19, %v4699_v30  ;;  %v14366_v30 = vld [vmem:[%s17335_s3] ss:$0 sm:$0xff] }
 0x19b   : > { %11979 = vmatprep.mubr.msk.f32.mxu0 %vm12169_vm3, %v17593_v28 }
 0x19d   : > { %v5864_v61 = vpop.permute.xlu1 %5863 }
 0x19e   : > { %11980 = vmatmul.mubr.msk.f32.gmra.mxu0 %vm6007_vm4, %v5985_v8 }
 0x19f   : > { %11982 = vmatprep.mubr.msk.f32.mxu0 %vm12169_vm3, %v17593_v28  ;;  %v5444_v3 = vpop.permute.xlu0 %5443 }
 0x1a0   : > { %v5960_v38 = vsel %vm5938_vm1, %v5930_v57, %v5444_v3 }
 0x1a1   : > { %v5990_v62 = vsel %vm5968_vm2, %v5960_v38, %v5864_v61 }
 0x1a2   : > { %11983 = vmatmul.mubr.msk.f32.gmra.mxu0 %vm6007_vm4, %v5986_v11 }
 0x1a3   : > { %11985 = vmatprep.mubr.msk.f32.mxu0 %vm12169_vm3, %v17593_v28  ;;  %v4701_v35 = vpop.permute.xlu0 %4700 }
 0x1a4   : > { %v5931_v17 = vsel %vm5908_vm0, %v2981_v15, %v4701_v35 }
 0x1a6   : > { %11986 = vmatmul.mubr.msk.f32.gmra.mxu0 %vm6007_vm4, %v5987_v58 }
 0x1a7   : > { %11988 = vmatprep.mubr.msk.f32.mxu0 %vm12169_vm3, %v17593_v28 }
 0x1aa   : > { %11989 = vmatmul.mubr.msk.f32.gmra.mxu0 %vm6007_vm4, %v5988_v21 }
 0x1ab   : > { %11991 = vmatprep.mubr.msk.f32.mxu0 %vm12169_vm3, %v17593_v28 }
 0x1ad   : > { %v5446_v14 = vpop.permute.xlu1 %5445 }
 0x1ae   : > { %11992 = vmatmul.mubr.msk.f32.gmra.mxu0 %vm6007_vm4, %v5989_v32  ;;  %v5961_v53 = vsel %vm5938_vm1, %v5931_v17, %v5446_v14 }
 0x1af   : > { %11994 = vmatprep.mubr.msk.f32.mxu0 %vm12169_vm3, %v17593_v28 }
 0x1b1   : > { %v4703_v46 = vpop.permute.xlu1 %4702 }
 0x1b2   : > { %11995 = vmatmul.mubr.msk.f32.gmra.mxu0 %vm6007_vm4, %v5990_v62  ;;  %v5932_v43 = vsel %vm5908_vm0, %v13642_v29, %v4703_v46 }
 0x1b3   : > { %11997 = vmatprep.mubr.msk.f32.mxu0 %vm12169_vm3, %v17593_v28 }
 0x1b4   : > { %v5866_v22 = vpop.permute.xlu0 %5865 }
 0x1b5   : > { %v5991_v45 = vsel %vm5968_vm2, %v5961_v53, %v5866_v22 }
 0x1b6   : > { %11998 = vmatmul.mubr.msk.f32.gmra.mxu0 %vm6007_vm4, %v5991_v45 }
 0x1b7   : > { %12000 = vmatprep.mubr.msk.f32.mxu0 %vm12169_vm3, %v17593_v28 }
 0x1be   : > { %v5448_v48 = vpop.permute.xlu0 %5447 }
 0x1bf   : > { %v5962_v25 = vsel %vm5938_vm1, %v5932_v43, %v5448_v48 }
 0x1c0   : > { %v5868_v54 = vpop.permute.xlu1 %5867 }
 0x1c1   : > { %v5992_v23 = vsel %vm5968_vm2, %v5962_v25, %v5868_v54 }
 0x1c2   : > { %12001 = vmatmul.mubr.msk.f32.gmra.mxu0 %vm6007_vm4, %v5992_v23 }
 0x1c3   : > { %12003 = vmatprep.mubr.msk.f32.mxu0 %vm12169_vm3, %v17593_v28  ;;  %v4705_v20 = vpop.permute.xlu0 %4704 }
 0x1c4   : > { %v5933_v29 = vsel %vm5908_vm0, %v3079_v16, %v4705_v20 }
 0x1ce   : > { %v5450_v31 = vpop.permute.xlu1 %5449 }
 0x1cf   : > { %v5963_v8 = vsel %vm5938_vm1, %v5933_v29, %v5450_v31  ;;  %v5870_v40 = vpop.permute.xlu0 %5869 }
 0x1d0   : > { %v5993_v26 = vsel %vm5968_vm2, %v5963_v8, %v5870_v40 }
 0x1d1   : > { %12004 = vmatmul.mubr.msk.f32.gmra.mxu0 %vm6007_vm4, %v5993_v26 }
 0x1d2   : > { %12006 = vmatprep.mubr.msk.f32.mxu0 %vm12169_vm3, %v17593_v28  ;;  %v4707_v63 = vpop.permute.xlu1 %4706 }
 0x1d3   : > { %v5934_v9 = vsel %vm5908_vm0, %v13863_v56, %v4707_v63 }
 0x1da   : > { %v5872_v7 = vpop.permute.xlu1 %5871 }
 0x1db   : > { %v5452_v50 = vpop.permute.xlu0 %5451 }
 0x1dc   : > { %v5964_v55 = vsel %vm5938_vm1, %v5934_v9, %v5452_v50 }
 0x1dd   : > { %v5994_v10 = vsel %vm5968_vm2, %v5964_v55, %v5872_v7 }
 0x1de   : > { %12007 = vmatmul.mubr.msk.f32.gmra.mxu0 %vm6007_vm4, %v5994_v10 }
 0x1df   : > { %12009 = vmatprep.mubr.msk.f32.mxu0 %vm12169_vm3, %v17593_v28  ;;  %v4709_v2 = vpop.permute.xlu0 %4708 }
 0x1e0   : > { %v5935_v11 = vsel %vm5908_vm0, %v3177_v6, %v4709_v2 }
 0x1e7   : > { %v5454_v34 = vpop.permute.xlu1 %5453 }
 0x1e8   : > { %v5965_v56 = vsel %vm5938_vm1, %v5935_v11, %v5454_v34 }
 0x1e9   : > { %v5874_v49 = vpop.permute.xlu0 %5873 }
 0x1ea   : > { %v5995_v36 = vsel %vm5968_vm2, %v5965_v56, %v5874_v49 }
 0x1eb   : > { %12010 = vmatmul.mubr.msk.f32.gmra.mxu0 %vm6007_vm4, %v5995_v36  ;;  %v4711_v24 = vpop.permute.xlu1 %4710 }
 0x1ec   : > { %12012 = vmatprep.mubr.msk.f32.mxu0 %vm12169_vm3, %v17593_v28  ;;  %v5936_v27 = vsel %vm5908_vm0, %v14028_v33, %v4711_v24 }
 0x1f2   : > { %v5456_v1 = vpop.permute.xlu0 %5455 }
 0x1f3   : > { %v5966_v6 = vsel %vm5938_vm1, %v5936_v27, %v5456_v1 }
 0x1f4   : > { %v5876_v0 = vpop.permute.xlu1 %5875 }
 0x1f5   : > { %v5996_v52 = vsel %vm5968_vm2, %v5966_v6, %v5876_v0 }
 0x1f6   : > { %12013 = vmatmul.mubr.msk.f32.gmra.mxu0 %vm6007_vm4, %v5996_v52  ;;  %v4713_v42 = vpop.permute.xlu0 %4712 }
 0x1f7   : > { %12015 = vmatprep.mubr.msk.f32.mxu0 %vm12169_vm3, %v17593_v28  ;;  %v5937_v58 = vsel %vm5908_vm0, %v3240_v12, %v4713_v42 }
 0x1f8   : > { %v5458_v37 = vpop.permute.xlu1 %5457 }
 0x1f9   : > { %v5967_v60 = vsel %vm5938_vm1, %v5937_v58, %v5458_v37 }
 0x1fa   : > { %v5878_v33 = vpop.permute.xlu0 %5877 }
 0x1fb   : > { %v5997_v18 = vsel %vm5968_vm2, %v5967_v60, %v5878_v33 }
 0x1fc   : > { %12016 = vmatmul.mubr.msk.f32.gmra.mxu0 %vm6007_vm4, %v5997_v18 }
 0x1fd   : > { %v6161_v39 = vpop.f32.mrf.mxu0 }
 0x1fe   : > { %v6162_v21 = vadd.f32 %v14366_v30, %v6161_v39 }
 0x1ff   : > { %v11933_v3 = vpop.f32.mrf.mxu0 }
 0x200   : > { %v6305_v44 = vmax.f32 %v6162_v21, 0.0 }
 0x201   : > { %v6166_v19 = vpop.f32.mrf.mxu0 }
 0x202   : > { %v6370_v57 = vrot.slane %v6305_v44, %v12260_v5  ;;  %v6167_v61 = vadd.f32 %v14366_v30, %v6166_v19  ;;  %v6363_v7 = vcombine.high %v6305_v44, %v6305_v44 }
 0x203   : > { %v11936_v59 = vpop.f32.mrf.mxu0 }
 0x204   : > { %v6378_v15 = vcombine.high %v6370_v57, %v6370_v57  ;;  %v6306_v32 = vmax.f32 %v6167_v61, 0.0  ;;  %v14374_v38 = vrot.slane %v6370_v57, %v12260_v5  ;;  %v6377_v56 = vrot.slane %v6363_v7, %v12260_v5 }
 0x206   : > { %17634 = vst [vmem:[#allocation5_spill] sm:$0xff] %v14374_v38  ;;  %v14377_v35 = vrot.slane %v6378_v15, %v12260_v5  ;;  %v6412_v17 = vcombine.high %v6306_v32, %v6306_v32  ;;  %v6419_v62 = vrot.slane %v6306_v32, %v12260_v5  ;;  %v6379_v42 = vcombine.high %v6377_v56, %v6377_v56 }
 0x207   : > { %v14454_v32 = vrot.slane %v6377_v56, %v12260_v5 }
 0x208   : > { %17635 = vst [vmem:[#allocation7_spill] sm:$0xff] %v14377_v35  ;;  %v6426_v22 = vrot.slane %v6412_v17, %v12260_v5  ;;  %v6427_v45 = vcombine.high %v6419_v62, %v6419_v62  ;;  %v14386_v46 = vrot.slane %v6419_v62, %v12260_v5  ;;  %v14445_v19 = vrot.slane %v6379_v42, %v12260_v5 }
 0x209   : > { %17648 = vst [vmem:[#allocation19_spill] sm:$0xff] %v14454_v32  ;;  %v6408_v62 = vcombine.high %v14374_v38, %v14374_v38 }
 0x20a   : > { %v6428_v4 = vcombine.high %v6426_v22, %v6426_v22  ;;  %17636 = vst [vmem:[#allocation6_spill] sm:$0xff] %v14386_v46  ;;  %v14389_v47 = vrot.slane %v6427_v45, %v12260_v5  ;;  %v14392_v48 = vrot.slane %v6426_v22, %v12260_v5  ;;  %17646 = vst [vmem:[#allocation21_spill] sm:$0xff] %v14445_v19 }
 0x20b   : > { %v6171_v43 = vpop.f32.mrf.mxu0 }
 0x20c   : > { %17637 = vst [vmem:[#allocation8_spill] sm:$0xff] %v14389_v47  ;;  %17638 = vst [vmem:[#allocation9_spill] sm:$0xff] %v14392_v48  ;;  %v14395_v25 = vrot.slane %v6428_v4, %v12260_v5  ;;  %v6172_v23 = vadd.f32 %v14366_v30, %v6171_v43  ;;  %v6410_v4 = vcombine.high %v14377_v35, %v14377_v35 }
 0x20d   : > { %v11939_v13 = vpop.f32.mrf.mxu0 }
 0x20e   : > { %17639 = vst [vmem:[#allocation10_spill] sm:$0xff] %v14395_v25  ;;  %v6307_v20 = vmax.f32 %v6172_v23, 0.0  ;;  %v6460_v8 = vcombine.high %v14395_v25, %v14395_v25 }
 0x210   : > { %v6461_v29 = vcombine.high %v6307_v20, %v6307_v20  ;;  %v6468_v31 = vrot.slane %v6307_v20, %v12260_v5  ;;  %v6411_v20 = vcombine.high %v14445_v19, %v14445_v19 }
 0x212   : > { %v6475_v40 = vrot.slane %v6461_v29, %v12260_v5  ;;  %v14409_v26 = vrot.slane %v6468_v31, %v12260_v5  ;;  %v6476_v57 = vcombine.high %v6468_v31, %v6468_v31  ;;  %v6457_v29 = vcombine.high %v14386_v46, %v14386_v46 }
 0x214   : > { %17640 = vst [vmem:[#allocation12_spill] sm:$0xff] %v14409_v26  ;;  %v6477_v9 = vcombine.high %v6475_v40, %v6475_v40  ;;  %v14412_v50 = vcombine.low %v6460_v8, %v14409_v26  ;;  %v14477_v31 = vrot.slane %v6476_v57, %v12260_v5 }
 0x215   : > { %v6176_v63 = vpop.f32.mrf.mxu0 }
 0x216   : > { %17641 = vst [vmem:[#allocation13_spill] sm:$0xff] %v14412_v50  ;;  %v6177_v55 = vadd.f32 %v14366_v30, %v6176_v63  ;;  %v14416_v2 = vrot.slane %v6477_v9, %v12260_v5  ;;  %17651 = vst [vmem:[#allocation15_spill] sm:$0xff] %v14477_v31  ;;  %v6459_v9 = vcombine.high %v14389_v47, %v14389_v47 }
 0x217   : > { %v11942_v10 = vpop.f32.mrf.mxu0 }
 0x218   : > { %17642 = vst [vmem:[#allocation11_spill] sm:$0xff] %v14416_v2  ;;  %v6308_v11 = vmax.f32 %v6177_v55, 0.0  ;;  %v6509_v27 = vcombine.high %v14416_v2, %v14416_v2  ;;  %v6458_v10 = vcombine.high %v14392_v48, %v14392_v48  ;;  %v14519_v42 = vcombine.low %v6459_v9, %v14392_v48 }
 0x219   : > { %v6181_v34 = vpop.f32.mrf.mxu0 }
 0x21a   : > { %v6510_v49 = vcombine.high %v6308_v11, %v6308_v11  ;;  %v6517_v36 = vrot.slane %v6308_v11, %v12260_v5  ;;  %v6182_v24 = vadd.f32 %v14366_v30, %v6181_v34  ;;  %v14491_v11 = vrot.slane %v6475_v40, %v12260_v5  ;;  %17658 = vst [vmem:[#allocation25_spill] sm:$0xff] %v14519_v42 }
 0x21b   : > { %v11945_v51 = vpop.f32.mrf.mxu0  ;;  %v6506_v34 = vcombine.high %v14409_v26, %v14409_v26  ;;  %v14508_v40 = vcombine.low %v6411_v20, %v14386_v46 }
 0x21c   : > { %v14424_v1 = vrot.slane %v6510_v49, %v12260_v5  ;;  %v6309_v6 = vmax.f32 %v6182_v24, 0.0  ;;  %v14427_v12 = vrot.slane %v6517_v36, %v12260_v5  ;;  %v6525_v7 = vcombine.high %v6517_v36, %v6517_v36  ;;  %17652 = vst [vmem:[#allocation24_spill] sm:$0xff] %v14491_v11 }
 0x21d   : > { %v6186_v0 = vpop.f32.mrf.mxu0  ;;  %v14498_v49 = vcombine.low %v14377_v35, %v6408_v62  ;;  %v14501_v36 = vcombine.low %v6410_v4, %v14454_v32  ;;  %17656 = vst [vmem:[#allocation32_spill] sm:$0xff] %v14508_v40  ;;  %v14533_v57 = vcombine.low %v14477_v31, %v6506_v34 }
 0x21e   : > { %17643 = vst [vmem:[#allocation17_spill] sm:$0xff] %v14427_v12  ;;  %v6187_v52 = vadd.f32 %v14366_v30, %v6186_v0  ;;  %v6526_v58 = vcombine.high %v14424_v1, %v14424_v1  ;;  %v14433_v60 = vcombine.low %v6509_v27, %v14427_v12  ;;  %v6559_v33 = vcombine.high %v6309_v6, %v6309_v6 }
 0x21f   : > { %v11948_v37 = vpop.f32.mrf.mxu0  ;;  %v14436_v18 = vrot.slane %v6309_v6, %v12260_v5  ;;  %17653 = vst [vmem:[#allocation18_spill] sm:$0xff] %v14498_v49  ;;  %17654 = vst [vmem:[#allocation20_spill] sm:$0xff] %v14501_v36  ;;  %v14511_v27 = vcombine.low %v14389_v47, %v6457_v29  ;;  %v6508_v6 = vcombine.high %v14477_v31, %v14477_v31 }
 0x220   : > { %17644 = vst [vmem:[#allocation16_spill] sm:$0xff] %v14433_v60  ;;  %v14439_v39 = vrot.slane %v6526_v58, %v12260_v5  ;;  %v6310_v21 = vmax.f32 %v6187_v52, 0.0  ;;  %v14442_v44 = vrot.slane %v6559_v33, %v12260_v5  ;;  %v14522_v58 = vrot.slane %v6525_v7, %v12260_v5  ;;  %17662 = vst [vmem:[#allocation29_spill] sm:$0xff] %v14533_v57 }
 0x221   : > { %v6191_v3 = vpop.f32.mrf.mxu0  ;;  %v14451_v59 = vrot.slane %v14436_v18, %v12260_v5  ;;  %17657 = vst [vmem:[#allocation30_spill] sm:$0xff] %v14511_v27 }
 0x222   : > { %17645 = vst [vmem:[#allocation22_spill] sm:$0xff] %v14439_v39  ;;  %v6558_v61 = vcombine.high %v14439_v39, %v14439_v39  ;;  %v6575_v17 = vcombine.high %v14442_v44, %v14442_v44  ;;  %v6608_v45 = vcombine.high %v6310_v21, %v6310_v21  ;;  %v14469_v23 = vrot.slane %v6310_v21, %v12260_v5 }
 0x223   : > { %17647 = vst [vmem:[#allocation14_spill] sm:$0xff] %v14451_v59  ;;  %v11951_v15 = vpop.f32.mrf.mxu0  ;;  %v6192_v13 = vadd.f32 %v14366_v30, %v6191_v3  ;;  %17659 = vst [vmem:[#allocation23_spill] sm:$0xff] %v14522_v58  ;;  %v14528_v21 = vcombine.low %v14395_v25, %v6458_v10 }
 0x224   : > { %v14461_v22 = vcombine.low %v6558_v61, %v14451_v59  ;;  %v14466_v43 = vrot.slane %v6575_v17, %v12260_v5  ;;  %v14480_v8 = vrot.slane %v6608_v45, %v12260_v5  ;;  %v14505_v24 = vrot.slane %v14469_v23, %v12260_v5 }
 0x225   : > { %v6311_v51 = vmax.f32 %v6192_v13, 0.0  ;;  %17661 = vst [vmem:[#allocation35_spill] sm:$0xff] %v14528_v21  ;;  %v6555_v61 = vcombine.high %v14427_v12, %v14427_v12  ;;  %v14543_v13 = vcombine.low %v6508_v6, %v14491_v11 }
 0x226   : > { %17649 = vst [vmem:[#allocation28_spill] sm:$0xff] %v14461_v22  ;;  %17650 = vst [vmem:[#allocation26_spill] sm:$0xff] %v14466_v43  ;;  %v6607_v55 = vcombine.high %v14466_v43, %v14466_v43  ;;  %v6624_v56 = vcombine.high %v14480_v8, %v14480_v8 }
 0x227   : > { %17655 = vst [vmem:[#allocation27_spill] sm:$0xff] %v14505_v24  ;;  %v6657_v33 = vcombine.high %v6311_v51, %v6311_v51  ;;  %v6664_v62 = vrot.slane %v6311_v51, %v12260_v5  ;;  %17663 = vst [vmem:[#allocation33_spill] sm:$0xff] %v14543_v13  ;;  %v14560_v51 = vcombine.low %v14522_v58, %v6555_v61 }
 0x228   : > { %v14516_v0 = vrot.slane %v6624_v56, %v12260_v5  ;;  %v14525_v37 = vcombine.low %v6607_v55, %v14505_v24  ;;  %v6557_v55 = vcombine.high %v14522_v58, %v14522_v58  ;;  %v14557_v56 = vrot.slane %v14424_v1, %v12260_v5 }
 0x229   : > { %v6671_v45 = vrot.slane %v6657_v33, %v12260_v5  ;;  %v6672_v10 = vcombine.high %v6664_v62, %v6664_v62  ;;  %17665 = vst [vmem:[#allocation38_spill] sm:$0xff] %v14560_v51  ;;  %v14563_v6 = vrot.slane %v6664_v62, %v12260_v5  ;;  %v6574_v1 = vcombine.high %v14436_v18, %v14436_v18 }
 0x22a   : > { %v6196_v52 = vpop.f32.mrf.mxu0  ;;  %17660 = vst [vmem:[#allocation36_spill] sm:$0xff] %v14525_v37  ;;  %v6656_v9 = vcombine.high %v14516_v0, %v14516_v0  ;;  %17664 = vst [vmem:[#allocation31_spill] sm:$0xff] %v14557_v56  ;;  %v14582_v41 = vcombine.low %v6557_v55, %v14557_v56  ;;  %v14593_v18 = vrot.slane %v14442_v44, %v12260_v5 }
 0x22b   : > { %v6197_v4 = vadd.f32 %v14366_v30, %v6196_v52  ;;  %v6673_v34 = vcombine.high %v6671_v45, %v6671_v45  ;;  %17666 = vst [vmem:[#allocation41_spill] sm:$0xff] %v14563_v6  ;;  %v14570_v16 = vrot.slane %v6672_v10, %v12260_v5  ;;  %v14587_v10 = vrot.slane %v6671_v45, %v12260_v5 }
 0x22c   : > { %v11954_v15 = vpop.f32.mrf.mxu0  ;;  %v14578_v61 = vcombine.low %v6656_v9, %v14563_v6  ;;  %17670 = vst [vmem:[#allocation39_spill] sm:$0xff] %v14582_v41  ;;  %17672 = vst [vmem:[#allocation42_spill] sm:$0xff] %v14593_v18 }
 0x22d   : > { %v6312_v52 = vmax.f32 %v6197_v4, 0.0  ;;  %17667 = vst [vmem:[#allocation40_spill] sm:$0xff] %v14570_v16  ;;  %v14573_v54 = vrot.slane %v6673_v34, %v12260_v5  ;;  %17671 = vst [vmem:[#allocation43_spill] sm:$0xff] %v14587_v10  ;;  %v6704_v34 = vcombine.high %v14570_v16, %v14570_v16 }
 0x22e   : > { %17669 = vst [vmem:[#allocation37_spill] sm:$0xff] %v14578_v61 }
 0x22f   : > { %17668 = vst [vmem:[#allocation34_spill] sm:$0xff] %v14573_v54  ;;  %v6706_v62 = vcombine.high %v6312_v52, %v6312_v52  ;;  %v6713_v4 = vrot.slane %v6312_v52, %v12260_v5  ;;  %v14600_v3 = vcombine.low %v6704_v34, %v14587_v10  ;;  %v9268_v17 = vcombine.low %v14587_v10, %v14573_v54 }
 0x230   : > { %v11839_v53 = vcombine.high %v14587_v10, %v14573_v54  ;;  %v14614_v34 = vrot.slane %v6574_v1, %v12260_v5  ;;  %v6705_v31 = vcombine.high %v14573_v54, %v14573_v54 }
 0x231   : > { %v6720_v9 = vrot.slane %v6706_v62, %v12260_v5  ;;  %v6721_v52 = vcombine.high %v6713_v4, %v6713_v4  ;;  %v14597_v55 = vrot.slane %v6713_v4, %v12260_v5  ;;  %17673 = vst [vmem:[#allocation44_spill] sm:$0xff] %v14600_v3 }
 0x232   : > { %v6201_v14 = vpop.f32.mrf.mxu0  ;;  %17674 = vst [vmem:[#allocation45_spill] sm:$0xff] %v14614_v34  ;;  %v14620_v7 = vrot.slane %v11839_v53, %v12260_v5  ;;  %v6606_v53 = vcombine.high %v14614_v34, %v14614_v34 }
 0x233   : > { %v6202_v45 = vadd.f32 %v14366_v30, %v6201_v14  ;;  %v6722_v44 = vcombine.high %v6720_v9, %v6720_v9  ;;  %v14608_v33 = vrot.slane %v6720_v9, %v12260_v5  ;;  %v6743_v62 = vrot.slane %v6721_v52, %v12260_v5 }
 0x234   : > { %v11957_v63 = vpop.f32.mrf.mxu0  ;;  %v6751_v4 = vcombine.high %v14597_v55, %v14597_v55  ;;  %17676 = vst [vmem:[#allocation47_spill] sm:$0xff] %v14620_v7  ;;  %v14826_v58 = vcombine.low %v6705_v31, %v14597_v55 }
 0x235   : > { %v6313_v14 = vmax.f32 %v6202_v45, 0.0  ;;  %v14617_v63 = vrot.slane %v9268_v17, %v12260_v5  ;;  %v14623_v29 = vrot.slane %v6722_v44, %v12260_v5  ;;  %v6752_v9 = vcombine.high %v14608_v33, %v14608_v33 }
 0x236   : > { %v14627_v52 = vcombine.low %v6743_v62, %v6751_v4  ;;  %v9270_v20 = vcombine.low %v14597_v55, %v6743_v62  ;;  %v11840_v1 = vcombine.high %v14597_v55, %v6743_v62  ;;  %v6604_v44 = vcombine.high %v14451_v59, %v14451_v59  ;;  %17690 = vst [vmem:[#allocation61_spill] sm:$0xff] %v14826_v58 }
 0x237   : > { %17675 = vst [vmem:[#allocation46_spill] sm:$0xff] %v14617_v63  ;;  %v6755_v15 = vcombine.high %v6313_v14, %v6313_v14  ;;  %v6762_v45 = vrot.slane %v6313_v14, %v12260_v5  ;;  %v9300_v17 = vcombine.low %v14617_v63, %v14620_v7  ;;  %v6754_v4 = vcombine.high %v14623_v29, %v14623_v29 }
 0x238   : > { %v14639_v25 = vrot.slane %v9270_v20, %v12260_v5  ;;  %v14648_v28 = vrot.slane %v11840_v1, %v12260_v5  ;;  %v9317_v47 = vcombine.low %v14623_v29, %v6752_v9 }
 0x239   : > { %v6769_v62 = vrot.slane %v6755_v15, %v12260_v5  ;;  %v6770_v48 = vcombine.high %v6762_v45, %v6762_v45  ;;  %v14645_v14 = vrot.slane %v6762_v45, %v12260_v5  ;;  %v9308_v20 = vrot.slane %v9300_v17, %v12260_v5 }
 0x23a   : > { %17677 = vst [vmem:[#allocation48_spill] sm:$0xff] %v14639_v25  ;;  %17678 = vst [vmem:[#allocation49_spill] sm:$0xff] %v14648_v28  ;;  %v9301_v35 = vcombine.low %v14639_v25, %v14648_v28  ;;  %v14693_v36 = vrot.slane %v9317_v47, %v12260_v5 }
 0x23b   : > { %v6771_v46 = vcombine.high %v6769_v62, %v6769_v62  ;;  %v14658_v15 = vrot.slane %v6769_v62, %v12260_v5  ;;  %v14661_v45 = vrot.slane %v6770_v48, %v12260_v5  ;;  %v6800_v1 = vcombine.high %v14645_v14, %v14645_v14 }
 0x23c   : > { %v9318_v9 = vcombine.low %v6754_v4, %v14645_v14  ;;  %v9315_v57 = vrot.slane %v9301_v35, %v12260_v5  ;;  %17680 = vst [vmem:[#allocation51_spill] sm:$0xff] %v14693_v36 }
 0x23d   : > { %v14672_v38 = vrot.slane %v6771_v46, %v12260_v5  ;;  %v6802_v13 = vcombine.high %v14661_v45, %v14661_v45  ;;  %v9319_v50 = vcombine.low %v14661_v45, %v6800_v1  ;;  %v6801_v46 = vcombine.high %v14658_v15, %v14658_v15 }
 0x23e   : > { %v14683_v17 = vrot.slane %v9318_v9, %v12260_v5  ;;  %v6623_v1 = vcombine.high %v14469_v23, %v14469_v23  ;;  %v9316_v49 = vcombine.low %v9308_v20, %v9315_v57  ;;  %v14714_v57 = vcombine.low %v14614_v34, %v6604_v44 }
 0x23f   : > { %v9320_v40 = vcombine.low %v6802_v13, %v14658_v15  ;;  %v14701_v4 = vrot.slane %v9319_v50, %v12260_v5  ;;  %v9366_v13 = vcombine.low %v14672_v38, %v6801_v46  ;;  %v6803_v50 = vcombine.high %v14672_v38, %v14672_v38 }
 0x240   : > { %17679 = vst [vmem:[#allocation50_spill] sm:$0xff] %v14683_v17  ;;  %v9349_v47 = vcombine.low %v14693_v36, %v14683_v17  ;;  %17682 = vst [vmem:[#allocation53_spill] sm:$0xff] %v14714_v57  ;;  %10186 = vrot.lane.b32.xlu0 %v9316_v49, %s12166_s11  ;;  %v14729_v44 = vrot.slane %v6623_v1, %v12260_v5  ;;  %v17693_v31 = vcombine.high %v14645_v14, %v14661_v45 }
 0x241   : > { %17681 = vst [vmem:[#allocation52_spill] sm:$0xff] %v14701_v4  ;;  %v14704_v48 = vrot.slane %v9320_v40, %v12260_v5  ;;  %v14721_v40 = vrot.slane %v14480_v8, %v12260_v5  ;;  %v14726_v46 = vrot.slane %v9366_v13, %v12260_v5 }
 0x242   : > { %v6206_v62 = vpop.f32.mrf.mxu0  ;;  %17683 = vst [vmem:[#allocation54_spill] sm:$0xff] %v14729_v44  ;;  %v9357_v35 = vrot.slane %v9349_v47, %v12260_v5  ;;  %v6655_v13 = vcombine.high %v14729_v44, %v14729_v44  ;;  %v14844_v55 = vrot.slane %v17693_v31, %v12260_v5 }
 0x243   : > { %v6207_v9 = vadd.f32 %v14366_v30, %v6206_v62  ;;  %v9350_v62 = vcombine.low %v14701_v4, %v14704_v48  ;;  %v6654_v47 = vcombine.high %v14721_v40, %v14721_v40 }
 0x244   : > { %v11960_v19 = vpop.f32.mrf.mxu0  ;;  %17694 = vst [vmem:[#allocation63_spill] sm:$0xff] %v14844_v55 }
 0x245   : > { %v6314_v19 = vmax.f32 %v6207_v9, 0.0  ;;  %v9364_v32 = vrot.slane %v9350_v62, %v12260_v5 }
 0x246   : > { %v6211_v20 = vpop.f32.mrf.mxu0 }
 0x247   : > { %v6804_v9 = vcombine.high %v6314_v19, %v6314_v19  ;;  %v6811_v49 = vrot.slane %v6314_v19, %v12260_v5  ;;  %v6212_v23 = vadd.f32 %v14366_v30, %v6211_v20  ;;  %v14744_v20 = vcombine.low %v6606_v53, %v14593_v18 }
 0x248   : > { %v11963_v8 = vpop.f32.mrf.mxu0  ;;  %v9365_v62 = vcombine.low %v9357_v35, %v9364_v32  ;;  %v14774_v53 = vcombine.low %v14516_v0, %v6654_v47  ;;  %v6702_v47 = vcombine.high %v14563_v6, %v14563_v6 }
 0x249   : > { %v6818_v21 = vrot.slane %v6804_v9, %v12260_v5  ;;  %v6819_v1 = vcombine.high %v6811_v49, %v6811_v49  ;;  %v14741_v42 = vrot.slane %v6811_v49, %v12260_v5  ;;  %v6315_v19 = vmax.f32 %v6212_v23, 0.0  ;;  %17684 = vst [vmem:[#allocation55_spill] sm:$0xff] %v14744_v20 }
 0x24a   : > { %v6653_v8 = vcombine.high %v14505_v24, %v14505_v24  ;;  %v6216_v60 = vpop.f32.mrf.mxu0  ;;  %10188 = vrot.lane.b32.xlu1 %v9365_v62, %s12166_s11  ;;  %17685 = vst [vmem:[#allocation56_spill] sm:$0xff] %v14774_v53  ;;  %v17691_v53 = vcombine.low %v14658_v15, %v14672_v38 }
 0x24b   : > { %v6820_v27 = vcombine.high %v6818_v21, %v6818_v21  ;;  %v14753_v9 = vrot.slane %v6819_v1, %v12260_v5  ;;  %v6849_v23 = vcombine.high %v14741_v42, %v14741_v42  ;;  %v9367_v49 = vcombine.low %v6803_v50, %v14741_v42 }
 0x24c   : > { %v6853_v41 = vcombine.high %v6315_v19, %v6315_v19  ;;  %v6860_v51 = vrot.slane %v6315_v19, %v12260_v5  ;;  %v14763_v32 = vrot.slane %v6818_v21, %v12260_v5  ;;  %v6217_v62 = vadd.f32 %v14366_v30, %v6216_v60  ;;  %v11966_v59 = vpop.f32.mrf.mxu0 }
 0x24d   : > { %v14766_v35 = vrot.slane %v6820_v27, %v12260_v5  ;;  %v9368_v34 = vcombine.low %v14753_v9, %v6849_v23  ;;  %v14778_v21 = vcombine.low %v14729_v44, %v6653_v8  ;;  %v9219_v27 = vcombine.low %v6655_v13, %v14721_v40 }
 0x24e   : > { %v6868_v19 = vcombine.high %v6860_v51, %v6860_v51  ;;  %v14784_v23 = vrot.slane %v9367_v49, %v12260_v5  ;;  %v6867_v60 = vrot.slane %v6853_v41, %v12260_v5  ;;  %v6221_v8 = vpop.f32.mrf.mxu0  ;;  %v6316_v2 = vmax.f32 %v6217_v62, 0.0 }
 0x24f   : > { %17686 = vst [vmem:[#allocation57_spill] sm:$0xff] %v14778_v21  ;;  %v9369_v1 = vcombine.low %v14763_v32, %v14766_v35  ;;  %v6222_v13 = vadd.f32 %v14366_v30, %v6221_v8  ;;  %v14796_v11 = vrot.slane %v9368_v34, %v12260_v5  ;;  %v14804_v41 = vrot.slane %v6860_v51, %v12260_v5 }
 0x250   : > { %17687 = vst [vmem:[#allocation58_spill] sm:$0xff] %v14784_v23  ;;  %v14792_v59 = vrot.slane %v6868_v19, %v12260_v5  ;;  %v11969_v19 = vpop.f32.mrf.mxu0  ;;  %v9398_v62 = vcombine.low %v14726_v46, %v14784_v23  ;;  %v11841_v34 = vcombine.high %v14763_v32, %v14766_v35  ;;  %v14815_v50 = vcombine.low %v14570_v16, %v6702_v47 }
 0x251   : > { %v9397_v49 = vrot.slane %v9369_v1, %v12260_v5  ;;  %v6317_v26 = vmax.f32 %v6222_v13, 0.0  ;;  %v14812_v1 = vrot.slane %v9219_v27, %v12260_v5  ;;  %v6869_v57 = vcombine.high %v6867_v60, %v6867_v60 }
 0x252   : > { %17689 = vst [vmem:[#allocation60_spill] sm:$0xff] %v14815_v50  ;;  %v6226_v22 = vpop.f32.mrf.mxu0  ;;  %v9416_v51 = vcombine.low %v14804_v41, %v14792_v59  ;;  %v11842_v19 = vcombine.high %v14804_v41, %v14792_v59  ;;  %v6902_v56 = vcombine.high %v6316_v2, %v6316_v2  ;;  %v9406_v47 = vrot.slane %v9398_v62, %v12260_v5 }
 0x253   : > { %v9399_v8 = vcombine.low %v14796_v11, %v9397_v49  ;;  %17688 = vst [vmem:[#allocation59_spill] sm:$0xff] %v14812_v1  ;;  %v6951_v27 = vcombine.high %v6317_v26, %v6317_v26  ;;  %v14834_v44 = vrot.slane %v17691_v53, %v12260_v5  ;;  %v6909_v13 = vrot.slane %v6316_v2, %v12260_v5 }
 0x254   : > { %v11972_v61 = vpop.f32.mrf.mxu0  ;;  %v14838_v39 = vrot.slane %v11841_v34, %v12260_v5  ;;  %v14853_v53 = vrot.slane %v6869_v57, %v12260_v5  ;;  %v14856_v2 = vrot.slane %v9416_v51, %v12260_v5  ;;  %v14859_v34 = vrot.slane %v11842_v19, %v12260_v5 }
 0x255   : > { %v9413_v12 = vrot.slane %v9399_v8, %v12260_v5  ;;  %17692 = vst [vmem:[#allocation62_spill] sm:$0xff] %v14834_v44  ;;  %v17695_v61 = vcombine.low %v14608_v33, %v14623_v29  ;;  %v6916_v31 = vrot.slane %v6902_v56, %v12260_v5  ;;  %v6958_v58 = vrot.slane %v6317_v26, %v12260_v5 }
 0x256   : > { %v14861_v24 = vpop.f32.mrf.mxu0  ;;  %v6965_v3 = vrot.slane %v6951_v27, %v12260_v5  ;;  %v17697_v56 = vcombine.high %v14608_v33, %v14623_v29  ;;  %v17699_v26 = vcombine.low %v14645_v14, %v14661_v45  ;;  %v6851_v27 = vcombine.high %v14753_v9, %v14753_v9 }
 0x257   : > { %v14850_v62 = vrot.slane %v17695_v61, %v12260_v5  ;;  %v9414_v8 = vcombine.low %v9406_v47, %v9413_v12  ;;  %v14868_v61 = vrot.slane %v14627_v52, %v12260_v5  ;;  %v6227_v12 = vadd.f32 %v14366_v30, %v6226_v22 }
 0x258   : > { %v11975_v57 = vpop.f32.mrf.mxu0  ;;  %v14878_v19 = vrot.slane %v17697_v56, %v12260_v5  ;;  %v14884_v52 = vrot.slane %v17699_v26, %v12260_v5  ;;  %v6917_v22 = vcombine.high %v6909_v13, %v6909_v13  ;;  %v10915_v47 = vcombine.low %v9397_v49, %v14838_v39 }
 0x259   : > { %17696 = vst [vmem:[#allocation64_spill] sm:$0xff] %v14850_v62  ;;  %10190 = vrot.lane.b32.xlu0 %v9414_v8, %s12166_s11  ;;  %v6898_v29 = vcombine.high %v14804_v41, %v14804_v41  ;;  %v6901_v33 = vcombine.high %v14853_v53, %v14853_v53  ;;  %v14896_v57 = vrot.slane %v6909_v13, %v12260_v5  ;;  %v6318_v54 = vmax.f32 %v6227_v12, 0.0 }
 0x25a   : > { %17698 = vst [vmem:[#allocation65_spill] sm:$0xff] %v14878_v19  ;;  %17700 = vst [vmem:[#allocation66_spill] sm:$0xff] %v14884_v52  ;;  %v10916_v14 = vcombine.low %v14856_v2, %v14859_v34  ;;  %v14900_v45 = vpop.f32.mrf.mxu0  ;;  %v6918_v56 = vcombine.high %v6916_v31, %v6916_v31  ;;  %v6966_v26 = vcombine.high %v6958_v58, %v6958_v58 }
 0x25b   : > { %v6967_v49 = vcombine.high %v6965_v3, %v6965_v3  ;;  %v6850_v8 = vcombine.high %v14763_v32, %v14763_v32  ;;  %v14905_v51 = vrot.slane %v6867_v60, %v12260_v5  ;;  %v10923_v10 = vrot.slane %v10915_v47, %v12260_v5 }
 0x25c   : > { %v10930_v13 = vrot.slane %v10916_v14, %v12260_v5  ;;  %v11978_v50 = vpop.f32.mrf.mxu0  ;;  %v14910_v63 = vrot.slane %v6916_v31, %v12260_v5  ;;  %v14913_v7 = vrot.slane %v6917_v22, %v12260_v5  ;;  %v14916_v25 = vrot.slane %v6958_v58, %v12260_v5 }
 0x25d   : > { %v6852_v17 = vcombine.high %v14766_v35, %v14766_v35  ;;  %v8144_v12 = vcombine.low %v6851_v27, %v14763_v32  ;;  %v8190_v47 = vcombine.low %v14766_v35, %v6850_v8  ;;  %v8192_v14 = vcombine.low %v14792_v59, %v6898_v29 }
 0x25e   : > { %v10931_v60 = vcombine.low %v10923_v10, %v10930_v13  ;;  %v14923_v50 = vpop.f32.mrf.mxu0  ;;  %v14926_v31 = vrot.slane %v6918_v56, %v12260_v5  ;;  %v14929_v22 = vcombine.low %v6901_v33, %v14896_v57  ;;  %v14932_v58 = vrot.slane %v6966_v26, %v12260_v5 }
 0x25f   : > { %v14935_v4 = vrot.slane %v6967_v49, %v12260_v5  ;;  %v7007_v10 = vrot.slane %v6318_v54, %v12260_v5  ;;  %v14940_v32 = vrot.slane %v8144_v12, %v12260_v5  ;;  %v8191_v35 = vcombine.low %v6852_v17, %v14804_v41 }
 0x260   : > { %11282 = vrot.lane.b32.xlu1 %v10931_v60, %s12170_s25  ;;  %v14944_v27 = vrot.slane %v8190_v47, %v12260_v5  ;;  %v11981_v8 = vpop.f32.mrf.mxu0  ;;  %v6949_v29 = vcombine.high %v14913_v7, %v14913_v7  ;;  %v9465_v56 = vcombine.low %v14896_v57, %v14913_v7  ;;  %v7000_v26 = vcombine.high %v6318_v54, %v6318_v54 }
 0x261   : > { %17701 = vst [vmem:[#allocation67_spill] sm:$0xff] %v14940_v32  ;;  %v14953_v49 = vrot.slane %v6965_v3, %v12260_v5  ;;  %v14958_v41 = vrot.slane %v8191_v35, %v12260_v5  ;;  %v14961_v13 = vrot.slane %v8192_v14, %v12260_v5  ;;  %v6999_v35 = vcombine.high %v14935_v4, %v14935_v4 }
 0x262   : > { %17702 = vst [vmem:[#allocation68_spill] sm:$0xff] %v14944_v27  ;;  %v14963_v60 = vpop.f32.mrf.mxu0  ;;  %v10368_v47 = vcombine.low %v14940_v32, %v14944_v27  ;;  %v7015_v8 = vcombine.high %v7007_v10, %v7007_v10  ;;  %v6232_v17 = vadd.f32 %v14366_v30, %v14861_v24  ;;  %v7014_v33 = vrot.slane %v7000_v26, %v12260_v5 }
 0x263   : > { %17703 = vst [vmem:[#allocation69_spill] sm:$0xff] %v14958_v41  ;;  %17704 = vst [vmem:[#allocation70_spill] sm:$0xff] %v14961_v13  ;;  %v10369_v14 = vcombine.low %v14958_v41, %v14961_v13  ;;  %v14981_v54 = vrot.slane %v7007_v10, %v12260_v5  ;;  %v9418_v3 = vcombine.low %v14905_v51, %v14853_v53 }
 0x264   : > { %v11984_v12 = vpop.f32.mrf.mxu0  ;;  %v6948_v27 = vcombine.high %v14910_v63, %v14910_v63  ;;  %v10376_v32 = vrot.slane %v10368_v47, %v12260_v5  ;;  %v11843_v41 = vcombine.high %v14905_v51, %v14853_v53  ;;  %v9466_v24 = vcombine.low %v6949_v29, %v14910_v63 }
 0x265   : > { %v10383_v28 = vrot.slane %v10369_v14, %v12260_v5  ;;  %v14995_v10 = vrot.slane %v9418_v3, %v12260_v5  ;;  %v9447_v26 = vcombine.low %v14838_v39, %v14856_v2  ;;  %v9481_v36 = vrot.slane %v9465_v56, %v12260_v5 }
 0x266   : > { %v14992_v12 = vpop.f32.mrf.mxu0  ;;  %v9467_v13 = vcombine.low %v14926_v31, %v6948_v27  ;;  %v15002_v47 = vrot.slane %v7015_v8, %v12260_v5  ;;  %v6319_v21 = vmax.f32 %v6232_v17, 0.0  ;;  %v9474_v37 = vrot.slane %v11843_v41, %v12260_v5 }
 0x267   : > { %v10384_v14 = vcombine.low %v10376_v32, %v10383_v28  ;;  %v9448_v20 = vcombine.low %v14859_v34, %v14995_v10  ;;  %v9488_v3 = vrot.slane %v9466_v24, %v12260_v5  ;;  %v6899_v39 = vcombine.high %v14905_v51, %v14905_v51 }
 0x268   : > { %v11987_v29 = vpop.f32.mrf.mxu0  ;;  %v15009_v43 = vrot.slane %v9467_v13, %v12260_v5  ;;  %v7016_v2 = vcombine.high %v7014_v33, %v7014_v33  ;;  %v15014_v27 = vrot.slane %v7014_v33, %v12260_v5  ;;  %v7045_v28 = vcombine.high %v14981_v54, %v14981_v54 }
 0x269   : > { %10735 = vrot.lane.b32.xlu0 %v10384_v14, %s12171_s26  ;;  %v9496_v32 = vcombine.low %v9474_v37, %v9481_v36  ;;  %v9455_v56 = vrot.slane %v9447_v26, %v12260_v5  ;;  %v9462_v17 = vrot.slane %v9448_v20, %v12260_v5  ;;  %v6900_v13 = vcombine.high %v14792_v59, %v14792_v59 }
 0x26a   : > { %v15019_v34 = vpop.f32.mrf.mxu0  ;;  %v9497_v41 = vcombine.low %v9488_v3, %v15009_v43  ;;  %v7047_v8 = vcombine.high %v15002_v47, %v15002_v47  ;;  %v9562_v24 = vcombine.low %v6999_v35, %v14981_v54  ;;  %v7049_v14 = vcombine.high %v6319_v21, %v6319_v21 }
 0x26b   : > { %v9463_v18 = vcombine.low %v9455_v56, %v9462_v17  ;;  %v9504_v26 = vrot.slane %v9496_v32, %v12260_v5  ;;  %v8239_v1 = vcombine.low %v14853_v53, %v6899_v39  ;;  %v15039_v16 = vrot.slane %v7016_v2, %v12260_v5 }
 0x26c   : > { %v11990_v29 = vpop.f32.mrf.mxu0  ;;  %v9511_v20 = vrot.slane %v9497_v41, %v12260_v5  ;;  %v15046_v32 = vcombine.low %v15002_v47, %v7045_v28  ;;  %v11844_v53 = vcombine.high %v14981_v54, %v15002_v47  ;;  %v8193_v56 = vcombine.low %v6900_v13, %v14905_v51 }
 0x26d   : > { %10192 = vrot.lane.b32.xlu1 %v9463_v18, %s12166_s11  ;;  %v15053_v17 = vcombine.low %v7047_v8, %v15014_v27  ;;  %v15056_v2 = vrot.slane %v9562_v24, %v12260_v5  ;;  %v7056_v41 = vrot.slane %v6319_v21, %v12260_v5  ;;  %v7063_v35 = vrot.slane %v7049_v14, %v12260_v5 }
 0x26e   : > { %v15043_v29 = vpop.f32.mrf.mxu0  ;;  %v9512_v39 = vcombine.low %v9504_v26, %v9511_v20  ;;  %v15062_v54 = vrot.slane %v8193_v56, %v12260_v5  ;;  %v15065_v18 = vrot.slane %v8239_v1, %v12260_v5  ;;  %v15069_v51 = vrot.slane %v14929_v22, %v12260_v5 }
 0x26f   : > { %v17708_v47 = vcombine.high %v14896_v57, %v14913_v7  ;;  %v6237_v13 = vadd.f32 %v14366_v30, %v14900_v45  ;;  %v10932_v8 = vcombine.low %v14995_v10, %v9474_v37  ;;  %v10933_v24 = vcombine.low %v9481_v36, %v9488_v3 }
 0x270   : > { %v11993_v28 = vpop.f32.mrf.mxu0  ;;  %10194 = vrot.lane.b32.xlu0 %v9512_v39, %s12166_s11  ;;  %17705 = vst [vmem:[#allocation71_spill] sm:$0xff] %v15062_v54  ;;  %17706 = vst [vmem:[#allocation72_spill] sm:$0xff] %v15065_v18  ;;  %v6950_v1 = vcombine.high %v14926_v31, %v14926_v31  ;;  %v10385_v22 = vcombine.low %v15062_v54, %v15065_v18  ;;  %v6997_v7 = vcombine.high %v14953_v49, %v14953_v49 }
 0x271   : > { %17707 = vst [vmem:[#allocation73_spill] sm:$0xff] %v15069_v51  ;;  %v15075_v21 = vrot.slane %v17708_v47, %v12260_v5  ;;  %v6998_v57 = vcombine.high %v14932_v58, %v14932_v58  ;;  %v7064_v45 = vcombine.high %v7056_v41, %v7056_v41  ;;  %v10940_v36 = vrot.slane %v10932_v8, %v12260_v5 }
 0x272   : > { %v15082_v14 = vpop.f32.mrf.mxu0  ;;  %v10947_v37 = vrot.slane %v10933_v24, %v12260_v5  ;;  %v9513_v10 = vcombine.low %v6950_v1, %v14916_v25  ;;  %v10393_v20 = vrot.slane %v10385_v22, %v12260_v5  ;;  %v17710_v56 = vcombine.high %v14916_v25, %v14916_v25 }
 0x273   : > { %17709 = vst [vmem:[#allocation74_spill] sm:$0xff] %v15075_v21  ;;  %v10386_v26 = vcombine.low %v15069_v51, %v15075_v21  ;;  %v9515_v47 = vcombine.low %v6998_v57, %v14953_v49  ;;  %v15103_v33 = vrot.slane %v7056_v41, %v12260_v5  ;;  %v6320_v8 = vmax.f32 %v6237_v13, 0.0 }
 0x274   : > { %v11996_v3 = vpop.f32.mrf.mxu0  ;;  %v9514_v28 = vcombine.low %v14932_v58, %v17710_v56  ;;  %v10948_v59 = vcombine.low %v10940_v36, %v10947_v37  ;;  %v9516_v24 = vcombine.low %v14935_v4, %v6997_v7  ;;  %v9523_v22 = vrot.slane %v9513_v10, %v12260_v5 }
 0x275   : > { %v10400_v39 = vrot.slane %v10386_v26, %v12260_v5  ;;  %v9537_v54 = vrot.slane %v9515_v47, %v12260_v5  ;;  %v7048_v56 = vcombine.high %v15039_v16, %v15039_v16  ;;  %v7065_v57 = vcombine.high %v7063_v35, %v7063_v35 }
 0x276   : > { %v15106_v1 = vpop.f32.mrf.mxu0  ;;  %v9530_v26 = vrot.slane %v9514_v28, %v12260_v5  ;;  %v15114_v41 = vrot.slane %v7063_v35, %v12260_v5  ;;  %11284 = vrot.lane.b32.xlu0 %v10948_v59, %s12170_s25  ;;  %v15118_v13 = vrot.slane %v9516_v24, %v12260_v5  ;;  %v17711_v37 = vcombine.low %v14910_v63, %v14926_v31 }
 0x277   : > { %v10401_v3 = vcombine.low %v10393_v20, %v10400_v39  ;;  %v17713_v35 = vcombine.high %v14910_v63, %v14926_v31  ;;  %v17715_v59 = vcombine.low %v14916_v25, %v14932_v58  ;;  %v9564_v28 = vcombine.low %v15014_v27, %v15039_v16 }
 0x278   : > { %v11999_v7 = vpop.f32.mrf.mxu0  ;;  %v9545_v36 = vcombine.low %v9523_v22, %v9530_v26  ;;  %v15125_v10 = vrot.slane %v17711_v37, %v12260_v5  ;;  %v11845_v47 = vcombine.high %v15014_v27, %v15039_v16  ;;  %v15144_v24 = vrot.slane %v7064_v45, %v12260_v5 }
 0x279   : > { %10737 = vrot.lane.b32.xlu1 %v10401_v3, %s12171_s26  ;;  %v15131_v20 = vrot.slane %v17713_v35, %v12260_v5  ;;  %v15137_v39 = vrot.slane %v17715_v59, %v12260_v5  ;;  %v7094_v63 = vcombine.high %v15103_v33, %v15103_v33  ;;  %v7098_v31 = vcombine.high %v6320_v8, %v6320_v8 }
 0x27a   : > { %17712 = vst [vmem:[#allocation75_spill] sm:$0xff] %v15125_v10  ;;  %v9546_v3 = vcombine.low %v9537_v54, %v15118_v13  ;;  %v17717_v7 = vcombine.high %v14916_v25, %v14932_v58  ;;  %v15158_v59 = vrot.slane %v11844_v53, %v12260_v5  ;;  %v15161_v45 = vrot.slane %v7065_v57, %v12260_v5 }
 0x27b   : > { %17714 = vst [vmem:[#allocation76_spill] sm:$0xff] %v15131_v20  ;;  %17716 = vst [vmem:[#allocation77_spill] sm:$0xff] %v15137_v39  ;;  %v10402_v35 = vcombine.low %v15125_v10, %v15131_v20  ;;  %v15164_v21 = vcombine.low %v7048_v56, %v15103_v33  ;;  %v7105_v18 = vrot.slane %v6320_v8, %v12260_v5 }
 0x27c   : > { %v15153_v37 = vrot.slane %v17717_v7, %v12260_v5  ;;  %v7095_v51 = vcombine.high %v15114_v41, %v15114_v41  ;;  %v9553_v25 = vrot.slane %v9545_v36, %v12260_v5  ;;  %v9560_v58 = vrot.slane %v9546_v3, %v12260_v5 }
 0x27d   : > { %v7096_v53 = vcombine.high %v15144_v24, %v15144_v24  ;;  %v15176_v57 = vcombine.low %v15144_v24, %v7094_v63  ;;  %v7112_v20 = vrot.slane %v7098_v31, %v12260_v5  ;;  %v10410_v3 = vrot.slane %v10402_v35, %v12260_v5 }
 0x27e   : > { %17718 = vst [vmem:[#allocation78_spill] sm:$0xff] %v15153_v37  ;;  %v10403_v7 = vcombine.low %v15137_v39, %v15153_v37  ;;  %v9561_v36 = vcombine.low %v9553_v25, %v9560_v58  ;;  %v7113_v37 = vcombine.high %v7105_v18, %v7105_v18  ;;  %v6242_v39 = vadd.f32 %v14366_v30, %v14923_v50 }
 0x27f   : > { %v10949_v63 = vcombine.low %v15009_v43, %v9523_v22  ;;  %v10950_v6 = vcombine.low %v9530_v26, %v9537_v54  ;;  %v15190_v23 = vrot.slane %v9564_v28, %v12260_v5  ;;  %v15193_v31 = vrot.slane %v11845_v47, %v12260_v5 }
 0x280   : > { %v10417_v10 = vrot.slane %v10403_v7, %v12260_v5  ;;  %10196 = vrot.lane.b32.xlu1 %v9561_v36, %s12166_s11  ;;  %v9594_v35 = vcombine.low %v15056_v2, %v15158_v59  ;;  %v7121_v58 = vrot.slane %v7105_v18, %v12260_v5  ;;  %v6321_v50 = vmax.f32 %v6242_v39, 0.0 }
 0x281   : > { %v10957_v43 = vrot.slane %v10949_v63, %v12260_v5  ;;  %v10964_v54 = vrot.slane %v10950_v6, %v12260_v5  ;;  %v15203_v22 = vcombine.low %v7096_v53, %v15114_v41  ;;  %v7114_v26 = vcombine.high %v7112_v20, %v7112_v20 }
 0x282   : > { %v10418_v56 = vcombine.low %v10410_v3, %v10417_v10  ;;  %v15197_v25 = vpop.f32.mrf.mxu0  ;;  %v9595_v10 = vcombine.low %v15190_v23, %v15193_v31  ;;  %v6247_v28 = vadd.f32 %v14366_v30, %v14963_v60  ;;  %v7135_v18 = vrot.slane %v7113_v37, %v12260_v5 }
 0x283   : > { %17719 = vst [vmem:[#allocation79_spill] sm:$0xff] %v15197_v25  ;;  %v7147_v39 = vcombine.high %v6321_v50, %v6321_v50  ;;  %v7154_v7 = vrot.slane %v6321_v50, %v12260_v5  ;;  %v10965_v36 = vcombine.low %v10957_v43, %v10964_v54  ;;  %v9602_v6 = vrot.slane %v9594_v35, %v12260_v5 }
 0x284   : > { %10739 = vrot.lane.b32.xlu0 %v10418_v56, %s12171_s26  ;;  %v12002_v47 = vpop.f32.mrf.mxu0  ;;  %v9609_v53 = vrot.slane %v9595_v10, %v12260_v5  ;;  %v17720_v56 = vcombine.low %v14953_v49, %v14935_v4  ;;  %v17722_v30 = vcombine.high %v14953_v49, %v14935_v4  ;;  %v15227_v37 = vcombine.low %v15161_v45, %v7095_v51 }
 0x285   : > { %v15230_v63 = vrot.slane %v7112_v20, %v12260_v5  ;;  %v7143_v35 = vcombine.high %v7121_v58, %v7121_v58  ;;  %11286 = vrot.lane.b32.xlu1 %v10965_v36, %s12170_s25  ;;  %v15235_v50 = vrot.slane %v15053_v17, %v12260_v5  ;;  %v9613_v43 = vcombine.low %v15114_v41, %v15161_v45 }
 0x286   : > { %v15218_v3 = vrot.slane %v17720_v56, %v12260_v5  ;;  %v15224_v60 = vrot.slane %v17722_v30, %v12260_v5  ;;  %v15240_v4 = vrot.slane %v7114_v26, %v12260_v5  ;;  %v9610_v49 = vcombine.low %v9602_v6, %v9609_v53 }
 0x287   : > { %17724 = vst [vmem:[#allocation82_spill] sm:$0xff] %v15235_v50  ;;  %v6322_v54 = vmax.f32 %v6247_v28, 0.0  ;;  %v11847_v51 = vcombine.high %v15114_v41, %v15161_v45  ;;  %v7161_v20 = vrot.slane %v7147_v39, %v12260_v5  ;;  %v7162_v10 = vcombine.high %v7154_v7, %v7154_v7 }
 0x288   : > { %17721 = vst [vmem:[#allocation80_spill] sm:$0xff] %v15218_v3  ;;  %17723 = vst [vmem:[#allocation81_spill] sm:$0xff] %v15224_v60  ;;  %v15247_v47 = vrot.slane %v15046_v32, %v12260_v5  ;;  %v7145_v17 = vcombine.high %v7135_v18, %v7135_v18  ;;  %v8435_v36 = vcombine.low %v7121_v58, %v7135_v18  ;;  %10198 = vrot.lane.b32.xlu0 %v9610_v49, %s12166_s11 }
 0x289   : > { %v11824_v56 = vcombine.high %v7121_v58, %v7135_v18  ;;  %v10419_v26 = vcombine.low %v15218_v3, %v15224_v60  ;;  %v7144_v28 = vcombine.high %v15230_v63, %v15230_v63  ;;  %v9660_v6 = vcombine.low %v7135_v18, %v7143_v35 }
 0x28a   : > { %17725 = vst [vmem:[#allocation83_spill] sm:$0xff] %v15247_v47  ;;  %v15255_v41 = vrot.slane %v7154_v7, %v12260_v5  ;;  %v10420_v45 = vcombine.low %v15247_v47, %v15235_v50  ;;  %v7146_v58 = vcombine.high %v15240_v4, %v15240_v4  ;;  %v7196_v39 = vcombine.high %v6322_v54, %v6322_v54 }
 0x28b   : > { %v15264_v53 = vrot.slane %v6322_v54, %v12260_v5  ;;  %v7163_v18 = vcombine.high %v7161_v20, %v7161_v20  ;;  %v15269_v7 = vrot.slane %v7161_v20, %v12260_v5  ;;  %v15272_v35 = vrot.slane %v7162_v10, %v12260_v5 }
 0x28c   : > { %v15275_v49 = vrot.slane %v8435_v36, %v12260_v5  ;;  %v15278_v32 = vrot.slane %v11824_v56, %v12260_v5  ;;  %v9661_v8 = vcombine.low %v7145_v17, %v15230_v63  ;;  %v10427_v54 = vrot.slane %v10419_v26, %v12260_v5 }
 0x28d   : > { %v7192_v30 = vcombine.high %v15255_v41, %v15255_v41  ;;  %v10434_v3 = vrot.slane %v10420_v45, %v12260_v5  ;;  %v10966_v20 = vcombine.low %v15118_v13, %v15056_v2  ;;  %v10967_v10 = vcombine.low %v15158_v59, %v15190_v23 }
 0x28e   : > { %17726 = vst [vmem:[#allocation84_spill] sm:$0xff] %v15275_v49  ;;  %17727 = vst [vmem:[#allocation85_spill] sm:$0xff] %v15278_v32  ;;  %v15290_v36 = vcombine.low %v7146_v58, %v15255_v41  ;;  %v7210_v56 = vrot.slane %v7196_v39, %v12260_v5  ;;  %v7211_v17 = vcombine.high %v15264_v53, %v15264_v53 }
 0x28f   : > { %v15297_v26 = vrot.slane %v15264_v53, %v12260_v5  ;;  %v15302_v45 = vrot.slane %v7163_v18, %v12260_v5  ;;  %v7193_v23 = vcombine.high %v15269_v7, %v15269_v7  ;;  %v7194_v2 = vcombine.high %v15272_v35, %v15272_v35 }
 0x290   : > { %v10435_v13 = vcombine.low %v10427_v54, %v10434_v3  ;;  %v10974_v59 = vrot.slane %v10966_v20, %v12260_v5  ;;  %v10981_v58 = vrot.slane %v10967_v10, %v12260_v5  ;;  %v17729_v39 = vcombine.low %v15103_v33, %v15144_v24 }
 0x291   : > { %v15299_v60 = vpop.f32.mrf.mxu0  ;;  %v17730_v18 = vcombine.high %v15103_v33, %v15144_v24  ;;  %v9642_v3 = vrot.slane %v11847_v51, %v12260_v5  ;;  %v17731_v54 = vcombine.high %v15014_v27, %v15014_v27  ;;  %v15327_v10 = vrot.slane %v15164_v21, %v12260_v5  ;;  %v15345_v21 = vld [vmem:[%s17335_s3] ss:$0 sm:$0xff] }
 0x292   : > { %17728 = vst [vmem:[#allocation86_spill] sm:$0xff] %v15299_v60  ;;  %v9621_v53 = vrot.slane %v17729_v39, %v12260_v5  ;;  %10741 = vrot.lane.b32.xlu1 %v10435_v13, %s12171_s26  ;;  %v9635_v60 = vrot.slane %v9613_v43, %v12260_v5  ;;  %v10982_v39 = vcombine.low %v10974_v59, %v10981_v58 }
 0x293   : > { %v9628_v47 = vrot.slane %v17730_v18, %v12260_v5  ;;  %v12005_v50 = vpop.f32.mrf.mxu0  ;;  %v8340_v20 = vcombine.low %v15039_v16, %v17731_v54  ;;  %17732 = vst [vmem:[#allocation87_spill] sm:$0xff] %v15327_v10  ;;  %v15331_v33 = vrot.slane %v15176_v57, %v12260_v5  ;;  %v15335_v24 = vrot.slane %v15203_v22, %v12260_v5 }
 0x294   : > { %v9644_v27 = vcombine.low %v9635_v60, %v9642_v3  ;;  %v6252_v57 = vadd.f32 %v15345_v21, %v14992_v12  ;;  %11288 = vrot.lane.b32.xlu0 %v10982_v39, %s12170_s25  ;;  %v10983_v51 = vcombine.low %v15193_v31, %v9621_v53  ;;  %v9662_v54 = vcombine.low %v15240_v4, %v7144_v28 }
 0x295   : > { %v9643_v25 = vcombine.low %v9621_v53, %v9628_v47  ;;  %17733 = vst [vmem:[#allocation88_spill] sm:$0xff] %v15331_v33  ;;  %17734 = vst [vmem:[#allocation89_spill] sm:$0xff] %v15335_v24  ;;  %v15340_v16 = vrot.slane %v8340_v20, %v12260_v5  ;;  %v10437_v43 = vcombine.low %v15331_v33, %v15335_v24 }
 0x296   : > { %v10984_v13 = vcombine.low %v9628_v47, %v9635_v60  ;;  %v9658_v59 = vrot.slane %v9644_v27, %v12260_v5  ;;  %v6323_v18 = vmax.f32 %v6252_v57, 0.0  ;;  %v7212_v20 = vcombine.high %v7210_v56, %v7210_v56 }
 0x297   : > { %17735 = vst [vmem:[#allocation90_spill] sm:$0xff] %v15340_v16  ;;  %v9651_v22 = vrot.slane %v9643_v25, %v12260_v5  ;;  %v10436_v58 = vcombine.low %v15340_v16, %v15327_v10  ;;  %v10451_v25 = vrot.slane %v10437_v43, %v12260_v5  ;;  %v15362_v39 = vrot.slane %v9660_v6, %v12260_v5 }
 0x298   : > { %v7245_v60 = vcombine.high %v6323_v18, %v6323_v18  ;;  %v10998_v47 = vrot.slane %v10984_v13, %v12260_v5  ;;  %v9709_v53 = vcombine.low %v15272_v35, %v7192_v30  ;;  %v15368_v27 = vrot.slane %v9661_v8, %v12260_v5 }
 0x299   : > { %v9659_v50 = vcombine.low %v9651_v22, %v9658_v59  ;;  %v10444_v31 = vrot.slane %v10436_v58, %v12260_v5  ;;  %v15371_v28 = vrot.slane %v9662_v54, %v12260_v5  ;;  %v11000_v57 = vcombine.low %v9642_v3, %v15362_v39 }
 0x29a   : > { %v15375_v43 = vrot.slane %v7211_v17, %v12260_v5  ;;  %v15379_v22 = vrot.slane %v7245_v60, %v12260_v5  ;;  %v10991_v13 = vrot.slane %v10983_v51, %v12260_v5  ;;  %v15385_v30 = vrot.slane %v7210_v56, %v12260_v5 }
 0x29b   : > { %10200 = vrot.lane.b32.xlu1 %v9659_v50, %s12166_s11  ;;  %v10452_v6 = vcombine.low %v10444_v31, %v10451_v25  ;;  %v11001_v3 = vcombine.low %v15368_v27, %v15371_v28  ;;  %v6257_v17 = vadd.f32 %v15345_v21, %v15019_v34  ;;  %v8486_v50 = vcombine.low %v15269_v7, %v15302_v45 }
 0x29c   : > { %v15394_v59 = vrot.slane %v7212_v20, %v12260_v5  ;;  %v7261_v51 = vcombine.high %v15379_v22, %v15379_v22  ;;  %v10999_v58 = vcombine.low %v10991_v13, %v10998_v47  ;;  %v9710_v56 = vcombine.low %v7194_v2, %v15269_v7 }
 0x29d   : > { %10743 = vrot.lane.b32.xlu0 %v10452_v6, %s12171_s26  ;;  %v11008_v54 = vrot.slane %v11000_v57, %v12260_v5  ;;  %v11015_v25 = vrot.slane %v11001_v3, %v12260_v5  ;;  %v6324_v31 = vmax.f32 %v6257_v17, 0.0  ;;  %v9711_v60 = vcombine.low %v15302_v45, %v7193_v23 }
 0x29e   : > { %v15402_v34 = vpop.f32.mrf.mxu0  ;;  %v9712_v20 = vcombine.low %v15297_v26, %v15375_v43  ;;  %v15408_v6 = vrot.slane %v7261_v51, %v12260_v5  ;;  %v17736_v7 = vcombine.low %v15230_v63, %v15240_v4  ;;  %v15420_v23 = vrot.slane %v15227_v37, %v12260_v5 }
 0x29f   : > { %11290 = vrot.lane.b32.xlu1 %v10999_v58, %s12170_s25  ;;  %v11016_v47 = vcombine.low %v11008_v54, %v11015_v25  ;;  %v7294_v57 = vcombine.high %v6324_v31, %v6324_v31  ;;  %v7301_v13 = vrot.slane %v6324_v31, %v12260_v5  ;;  %v11848_v17 = vcombine.high %v15297_v26, %v15375_v43 }
 0x2a0   : > { %v15415_v2 = vrot.slane %v17736_v7, %v12260_v5  ;;  %17738 = vst [vmem:[#allocation92_spill] sm:$0xff] %v15420_v23  ;;  %v12008_v3 = vpop.f32.mrf.mxu0  ;;  %v9759_v51 = vcombine.low %v15385_v30, %v15394_v59  ;;  %v15427_v58 = vrot.slane %v6323_v18, %v12260_v5  ;;  %v7293_v54 = vcombine.high %v15408_v6, %v15408_v6 }
 0x2a1   : > { %11292 = vrot.lane.b32.xlu0 %v11016_v47, %s12170_s25  ;;  %v7308_v25 = vrot.slane %v7294_v57, %v12260_v5  ;;  %v7309_v31 = vcombine.high %v7301_v13, %v7301_v13  ;;  %v15434_v37 = vrot.slane %v7301_v13, %v12260_v5  ;;  %v10453_v7 = vcombine.low %v15420_v23, %v15275_v49 }
 0x2a2   : > { %17737 = vst [vmem:[#allocation91_spill] sm:$0xff] %v15415_v2  ;;  %v11849_v3 = vcombine.high %v15385_v30, %v15394_v59  ;;  %v10454_v18 = vcombine.low %v15278_v32, %v15415_v2  ;;  %v9691_v8 = vrot.slane %v15290_v36, %v12260_v5  ;;  %v9692_v47 = vcombine.low %v15362_v39, %v15368_v27 }
 0x2a3   : > { %17739 = vst [vmem:[#allocation93_spill] sm:$0xff] %v15434_v37  ;;  %v7310_v57 = vcombine.high %v7308_v25, %v7308_v25  ;;  %v15447_v12 = vrot.slane %v7309_v31, %v12260_v5  ;;  %v7339_v13 = vcombine.high %v15434_v37, %v15434_v37  ;;  %v9719_v16 = vrot.slane %v9709_v53, %v12260_v5 }
 0x2a4   : > { %v15453_v10 = vcombine.low %v7293_v54, %v15434_v37  ;;  %v10461_v33 = vrot.slane %v10453_v7, %v12260_v5  ;;  %v10468_v24 = vrot.slane %v10454_v18, %v12260_v5  ;;  %v9693_v36 = vcombine.low %v15371_v28, %v9691_v8 }
 0x2a5   : > { %17740 = vst [vmem:[#allocation94_spill] sm:$0xff] %v15447_v12  ;;  %v7260_v39 = vcombine.high %v15427_v58, %v15427_v58  ;;  %v15461_v27 = vrot.slane %v7308_v25, %v12260_v5  ;;  %v7341_v31 = vcombine.high %v15447_v12, %v15447_v12  ;;  %v15468_v54 = vrot.slane %v7310_v57, %v12260_v5 }
 0x2a6   : > { %v15473_v28 = vcombine.low %v15447_v12, %v7339_v13  ;;  %v10469_v18 = vcombine.low %v10461_v33, %v10468_v24  ;;  %v15477_v25 = vrot.slane %v15427_v58, %v12260_v5  ;;  %v9700_v49 = vrot.slane %v9692_v47, %v12260_v5 }
 0x2a7   : > { %17741 = vst [vmem:[#allocation95_spill] sm:$0xff] %v15461_v27  ;;  %17742 = vst [vmem:[#allocation96_spill] sm:$0xff] %v15468_v54  ;;  %v15480_v23 = vcombine.low %v7341_v31, %v15461_v27  ;;  %v9707_v53 = vrot.slane %v9693_v36, %v12260_v5  ;;  %v9726_v57 = vrot.slane %v9710_v56, %v12260_v5 }
 0x2a8   : > { %17743 = vst [vmem:[#allocation97_spill] sm:$0xff] %v15473_v28  ;;  %10745 = vrot.lane.b32.xlu1 %v10469_v18, %s12171_s26  ;;  %v9733_v7 = vrot.slane %v9711_v60, %v12260_v5  ;;  %v11017_v13 = vcombine.low %v9691_v8, %v9719_v16  ;;  %v17745_v33 = vcombine.high %v15230_v63, %v15240_v4 }
 0x2a9   : > { %17744 = vst [vmem:[#allocation98_spill] sm:$0xff] %v15480_v23  ;;  %v9708_v58 = vcombine.low %v9700_v49, %v9707_v53  ;;  %v17747_v47 = vcombine.low %v15255_v41, %v15272_v35  ;;  %v17749_v56 = vcombine.high %v15255_v41, %v15272_v35  ;;  %v15506_v8 = vrot.slane %v8486_v50, %v12260_v5 }
 0x2aa   : > { %v15491_v24 = vrot.slane %v17745_v33, %v12260_v5  ;;  %v11018_v63 = vcombine.low %v9726_v57, %v9733_v7  ;;  %v11025_v4 = vrot.slane %v11017_v13, %v12260_v5  ;;  %v6262_v49 = vadd.f32 %v15345_v21, %v15043_v29 }
 0x2ab   : > { %v15497_v31 = vrot.slane %v17747_v47, %v12260_v5  ;;  %v15503_v36 = vrot.slane %v17749_v56, %v12260_v5  ;;  %17751 = vst [vmem:[#allocation102_spill] sm:$0xff] %v15506_v8  ;;  %v15508_v60 = vpop.f32.mrf.mxu0  ;;  %v7342_v53 = vcombine.high %v15468_v54, %v15468_v54  ;;  %10202 = vrot.lane.b32.xlu0 %v9708_v58, %s12166_s11 }
 0x2ac   : > { %17746 = vst [vmem:[#allocation99_spill] sm:$0xff] %v15491_v24  ;;  %v9740_v50 = vrot.slane %v9712_v20, %v12260_v5  ;;  %v9741_v18 = vcombine.low %v9719_v16, %v9726_v57  ;;  %v11032_v13 = vrot.slane %v11018_v63, %v12260_v5  ;;  %v6325_v47 = vmax.f32 %v6262_v49, 0.0 }
 0x2ad   : > { %17748 = vst [vmem:[#allocation100_spill] sm:$0xff] %v15497_v31  ;;  %17750 = vst [vmem:[#allocation101_spill] sm:$0xff] %v15503_v36  ;;  %v10470_v41 = vcombine.low %v15491_v24, %v15497_v31  ;;  %v10471_v35 = vcombine.low %v15503_v36, %v15506_v8  ;;  %v12011_v33 = vpop.f32.mrf.mxu0  ;;  %v15523_v29 = vrot.slane %v11848_v17, %v12260_v5 }
 0x2ae   : > { %v15526_v56 = vrot.slane %v9759_v51, %v12260_v5  ;;  %v9742_v31 = vcombine.low %v9733_v7, %v9740_v50  ;;  %v9749_v8 = vrot.slane %v9741_v18, %v12260_v5  ;;  %v11033_v36 = vcombine.low %v11025_v4, %v11032_v13 }
 0x2af   : > { %17752 = vst [vmem:[#allocation103_spill] sm:$0xff] %v15523_v29  ;;  %v10478_v58 = vrot.slane %v10470_v41, %v12260_v5  ;;  %v10485_v32 = vrot.slane %v10471_v35, %v12260_v5  ;;  %v7343_v20 = vcombine.high %v6325_v47, %v6325_v47  ;;  %v15532_v16 = vrot.slane %v6325_v47, %v12260_v5 }
 0x2b0   : > { %17753 = vst [vmem:[#allocation104_spill] sm:$0xff] %v15526_v56  ;;  %v15535_v57 = vrot.slane %v11849_v3, %v12260_v5  ;;  %v9756_v63 = vrot.slane %v9742_v31, %v12260_v5  ;;  %v11034_v51 = vcombine.low %v9740_v50, %v15523_v29  ;;  %v6267_v49 = vadd.f32 %v15345_v21, %v15082_v14 }
 0x2b1   : > { %v10486_v17 = vcombine.low %v10478_v58, %v10485_v32  ;;  %v7241_v7 = vcombine.high %v15297_v26, %v15297_v26  ;;  %v7243_v4 = vcombine.high %v15375_v43, %v15375_v43  ;;  %11294 = vrot.lane.b32.xlu1 %v11033_v36, %s12170_s25  ;;  %v15547_v41 = vrot.slane %v7343_v20, %v12260_v5 }
 0x2b2   : > { %17754 = vst [vmem:[#allocation105_spill] sm:$0xff] %v15535_v57  ;;  %v11035_v32 = vcombine.low %v15526_v56, %v15535_v57  ;;  %v15552_v3 = vrot.slane %v7260_v39, %v12260_v5  ;;  %v15557_v14 = vrot.slane %v15532_v16, %v12260_v5  ;;  %v9757_v31 = vcombine.low %v9749_v8, %v9756_v63  ;;  %v17808_v56 = vld [vmem:[#allocation49_spill] sm:$0xff]  ;;  %v17809_v57 = vld [vmem:[#allocation52_spill] sm:$0xff] }
 0x2b3   : > { %10747 = vrot.lane.b32.xlu0 %v10486_v17, %s12171_s26  ;;  %v6326_v35 = vmax.f32 %v6267_v49, 0.0  ;;  %v7242_v36 = vcombine.high %v15385_v30, %v15385_v30  ;;  %v17756_v50 = vcombine.high %v15302_v45, %v15302_v45  ;;  %v7290_v39 = vcombine.high %v15477_v25, %v15477_v25 }
 0x2b4   : > { %17755 = vst [vmem:[#allocation106_spill] sm:$0xff] %v15557_v14  ;;  %v7359_v33 = vcombine.high %v15547_v41, %v15547_v41  ;;  %v7244_v13 = vcombine.high %v15394_v59, %v15394_v59  ;;  %v15572_v8 = vcombine.low %v7342_v53, %v15557_v14  ;;  %v11042_v47 = vrot.slane %v11034_v51, %v12260_v5 }
 0x2b5   : > { %v8487_v18 = vcombine.low %v17756_v50, %v15297_v26  ;;  %v11049_v58 = vrot.slane %v11035_v32, %v12260_v5  ;;  %v8533_v20 = vcombine.low %v15375_v43, %v7241_v7  ;;  %v8534_v26 = vcombine.low %v7243_v4, %v15385_v30  ;;  %10204 = vrot.lane.b32.xlu1 %v9757_v31, %s12166_s11 }
 0x2b6   : > { %17757 = vst [vmem:[#allocation107_spill] sm:$0xff] %v15572_v8  ;;  %v15579_v45 = vrot.slane %v7359_v33, %v12260_v5  ;;  %v15583_v17 = vrot.slane %v6326_v35, %v12260_v5  ;;  %v15585_v63 = vpop.f32.mrf.mxu0  ;;  %v7292_v53 = vcombine.high %v15552_v3, %v15552_v3  ;;  %v17759_v43 = vcombine.high %v14658_v15, %v14672_v38  ;;  %v17824_v8 = vld [vmem:[#allocation54_spill] sm:$0xff] }
 0x2b7   : > { %v11050_v51 = vcombine.low %v11042_v47, %v11049_v58  ;;  %v10335_v30 = vcombine.low %v14878_v19, %v14884_v52  ;;  %v8582_v7 = vcombine.low %v15552_v3, %v7290_v39  ;;  %v15601_v32 = vrot.slane %v8487_v18, %v12260_v5  ;;  %v17803_v19 = vld [vmem:[#allocation55_spill] sm:$0xff] }
 0x2b8   : > { %17758 = vst [vmem:[#allocation108_spill] sm:$0xff] %v15579_v45  ;;  %v15593_v49 = vrot.slane %v17759_v43, %v12260_v5  ;;  %v7391_v4 = vcombine.high %v15579_v45, %v15579_v45  ;;  %v17762_v31 = vcombine.low %v14844_v55, %v14834_v44  ;;  %v12014_v38 = vpop.f32.mrf.mxu0  ;;  %v7275_v15 = vrot.slane %v15379_v22, %v12260_v5  ;;  %v17845_v45 = vld [vmem:[#allocation11_spill] sm:$0xff] }
 0x2b9   : > { %17761 = vst [vmem:[#allocation110_spill] sm:$0xff] %v15601_v32  ;;  %v8536_v33 = vcombine.low %v7244_v13, %v15477_v25  ;;  %11296 = vrot.lane.b32.xlu0 %v11050_v51, %s12170_s25  ;;  %v17763_v39 = vcombine.low %v14704_v48, %v14726_v46  ;;  %v17764_v47 = vcombine.low %v14868_v61, %v14850_v62 }
 0x2ba   : > { %17760 = vst [vmem:[#allocation109_spill] sm:$0xff] %v15593_v49  ;;  %v15607_v50 = vrot.slane %v17762_v31, %v12260_v5  ;;  %v15627_v43 = vrot.slane %v15583_v17, %v12260_v5  ;;  %v8535_v22 = vcombine.low %v15394_v59, %v7242_v36  ;;  %v15631_v13 = vrot.slane %v8533_v20, %v12260_v5 }
 0x2bb   : > { %v15617_v18 = vrot.slane %v17763_v39, %v12260_v5  ;;  %v15623_v58 = vrot.slane %v17764_v47, %v12260_v5  ;;  %v15634_v51 = vrot.slane %v8534_v26, %v12260_v5  ;;  %v8583_v48 = vcombine.low %v7292_v53, %v7275_v15 }
 0x2bc   : > { %17765 = vst [vmem:[#allocation111_spill] sm:$0xff] %v15627_v43  ;;  %17766 = vst [vmem:[#allocation112_spill] sm:$0xff] %v15631_v13  ;;  %v11827_v46 = vcombine.high %v7275_v15, %v15408_v6  ;;  %v9761_v31 = vcombine.low %v15477_v25, %v15552_v3  ;;  %v7358_v38 = vcombine.high %v15532_v16, %v15532_v16 }
 0x2bd   : > { %17767 = vst [vmem:[#allocation113_spill] sm:$0xff] %v15634_v51  ;;  %v15642_v39 = vcombine.low %v7391_v4, %v15627_v43  ;;  %v15645_v59 = vrot.slane %v8535_v22, %v12260_v5  ;;  %v10487_v36 = vcombine.low %v15601_v32, %v15631_v13  ;;  %v15650_v20 = vrot.slane %v8582_v7, %v12260_v5  ;;  %v15658_v4 = vpop.f32.mrf.mxu0 }
 0x2be   : > { %v11850_v26 = vcombine.high %v15477_v25, %v15552_v3  ;;  %v9808_v53 = vcombine.low %v7275_v15, %v15408_v6  ;;  %v7392_v47 = vcombine.high %v6326_v35, %v6326_v35  ;;  %v15656_v16 = vrot.slane %v8536_v33, %v12260_v5 }
 0x2bf   : > { %17768 = vst [vmem:[#allocation114_spill] sm:$0xff] %v15642_v39  ;;  %17769 = vst [vmem:[#allocation115_spill] sm:$0xff] %v15645_v59  ;;  %v17772_v22 = vcombine.low %v14741_v42, %v14753_v9  ;;  %v10488_v7 = vcombine.low %v15634_v51, %v15645_v59  ;;  %v15669_v13 = vrot.slane %v10335_v30, %v12260_v5  ;;  %v12017_v30 = vpop.f32.mrf.mxu0  ;;  %v17783_v51 = vld [vmem:[#allocation79_spill] sm:$0xff] }
 0x2c0   : > { %17770 = vst [vmem:[#allocation116_spill] sm:$0xff] %v15650_v20  ;;  %17771 = vst [vmem:[#allocation117_spill] sm:$0xff] %v15656_v16  ;;  %v17774_v6 = vcombine.high %v14721_v40, %v14516_v0  ;;  %v15678_v3 = vrot.slane %v7358_v38, %v12260_v5  ;;  %v15681_v35 = vrot.slane %v8583_v48, %v12260_v5 }
 0x2c1   : > { %v15664_v62 = vrot.slane %v17772_v22, %v12260_v5  ;;  %v15684_v42 = vrot.slane %v11827_v46, %v12260_v5  ;;  %v10504_v9 = vcombine.low %v15656_v16, %v15650_v20  ;;  %v10495_v15 = vrot.slane %v10487_v36, %v12260_v5 }
 0x2c2   : > { %v15675_v25 = vrot.slane %v17774_v6, %v12260_v5  ;;  %17775 = vst [vmem:[#allocation119_spill] sm:$0xff] %v15678_v3  ;;  %17776 = vst [vmem:[#allocation120_spill] sm:$0xff] %v15681_v35  ;;  %v10502_v33 = vrot.slane %v10488_v7, %v12260_v5  ;;  %v6272_v0 = vadd.f32 %v15345_v21, %v15106_v1  ;;  %v17782_v1 = vld [vmem:[#allocation58_spill] sm:$0xff] }
 0x2c3   : > { %17773 = vst [vmem:[#allocation118_spill] sm:$0xff] %v15664_v62  ;;  %17777 = vst [vmem:[#allocation121_spill] sm:$0xff] %v15684_v42  ;;  %v15693_v40 = vrot.slane %v9761_v31, %v12260_v5  ;;  %v7406_v48 = vrot.slane %v7392_v47, %v12260_v5  ;;  %v10505_v46 = vcombine.low %v15681_v35, %v15684_v42 }
 0x2c4   : > { %v15699_v38 = vrot.slane %v11850_v26, %v12260_v5  ;;  %v15702_v22 = vrot.slane %v9808_v53, %v12260_v5  ;;  %v10503_v36 = vcombine.low %v10495_v15, %v10502_v33  ;;  %v6327_v6 = vmax.f32 %v6272_v0, 0.0 }
 0x2c5   : > { %17778 = vst [vmem:[#allocation122_spill] sm:$0xff] %v15693_v40  ;;  %v15706_v7 = vrot.slane %v15453_v10, %v12260_v5  ;;  %v10899_v31 = vcombine.low %v17782_v1, %v14796_v11  ;;  %v10512_v47 = vrot.slane %v10504_v9, %v12260_v5  ;;  %v10519_v30 = vrot.slane %v10505_v46, %v12260_v5 }
 0x2c6   : > { %17779 = vst [vmem:[#allocation123_spill] sm:$0xff] %v15699_v38  ;;  %17780 = vst [vmem:[#allocation124_spill] sm:$0xff] %v15702_v22  ;;  %v11051_v26 = vcombine.low %v15693_v40, %v15699_v38  ;;  %v6277_v53 = vadd.f32 %v15345_v21, %v17783_v51  ;;  %v7407_v15 = vcombine.high %v15583_v17, %v15583_v17  ;;  %10749 = vrot.lane.b32.xlu1 %v10503_v36, %s12171_s26  ;;  %v17810_v40 = vld [vmem:[#allocation50_spill] sm:$0xff] }
 0x2c7   : > { %17781 = vst [vmem:[#allocation125_spill] sm:$0xff] %v15706_v7  ;;  %v7441_v10 = vcombine.high %v6327_v6, %v6327_v6  ;;  %v11052_v33 = vcombine.low %v15702_v22, %v15706_v7  ;;  %v10352_v11 = vcombine.low %v15593_v49, %v15664_v62  ;;  %v10520_v9 = vcombine.low %v10512_v47, %v10519_v30 }
 0x2c8   : > { %v7448_v0 = vrot.slane %v6327_v6, %v12260_v5  ;;  %v10913_v46 = vrot.slane %v10899_v31, %v12260_v5  ;;  %v6328_v1 = vmax.f32 %v6277_v53, 0.0  ;;  %v7390_v51 = vcombine.high %v15678_v3, %v15678_v3  ;;  %v17834_v3 = vld [vmem:[#allocation23_spill] sm:$0xff] }
 0x2c9   : > { %v7408_v59 = vcombine.high %v7406_v48, %v7406_v48  ;;  %v11066_v17 = vrot.slane %v11052_v33, %v12260_v5  ;;  %v10350_v36 = vcombine.low %v15623_v58, %v15669_v13  ;;  %v15732_v16 = vrot.slane %v15547_v41, %v12260_v5  ;;  %10751 = vrot.lane.b32.xlu0 %v10520_v9, %s12171_s26 }
 0x2ca   : > { %v15735_v47 = vrot.slane %v7406_v48, %v12260_v5  ;;  %v11059_v6 = vrot.slane %v11051_v26, %v12260_v5  ;;  %v7490_v31 = vcombine.high %v6328_v1, %v6328_v1  ;;  %v15740_v30 = vrot.slane %v7407_v15, %v12260_v5 }
 0x2cb   : > { %17784 = vst [vmem:[#allocation58_spill] sm:$0xff] %v15732_v16  ;;  %v7437_v53 = vcombine.high %v15627_v43, %v15627_v43  ;;  %v7455_v58 = vrot.slane %v7441_v10, %v12260_v5  ;;  %v10366_v13 = vrot.slane %v10352_v11, %v12260_v5  ;;  %v7456_v41 = vcombine.high %v7448_v0, %v7448_v0 }
 0x2cc   : > { %17785 = vst [vmem:[#allocation79_spill] sm:$0xff] %v15735_v47  ;;  %17786 = vst [vmem:[#allocation126_spill] sm:$0xff] %v15740_v30  ;;  %v15747_v33 = vrot.slane %v7448_v0, %v12260_v5  ;;  %v11067_v48 = vcombine.low %v11059_v6, %v11066_v17  ;;  %v10914_v9 = vcombine.low %v15617_v18, %v10913_v46  ;;  %v17797_v6 = vld [vmem:[#allocation59_spill] sm:$0xff] }
 0x2cd   : > { %v15753_v15 = vcombine.low %v7390_v51, %v15732_v16  ;;  %v15758_v10 = vrot.slane %v7408_v59, %v12260_v5  ;;  %v7504_v18 = vrot.slane %v7490_v31, %v12260_v5  ;;  %v15768_v46 = vcombine.low %v15740_v30, %v7437_v53 }
 0x2ce   : > { %17787 = vst [vmem:[#allocation127_spill] sm:$0xff] %v15747_v33  ;;  %11298 = vrot.lane.b32.xlu1 %v11067_v48, %s12170_s25  ;;  %11280 = vrot.lane.b32.xlu0 %v10914_v9, %s12170_s25  ;;  %v7457_v51 = vcombine.high %v7455_v58, %v7455_v58  ;;  %v15771_v17 = vrot.slane %v7455_v58, %v12260_v5  ;;  %v17793_v58 = vld [vmem:[#allocation41_spill] sm:$0xff]  ;;  %v17794_v9 = vld [vmem:[#allocation40_spill] sm:$0xff] }
 0x2cf   : > { %17788 = vst [vmem:[#allocation128_spill] sm:$0xff] %v15753_v15  ;;  %17789 = vst [vmem:[#allocation129_spill] sm:$0xff] %v15758_v10  ;;  %v15774_v59 = vrot.slane %v6328_v1, %v12260_v5  ;;  %v15779_v11 = vrot.slane %v7456_v41, %v12260_v5  ;;  %v7486_v48 = vcombine.high %v15747_v33, %v15747_v33 }
 0x2d0   : > { %17790 = vst [vmem:[#allocation130_spill] sm:$0xff] %v15768_v46  ;;  %17791 = vst [vmem:[#allocation131_spill] sm:$0xff] %v15771_v17  ;;  %v10367_v31 = vcombine.low %v15607_v50, %v10366_v13  ;;  %v17795_v26 = vcombine.low %v17793_v58, %v17794_v9  ;;  %v17796_v0 = vcombine.high %v17793_v58, %v17794_v9  ;;  %v17833_v46 = vld [vmem:[#allocation17_spill] sm:$0xff] }
 0x2d1   : > { %17792 = vst [vmem:[#allocation132_spill] sm:$0xff] %v15779_v11  ;;  %v9251_v20 = vcombine.low %v17797_v6, %v15675_v25  ;;  %v15806_v35 = vrot.slane %v7457_v51, %v12260_v5  ;;  %v7505_v58 = vcombine.high %v15774_v59, %v15774_v59  ;;  %v15815_v13 = vcombine.low %v15779_v11, %v7486_v48  ;;  %v17802_v51 = vld [vmem:[#allocation26_spill] sm:$0xff]  ;;  %v17805_v48 = vld [vmem:[#allocation57_spill] sm:$0xff] }
 0x2d2   : > { %v15790_v1 = vrot.slane %v17795_v26, %v12260_v5  ;;  %v9250_v41 = vrot.slane %v17796_v0, %v12260_v5  ;;  %10733 = vrot.lane.b32.xlu1 %v10367_v31, %s12171_s26  ;;  %v7506_v26 = vcombine.high %v7504_v18, %v7504_v18  ;;  %v7487_v0 = vcombine.high %v15771_v17, %v15771_v17  ;;  %v17800_v31 = vld [vmem:[#allocation42_spill] sm:$0xff] }
 0x2d3   : > { %17798 = vst [vmem:[#allocation41_spill] sm:$0xff] %v15806_v35  ;;  %10731 = vrot.lane.b32.xlu0 %v10350_v36, %s12171_s26  ;;  %17799 = vst [vmem:[#allocation40_spill] sm:$0xff] %v15815_v13  ;;  %v9259_v53 = vrot.slane %v9251_v20, %v12260_v5  ;;  %v17801_v50 = vcombine.high %v17800_v31, %v17800_v31  ;;  %v15824_v52 = vrot.slane %v17803_v19, %v12260_v5  ;;  %v17804_v36 = vld [vmem:[#allocation36_spill] sm:$0xff]  ;;  %v17806_v20 = vld [vmem:[#allocation86_spill] sm:$0xff] }
 0x2d4   : > { %v9252_v9 = vcombine.low %v15790_v1, %v9250_v41  ;;  %v15829_v32 = vrot.slane %v17804_v36, %v12260_v5  ;;  %v15833_v2 = vrot.slane %v17805_v48, %v12260_v5  ;;  %v6282_v24 = vadd.f32 %v15345_v21, %v17806_v20  ;;  %v17807_v19 = vld [vmem:[#allocation51_spill] sm:$0xff]  ;;  %v17849_v17 = vld [vmem:[#allocation14_spill] sm:$0xff] }
 0x2d5   : > { %v9171_v42 = vcombine.low %v17802_v51, %v17801_v50  ;;  %v15838_v29 = vrot.slane %v7506_v26, %v12260_v5  ;;  %v10882_v36 = vcombine.low %v17810_v40, %v17809_v57  ;;  %v15849_v12 = vrot.slane %v15774_v59, %v12260_v5  ;;  %v17814_v59 = vld [vmem:[#allocation46_spill] sm:$0xff] }
 0x2d6   : > { %v9266_v55 = vrot.slane %v9252_v9, %v12260_v5  ;;  %v10881_v9 = vcombine.low %v17808_v56, %v17807_v19  ;;  %v9203_v20 = vcombine.low %v15829_v32, %v15833_v2  ;;  %v6329_v37 = vmax.f32 %v6282_v24, 0.0  ;;  %v17812_v56 = vld [vmem:[#allocation48_spill] sm:$0xff]  ;;  %v17813_v19 = vld [vmem:[#allocation47_spill] sm:$0xff] }
 0x2d7   : > { %v15841_v50 = vrot.slane %v9171_v42, %v12260_v5  ;;  %17811 = vst [vmem:[#allocation59_spill] sm:$0xff] %v15849_v12  ;;  %v10896_v39 = vrot.slane %v10882_v36, %v12260_v5  ;;  %v10865_v7 = vcombine.low %v17813_v19, %v17812_v56  ;;  %v10864_v24 = vcombine.low %v9250_v41, %v17814_v59  ;;  %v17819_v59 = vld [vmem:[#allocation34_spill] sm:$0xff] }
 0x2d8   : > { %v9267_v48 = vcombine.low %v9259_v53, %v9266_v55  ;;  %v10889_v42 = vrot.slane %v10881_v9, %v12260_v5  ;;  %v9217_v57 = vrot.slane %v9203_v20, %v12260_v5  ;;  %v7539_v40 = vcombine.high %v6329_v37, %v6329_v37  ;;  %v17815_v20 = vld [vmem:[#allocation60_spill] sm:$0xff] }
 0x2d9   : > { %v9202_v26 = vcombine.low %v15824_v52, %v15841_v50  ;;  %v15862_v55 = vrot.slane %v6329_v37, %v12260_v5  ;;  %v7489_v53 = vcombine.high %v15806_v35, %v15806_v35  ;;  %v7538_v36 = vcombine.high %v15838_v29, %v15838_v29  ;;  %v17817_v37 = vld [vmem:[#allocation43_spill] sm:$0xff] }
 0x2da   : > { %10184 = vrot.lane.b32.xlu1 %v9267_v48, %s12166_s11  ;;  %v10897_v38 = vcombine.low %v10889_v42, %v10896_v39  ;;  %v7553_v56 = vrot.slane %v7539_v40, %v12260_v5  ;;  %v10879_v48 = vrot.slane %v10865_v7, %v12260_v5  ;;  %v15874_v19 = vrot.slane %v17815_v20, %v12260_v5  ;;  %v17820_v39 = vld [vmem:[#allocation44_spill] sm:$0xff]  ;;  %v17821_v7 = vld [vmem:[#allocation61_spill] sm:$0xff] }
 0x2db   : > { %v9210_v9 = vrot.slane %v9202_v26, %v12260_v5  ;;  %v17818_v41 = vcombine.high %v17817_v37, %v17817_v37  ;;  %v15882_v26 = vrot.slane %v15862_v55, %v12260_v5  ;;  %v15886_v42 = vrot.slane %v17820_v39, %v12260_v5 }
 0x2dc   : > { %17816 = vst [vmem:[#allocation42_spill] sm:$0xff] %v15874_v19  ;;  %v15890_v40 = vrot.slane %v17821_v7, %v12260_v5  ;;  %v15895_v37 = vrot.slane %v7504_v18, %v12260_v5  ;;  %v6287_v18 = vadd.f32 %v15345_v21, %v15402_v34  ;;  %v7554_v7 = vcombine.high %v15862_v55, %v15862_v55 }
 0x2dd   : > { %v8044_v22 = vcombine.low %v17819_v59, %v17818_v41  ;;  %v9218_v28 = vcombine.low %v9210_v9, %v9217_v57  ;;  %v7555_v41 = vcombine.high %v7553_v56, %v7553_v56  ;;  %v10872_v57 = vrot.slane %v10864_v24, %v12260_v5 }
 0x2de   : > { %11278 = vrot.lane.b32.xlu1 %v10897_v38, %s12170_s25  ;;  %v15901_v9 = vcombine.low %v7538_v36, %v15882_v26  ;;  %v10317_v39 = vcombine.low %v15874_v19, %v15886_v42  ;;  %v15913_v38 = vcombine.low %v15806_v35, %v7487_v0  ;;  %v7535_v24 = vcombine.high %v15849_v12, %v15849_v12  ;;  %v17850_v35 = vld [vmem:[#allocation45_spill] sm:$0xff] }
 0x2df   : > { %10182 = vrot.lane.b32.xlu0 %v9218_v28, %s12166_s11  ;;  %v15904_v59 = vrot.slane %v8044_v22, %v12260_v5  ;;  %v15916_v28 = vrot.slane %v7505_v58, %v12260_v5  ;;  %v15921_v22 = vcombine.low %v7489_v53, %v15849_v12  ;;  %v15924_v36 = vrot.slane %v7555_v41, %v12260_v5 }
 0x2e0   : > { %v10880_v20 = vcombine.low %v10872_v57, %v10879_v48  ;;  %v10325_v19 = vrot.slane %v10317_v39, %v12260_v5  ;;  %v6330_v41 = vmax.f32 %v6287_v18, 0.0  ;;  %v17823_v57 = vld [vmem:[#allocation27_spill] sm:$0xff]  ;;  %v17831_v18 = vld [vmem:[#allocation37_spill] sm:$0xff]  ;;  %v17835_v14 = vcombine.high %v17833_v46, %v17834_v3 }
 0x2e1   : > { %17822 = vst [vmem:[#allocation26_spill] sm:$0xff] %v15916_v28  ;;  %v10318_v34 = vcombine.low %v15904_v59, %v15890_v40  ;;  %v7537_v58 = vcombine.high %v15916_v28, %v15916_v28  ;;  %v7587_v48 = vcombine.high %v15924_v36, %v15924_v36  ;;  %v17825_v0 = vcombine.low %v17823_v57, %v17824_v8 }
 0x2e2   : > { %v17827_v55 = vcombine.high %v17823_v57, %v17824_v8  ;;  %v7588_v13 = vcombine.high %v6330_v41, %v6330_v41  ;;  %v15966_v8 = vrot.slane %v6330_v41, %v12260_v5  ;;  %v17836_v57 = vld [vmem:[#allocation31_spill] sm:$0xff]  ;;  %v16017_v43 = vcombine.low %v15916_v28, %v7535_v24 }
 0x2e3   : > { %11276 = vrot.lane.b32.xlu0 %v10880_v20, %s12170_s25  ;;  %v10332_v53 = vrot.slane %v10318_v34, %v12260_v5  ;;  %v15943_v23 = vrot.slane %v17825_v0, %v12260_v5  ;;  %v17829_v20 = vld [vmem:[#allocation56_spill] sm:$0xff]  ;;  %v15957_v34 = vrot.slane %v17831_v18, %v12260_v5  ;;  %v15963_v0 = vrot.slane %v17835_v14, %v12260_v5 }
 0x2e4   : > { %v15949_v54 = vrot.slane %v17827_v55, %v12260_v5  ;;  %v15953_v39 = vrot.slane %v17829_v20, %v12260_v5  ;;  %v17837_v55 = vld [vmem:[#allocation22_spill] sm:$0xff]  ;;  %v17839_v14 = vld [vmem:[#allocation28_spill] sm:$0xff] }
 0x2e5   : > { %17826 = vst [vmem:[#allocation55_spill] sm:$0xff] %v15943_v23  ;;  %17832 = vst [vmem:[#allocation86_spill] sm:$0xff] %v15957_v34  ;;  %v10333_v27 = vcombine.low %v10325_v19, %v10332_v53  ;;  %v17838_v20 = vcombine.low %v17836_v57, %v17837_v55  ;;  %v15980_v10 = vrot.slane %v17839_v14, %v12260_v5  ;;  %v17840_v19 = vld [vmem:[#allocation53_spill] sm:$0xff] }
 0x2e6   : > { %17828 = vst [vmem:[#allocation36_spill] sm:$0xff] %v15949_v54  ;;  %17830 = vst [vmem:[#allocation57_spill] sm:$0xff] %v15953_v39  ;;  %v10300_v18 = vcombine.low %v15943_v23, %v15949_v54  ;;  %v10301_v33 = vcombine.low %v15953_v39, %v15957_v34  ;;  %v9152_v53 = vrot.slane %v17840_v19, %v12260_v5 }
 0x2e7   : > { %v15972_v11 = vrot.slane %v17838_v20, %v12260_v5  ;;  %10729 = vrot.lane.b32.xlu1 %v10333_v27, %s12171_s26  ;;  %v15990_v23 = vrot.slane %v7588_v13, %v12260_v5  ;;  %v15996_v14 = vrot.slane %v15966_v8, %v12260_v5  ;;  %v16004_v27 = vrot.slane %v7553_v56, %v12260_v5 }
 0x2e8   : > { %v10308_v19 = vrot.slane %v10300_v18, %v12260_v5  ;;  %v10315_v39 = vrot.slane %v10301_v33, %v12260_v5  ;;  %v9154_v41 = vcombine.low %v15980_v10, %v9152_v53  ;;  %v16007_v13 = vrot.slane %v7554_v7, %v12260_v5 }
 0x2e9   : > { %v9153_v54 = vcombine.low %v15963_v0, %v15972_v11  ;;  %v7604_v34 = vcombine.high %v15990_v23, %v15990_v23  ;;  %v16012_v47 = vcombine.low %v7587_v48, %v15996_v14  ;;  %v16020_v56 = vcombine.low %v7537_v58, %v15895_v37  ;;  %v17844_v58 = vld [vmem:[#allocation24_spill] sm:$0xff] }
 0x2ea   : > { %v10316_v18 = vcombine.low %v10308_v19, %v10315_v39  ;;  %v9168_v30 = vrot.slane %v9154_v41, %v12260_v5  ;;  %v7584_v7 = vcombine.high %v15882_v26, %v15882_v26  ;;  %v17841_v39 = vld [vmem:[#allocation12_spill] sm:$0xff]  ;;  %v17842_v41 = vld [vmem:[#allocation15_spill] sm:$0xff]  ;;  %v17846_v16 = vcombine.low %v17844_v58, %v17845_v45 }
 0x2eb   : > { %v9161_v33 = vrot.slane %v9153_v54, %v12260_v5  ;;  %v16027_v48 = vrot.slane %v7604_v34, %v12260_v5  ;;  %v17843_v24 = vcombine.high %v17841_v39, %v17842_v41  ;;  %v7586_v20 = vcombine.high %v16007_v13, %v16007_v13 }
 0x2ec   : > { %10727 = vrot.lane.b32.xlu0 %v10316_v18, %s12171_s26  ;;  %v16040_v15 = vrot.slane %v17846_v16, %v12260_v5  ;;  %v7603_v34 = vcombine.high %v15966_v8, %v15966_v8  ;;  %v6292_v8 = vadd.f32 %v15345_v21, %v15508_v60 }
 0x2ed   : > { %v9169_v54 = vcombine.low %v9161_v33, %v9168_v30  ;;  %v16034_v19 = vrot.slane %v17843_v24, %v12260_v5  ;;  %v17847_v30 = vcombine.high %v17844_v58, %v17845_v45  ;;  %v17848_v33 = vcombine.low %v17833_v46, %v17834_v3 }
 0x2ee   : > { %v7636_v44 = vcombine.high %v16027_v48, %v16027_v48  ;;  %v10848_v3 = vcombine.low %v15675_v25, %v15790_v1  ;;  %v10830_v46 = vcombine.low %v9152_v53, %v15824_v52  ;;  %v6331_v60 = vmax.f32 %v6292_v8, 0.0 }
 0x2ef   : > { %v16050_v18 = vrot.slane %v17847_v30, %v12260_v5  ;;  %v16056_v24 = vrot.slane %v17848_v33, %v12260_v5  ;;  %10180 = vrot.lane.b32.xlu1 %v9169_v54, %s12166_s11  ;;  %v9104_v16 = vcombine.low %v16034_v19, %v16040_v15  ;;  %v10847_v30 = vcombine.low %v15833_v2, %v17797_v6 }
 0x2f0   : > { %v10831_v54 = vcombine.low %v15841_v50, %v15829_v32  ;;  %v17851_v2 = vcombine.low %v17849_v17, %v17850_v35  ;;  %v10862_v25 = vrot.slane %v10848_v3, %v12260_v5  ;;  %v10838_v52 = vrot.slane %v10830_v46, %v12260_v5 }
 0x2f1   : > { %v9105_v49 = vcombine.low %v16050_v18, %v16056_v24  ;;  %v9112_v33 = vrot.slane %v9104_v16, %v12260_v5  ;;  %v10855_v62 = vrot.slane %v10847_v30, %v12260_v5  ;;  %v7637_v32 = vcombine.high %v6331_v60, %v6331_v60 }
 0x2f2   : > { %v16080_v6 = vrot.slane %v17851_v2, %v12260_v5  ;;  %v10845_v1 = vrot.slane %v10831_v54, %v12260_v5  ;;  %v7644_v50 = vrot.slane %v6331_v60, %v12260_v5  ;;  %v17853_v53 = vcombine.high %v17849_v17, %v17850_v35 }
 0x2f3   : > { %v9119_v28 = vrot.slane %v9105_v49, %v12260_v5  ;;  %v17855_v8 = vcombine.low %v17800_v31, %v17802_v51  ;;  %v10863_v3 = vcombine.low %v10855_v62, %v10862_v25  ;;  %v17857_v54 = vcombine.high %v17800_v31, %v17802_v51  ;;  %v17859_v31 = vld [vmem:[#allocation16_spill] sm:$0xff] }
 0x2f4   : > { %17852 = vst [vmem:[#allocation51_spill] sm:$0xff] %v16080_v6  ;;  %v16091_v16 = vrot.slane %v17853_v53, %v12260_v5  ;;  %v10846_v46 = vcombine.low %v10838_v52, %v10845_v1  ;;  %v16108_v17 = vrot.slane %v7637_v32, %v12260_v5  ;;  %v16111_v2 = vrot.slane %v7644_v50, %v12260_v5 }
 0x2f5   : > { %v16097_v49 = vrot.slane %v17855_v8, %v12260_v5  ;;  %v9120_v30 = vcombine.low %v9112_v33, %v9119_v28  ;;  %v16103_v60 = vrot.slane %v17857_v54, %v12260_v5  ;;  %11274 = vrot.lane.b32.xlu1 %v10863_v3, %s12170_s25  ;;  %v16121_v51 = vrot.slane %v17859_v31, %v12260_v5  ;;  %v17861_v33 = vld [vmem:[#allocation38_spill] sm:$0xff]  ;;  %v17863_v3 = vld [vmem:[#allocation39_spill] sm:$0xff] }
 0x2f6   : > { %17854 = vst [vmem:[#allocation49_spill] sm:$0xff] %v16091_v16  ;;  %v10283_v28 = vcombine.low %v16080_v6, %v16091_v16  ;;  %v16125_v25 = vrot.slane %v17861_v33, %v12260_v5  ;;  %v16128_v52 = vrot.slane %v7603_v34, %v12260_v5  ;;  %v7633_v1 = vcombine.high %v15996_v14, %v15996_v14 }
 0x2f7   : > { %17856 = vst [vmem:[#allocation52_spill] sm:$0xff] %v16097_v49  ;;  %17858 = vst [vmem:[#allocation50_spill] sm:$0xff] %v16103_v60  ;;  %10178 = vrot.lane.b32.xlu0 %v9120_v30, %s12166_s11  ;;  %v10284_v62 = vcombine.low %v16097_v49, %v16103_v60  ;;  %v7653_v32 = vcombine.high %v16108_v17, %v16108_v17  ;;  %v16135_v53 = vcombine.low %v7636_v44, %v16111_v2 }
 0x2f8   : > { %17860 = vst [vmem:[#allocation48_spill] sm:$0xff] %v16121_v51  ;;  %17862 = vst [vmem:[#allocation47_spill] sm:$0xff] %v16125_v25  ;;  %v10291_v8 = vrot.slane %v10283_v28, %v12260_v5  ;;  %v16141_v54 = vrot.slane %v17863_v3, %v12260_v5  ;;  %v17865_v34 = vcombine.high %v17836_v57, %v17837_v55  ;;  %v17868_v3 = vld [vmem:[#allocation25_spill] sm:$0xff] }
 0x2f9   : > { %v10298_v30 = vrot.slane %v10284_v62, %v12260_v5  ;;  %v16150_v33 = vcombine.low %v7586_v20, %v16004_v27  ;;  %v16153_v44 = vcombine.low %v16007_v13, %v7584_v7  ;;  %v16157_v28 = vrot.slane %v15901_v9, %v12260_v5  ;;  %v17867_v9 = vld [vmem:[#allocation30_spill] sm:$0xff] }
 0x2fa   : > { %17864 = vst [vmem:[#allocation46_spill] sm:$0xff] %v16141_v54  ;;  %v16147_v31 = vrot.slane %v17865_v34, %v12260_v5  ;;  %v16161_v62 = vrot.slane %v15990_v23, %v12260_v5  ;;  %v10266_v20 = vcombine.low %v16121_v51, %v16125_v25  ;;  %v7635_v7 = vcombine.high %v16128_v52, %v16128_v52 }
 0x2fb   : > { %11272 = vrot.lane.b32.xlu0 %v10846_v46, %s12170_s25  ;;  %v10299_v55 = vcombine.low %v10291_v8, %v10298_v30  ;;  %v16175_v23 = vcombine.low %v16128_v52, %v7633_v1  ;;  %v7652_v35 = vcombine.high %v7644_v50, %v7644_v50  ;;  %v16180_v57 = vrot.slane %v7653_v32, %v12260_v5  ;;  %v17869_v50 = vld [vmem:[#allocation35_spill] sm:$0xff]  ;;  %v16193_v32 = vpop.permute.xlu0 %10186 }
 0x2fc   : > { %17866 = vst [vmem:[#allocation60_spill] sm:$0xff] %v16147_v31  ;;  %v10267_v34 = vcombine.low %v16141_v54, %v16147_v31  ;;  %v10274_v46 = vrot.slane %v10266_v20, %v12260_v5  ;;  %v6297_v8 = vadd.f32 %v15345_v21, %v15585_v63  ;;  %v9033_v1 = vrot.slane %v17867_v9, %v12260_v5  ;;  %v17872_v63 = vld [vmem:[#allocation19_spill] sm:$0xff]  ;;  %v17874_v31 = vld [vmem:[#allocation21_spill] sm:$0xff]  ;;  %v17875_v9 = vld [vmem:[#allocation18_spill] sm:$0xff] }
 0x2fd   : > { %10725 = vrot.lane.b32.xlu1 %v10299_v55, %s12171_s26  ;;  %v9040_v51 = vrot.slane %v17868_v3, %v12260_v5  ;;  %v9047_v25 = vrot.slane %v17869_v50, %v12260_v5  ;;  %17870 = vst [vmem:[#allocation43_spill] sm:$0xff] %v16193_v32  ;;  %v17871_v55 = vcombine.low %v17841_v39, %v17842_v41  ;;  %v17876_v50 = vld [vmem:[#allocation20_spill] sm:$0xff] }
 0x2fe   : > { %v10281_v30 = vrot.slane %v10267_v34, %v12260_v5  ;;  %v6332_v54 = vmax.f32 %v6297_v8, 0.0  ;;  %v17873_v34 = vcombine.high %v17872_v63, %v17872_v63  ;;  %v8984_v16 = vrot.slane %v17875_v9, %v12260_v5  ;;  %v17877_v8 = vld [vmem:[#allocation32_spill] sm:$0xff] }
 0x2ff   : > { %v9054_v20 = vrot.slane %v17871_v55, %v12260_v5  ;;  %v9055_v49 = vcombine.low %v9033_v1, %v9040_v51  ;;  %v8991_v60 = vrot.slane %v17876_v50, %v12260_v5  ;;  %v9005_v32 = vrot.slane %v17877_v8, %v12260_v5 }
 0x300   : > { %v8976_v6 = vcombine.low %v17874_v31, %v17873_v34  ;;  %v10282_v3 = vcombine.low %v10274_v46, %v10281_v30  ;;  %v16210_v12 = vrot.slane %v7652_v35, %v12260_v5  ;;  %v7685_v39 = vcombine.high %v16180_v57, %v16180_v57  ;;  %v16223_v35 = vpop.permute.xlu1 %10188  ;;  %v16225_v34 = vpop.permute.xlu0 %10190 }
 0x301   : > { %v16215_v41 = vrot.slane %v6332_v54, %v12260_v5  ;;  %v9056_v55 = vcombine.low %v9047_v25, %v9054_v20  ;;  %v9006_v46 = vcombine.low %v8984_v16, %v8991_v60  ;;  %v10813_v30 = vcombine.low %v16056_v24, %v15963_v0  ;;  %17878 = vst [vmem:[#allocation34_spill] sm:$0xff] %v16223_v35 }
 0x302   : > { %10723 = vrot.lane.b32.xlu0 %v10282_v3, %s12171_s26  ;;  %v8998_v51 = vrot.slane %v8976_v6, %v12260_v5  ;;  %v10814_v1 = vcombine.low %v15972_v11, %v15980_v10  ;;  %v7686_v50 = vcombine.high %v6332_v54, %v6332_v54  ;;  %v9063_v25 = vrot.slane %v9055_v49, %v12260_v5 }
 0x303   : > { %v9070_v3 = vrot.slane %v9056_v55, %v12260_v5  ;;  %v16233_v6 = vrot.slane %v16215_v41, %v12260_v5  ;;  %v10821_v24 = vrot.slane %v10813_v30, %v12260_v5  ;;  %v16239_v11 = vrot.slane %v16108_v17, %v12260_v5 }
 0x304   : > { %v9007_v0 = vcombine.low %v8998_v51, %v9005_v32  ;;  %v10828_v10 = vrot.slane %v10814_v1, %v12260_v5  ;;  %v7684_v16 = vcombine.high %v16210_v12, %v16210_v12  ;;  %v11858_v49 = vcombine.high %v16111_v2, %v16210_v12  ;;  %v16250_v51 = vpop.permute.xlu1 %11282 }
 0x305   : > { %v9014_v60 = vrot.slane %v9006_v46, %v12260_v5  ;;  %v16247_v54 = vcombine.low %v7685_v39, %v16233_v6  ;;  %v9071_v32 = vcombine.low %v9063_v25, %v9070_v3  ;;  %17879 = vst [vmem:[#allocation44_spill] sm:$0xff] %v16250_v51  ;;  %v16253_v17 = vcombine.low %v7635_v7, %v16161_v62 }
 0x306   : > { %v9021_v8 = vrot.slane %v9007_v0, %v12260_v5  ;;  %v10829_v55 = vcombine.low %v10821_v24, %v10828_v10  ;;  %v11856_v30 = vcombine.high %v15996_v14, %v16128_v52  ;;  %v16260_v46 = vrot.slane %v7686_v50, %v12260_v5  ;;  %v16270_v0 = vpop.permute.xlu0 %10735 }
 0x307   : > { %v16264_v39 = vrot.slane %v16135_v53, %v12260_v5  ;;  %10176 = vrot.lane.b32.xlu1 %v9071_v32, %s12166_s11  ;;  %v10796_v3 = vcombine.low %v9054_v20, %v16034_v19  ;;  %17881 = vst [vmem:[#allocation27_spill] sm:$0xff] %v16270_v0  ;;  %v16273_v24 = vrot.slane %v11858_v49, %v12260_v5  ;;  %v17882_v19 = vld [vmem:[#allocation13_spill] sm:$0xff] }
 0x308   : > { %v9022_v7 = vcombine.low %v9014_v60, %v9021_v8  ;;  %v16276_v50 = vcombine.low %v7684_v16, %v16239_v11  ;;  %v10797_v10 = vcombine.low %v16040_v15, %v16050_v18  ;;  %v6302_v60 = vadd.f32 %v15345_v21, %v15658_v4  ;;  %v17884_v32 = vld [vmem:[#allocation29_spill] sm:$0xff] }
 0x309   : > { %17880 = vst [vmem:[#allocation61_spill] sm:$0xff] %v16264_v39  ;;  %v16287_v20 = vrot.slane %v17882_v19, %v12260_v5  ;;  %v17883_v49 = vcombine.high %v17844_v58, %v17844_v58  ;;  %v16295_v8 = vrot.slane %v17884_v32, %v12260_v5  ;;  %v7702_v15 = vcombine.high %v16260_v46, %v16260_v46  ;;  %v17886_v4 = vld [vmem:[#allocation33_spill] sm:$0xff] }
 0x30a   : > { %10174 = vrot.lane.b32.xlu0 %v9022_v7, %s12166_s11  ;;  %v10804_v18 = vrot.slane %v10796_v3, %v12260_v5  ;;  %v10811_v21 = vrot.slane %v10797_v10, %v12260_v5  ;;  %v16303_v7 = vrot.slane %v17886_v4, %v12260_v5  ;;  %v16313_v19 = vrot.slane %v15913_v38, %v12260_v5  ;;  %v16319_v10 = vpop.permute.xlu1 %10192 }
 0x30b   : > { %v7849_v16 = vcombine.low %v17845_v45, %v17883_v49  ;;  %17885 = vst [vmem:[#allocation54_spill] sm:$0xff] %v16295_v8  ;;  %11270 = vrot.lane.b32.xlu1 %v10829_v55, %s12170_s25  ;;  %v10249_v45 = vcombine.low %v16287_v20, %v16295_v8  ;;  %v16317_v3 = vrot.slane %v15921_v22, %v12260_v5  ;;  %17889 = vst [vmem:[#allocation17_spill] sm:$0xff] %v16319_v10  ;;  %v16321_v49 = vpop.permute.xlu0 %10194 }
 0x30c   : > { %17887 = vst [vmem:[#allocation56_spill] sm:$0xff] %v16303_v7  ;;  %v10812_v32 = vcombine.low %v10804_v18, %v10811_v21  ;;  %v16325_v55 = vrot.slane %v16017_v43, %v12260_v5  ;;  %v17890_v38 = vcombine.high %v15895_v37, %v15895_v37  ;;  %v6333_v22 = vmax.f32 %v6302_v60, 0.0 }
 0x30d   : > { %v16307_v58 = vrot.slane %v7849_v16, %v12260_v5  ;;  %v16329_v16 = vrot.slane %v16020_v56, %v12260_v5  ;;  %v10257_v25 = vrot.slane %v10249_v45, %v12260_v5  ;;  %v10035_v18 = vcombine.low %v16313_v19, %v16317_v3 }
 0x30e   : > { %v10052_v4 = vcombine.low %v15838_v29, %v17890_v38  ;;  %11268 = vrot.lane.b32.xlu0 %v10812_v32, %s12170_s25  ;;  %v16348_v21 = vrot.slane %v16153_v44, %v12260_v5  ;;  %v17891_v60 = vcombine.low %v16004_v27, %v15924_v36  ;;  %v17892_v32 = vcombine.high %v16004_v27, %v15924_v36 }
 0x30f   : > { %17888 = vst [vmem:[#allocation37_spill] sm:$0xff] %v16307_v58  ;;  %v10250_v53 = vcombine.low %v16303_v7, %v16307_v58  ;;  %v10036_v43 = vcombine.low %v16325_v55, %v16329_v16  ;;  %v10043_v1 = vrot.slane %v10035_v18, %v12260_v5  ;;  %v16365_v8 = vrot.slane %v7702_v15, %v12260_v5  ;;  %v16375_v58 = vpop.permute.xlu1 %10737 }
 0x310   : > { %v16344_v56 = vrot.slane %v10052_v4, %v12260_v5  ;;  %v10083_v45 = vrot.slane %v17891_v60, %v12260_v5  ;;  %v10111_v9 = vrot.slane %v17892_v32, %v12260_v5  ;;  %v17893_v4 = vcombine.low %v15996_v14, %v16128_v52  ;;  %v16377_v14 = vpop.permute.xlu0 %11284 }
 0x311   : > { %v10264_v38 = vrot.slane %v10250_v53, %v12260_v5  ;;  %v10050_v7 = vrot.slane %v10036_v43, %v12260_v5  ;;  %v16372_v60 = vrot.slane %v6333_v22, %v12260_v5  ;;  %v10125_v32 = vrot.slane %v11856_v30, %v12260_v5 }
 0x312   : > { %v10118_v44 = vrot.slane %v17893_v4, %v12260_v5  ;;  %v10084_v53 = vcombine.low %v16344_v56, %v16157_v28  ;;  %v10085_v18 = vcombine.low %v16348_v21, %v10083_v45  ;;  %v11153_v31 = vcombine.low %v10083_v45, %v10111_v9 }
 0x313   : > { %v10265_v63 = vcombine.low %v10257_v25, %v10264_v38  ;;  %v10051_v52 = vcombine.low %v10043_v1, %v10050_v7  ;;  %v16383_v4 = vrot.slane %v16150_v33, %v12260_v5  ;;  %v17894_v30 = vcombine.high %v16004_v27, %v16004_v27 }
 0x314   : > { %v10092_v15 = vrot.slane %v10084_v53, %v12260_v5  ;;  %v10099_v43 = vrot.slane %v10085_v18, %v12260_v5  ;;  %v11154_v22 = vcombine.low %v10118_v44, %v10125_v32  ;;  %v11161_v25 = vrot.slane %v11153_v31, %v12260_v5  ;;  %v16412_v18 = vpop.permute.xlu1 %10196 }
 0x315   : > { %10721 = vrot.lane.b32.xlu1 %v10265_v63, %s12171_s26  ;;  %v8876_v45 = vcombine.low %v15924_v36, %v17894_v30  ;;  %v16393_v1 = vrot.slane %v16012_v47, %v12260_v5  ;;  %10216 = vrot.lane.b32.xlu0 %v10051_v52, %s12166_s11  ;;  %v16398_v33 = vrot.slane %v16175_v23, %v12260_v5 }
 0x316   : > { %v10100_v7 = vcombine.low %v10092_v15, %v10099_v43  ;;  %v8075_v63 = vcombine.low %v15886_v42, %v15904_v59  ;;  %v8076_v31 = vcombine.low %v15890_v40, %v14868_v61  ;;  %v11168_v27 = vrot.slane %v11154_v22, %v12260_v5  ;;  %v16428_v15 = vpop.permute.xlu0 %10739 }
 0x317   : > { %17895 = vst [vmem:[#allocation23_spill] sm:$0xff] %v16393_v1  ;;  %17896 = vst [vmem:[#allocation31_spill] sm:$0xff] %v16398_v33  ;;  %v16406_v36 = vrot.slane %v8876_v45, %v12260_v5  ;;  %v17898_v47 = vcombine.low %v16161_v62, %v16027_v48  ;;  %v10133_v53 = vcombine.low %v10111_v9, %v10118_v44 }
 0x318   : > { %v10607_v23 = vcombine.low %v16393_v1, %v16398_v33  ;;  %v16417_v42 = vrot.slane %v8075_v63, %v12260_v5  ;;  %v16420_v61 = vrot.slane %v8076_v31, %v12260_v5  ;;  %v11857_v40 = vcombine.high %v16161_v62, %v16027_v48  ;;  %17901 = vst [vmem:[#allocation12_spill] sm:$0xff] %v16428_v15  ;;  %v17910_v33 = vld [vmem:[#allocation26_spill] sm:$0xff]  ;;  %v17924_v1 = vld [vmem:[#allocation111_spill] sm:$0xff] }
 0x319   : > { %17897 = vst [vmem:[#allocation22_spill] sm:$0xff] %v16406_v36  ;;  %v10132_v38 = vrot.slane %v17898_v47, %v12260_v5  ;;  %10218 = vrot.lane.b32.xlu1 %v10100_v7, %s12166_s11  ;;  %v11169_v59 = vcombine.low %v11161_v25, %v11168_v27  ;;  %v10606_v9 = vcombine.low %v16383_v4, %v16406_v36 }
 0x31a   : > { %17899 = vst [vmem:[#allocation28_spill] sm:$0xff] %v16417_v42  ;;  %17900 = vst [vmem:[#allocation53_spill] sm:$0xff] %v16420_v61  ;;  %v10141_v52 = vrot.slane %v10133_v53, %v12260_v5  ;;  %v10621_v43 = vrot.slane %v10607_v23, %v12260_v5  ;;  %v10158_v30 = vrot.slane %v11857_v40, %v12260_v5 }
 0x31b   : > { %v10134_v44 = vcombine.low %v10125_v32, %v10132_v38  ;;  %v17902_v45 = vcombine.low %v16111_v2, %v16210_v12  ;;  %v10648_v7 = vcombine.low %v16239_v11, %v16180_v57  ;;  %v17903_v32 = vcombine.high %v16215_v41, %v16215_v41  ;;  %11310 = vrot.lane.b32.xlu0 %v11169_v59, %s12170_s25 }
 0x31c   : > { %v10614_v31 = vrot.slane %v10606_v9, %v12260_v5  ;;  %v11859_v47 = vcombine.high %v16239_v11, %v16180_v57  ;;  %v16453_v12 = vrot.slane %v16260_v46, %v12260_v5  ;;  %v17904_v53 = vcombine.high %v16161_v62, %v16161_v62 }
 0x31d   : > { %v10165_v25 = vrot.slane %v17902_v45, %v12260_v5  ;;  %v16444_v63 = vrot.slane %v17903_v32, %v12260_v5  ;;  %v10148_v27 = vrot.slane %v10134_v44, %v12260_v5  ;;  %v7734_v23 = vcombine.high %v16365_v8, %v16365_v8  ;;  %v16463_v44 = vpop.permute.xlu1 %11286 }
 0x31e   : > { %v8925_v41 = vcombine.low %v16027_v48, %v17904_v53  ;;  %v7748_v40 = vrot.slane %v16372_v60, %v12260_v5  ;;  %v10622_v59 = vcombine.low %v10614_v31, %v10621_v43  ;;  %17905 = vst [vmem:[#allocation15_spill] sm:$0xff] %v16463_v44  ;;  %v16467_v46 = vrot.slane %v16253_v17, %v12260_v5  ;;  %v16482_v43 = vpop.permute.xlu0 %10198 }
 0x31f   : > { %v10166_v2 = vcombine.low %v10158_v30, %v10165_v25  ;;  %v10149_v9 = vcombine.low %v10141_v52, %v10148_v27  ;;  %v10632_v48 = vcombine.low %v16264_v39, %v16273_v24  ;;  %v11177_v62 = vrot.slane %v16276_v50, %v12260_v5 }
 0x320   : > { %17906 = vst [vmem:[#allocation24_spill] sm:$0xff] %v16467_v46  ;;  %v16470_v45 = vrot.slane %v8925_v41, %v12260_v5  ;;  %v10650_v60 = vcombine.low %v16233_v6, %v16444_v63  ;;  %10763 = vrot.lane.b32.xlu1 %v10622_v59, %s12171_s26  ;;  %v11178_v52 = vcombine.low %v10132_v38, %v10158_v30 }
 0x321   : > { %10220 = vrot.lane.b32.xlu0 %v10149_v9, %s12166_s11  ;;  %v10697_v17 = vcombine.low %v16453_v12, %v16365_v8  ;;  %v10646_v24 = vrot.slane %v10632_v48, %v12260_v5  ;;  %v11179_v31 = vcombine.low %v10165_v25, %v11177_v62  ;;  %v11861_v50 = vcombine.high %v16453_v12, %v16365_v8 }
 0x322   : > { %17907 = vst [vmem:[#allocation11_spill] sm:$0xff] %v16470_v45  ;;  %v10631_v32 = vcombine.low %v16467_v46, %v16470_v45  ;;  %v11860_v27 = vcombine.high %v16233_v6, %v16444_v63  ;;  %v11245_v53 = vcombine.low %v7734_v23, %v7748_v40  ;;  %v10173_v38 = vrot.slane %v10166_v2, %v12260_v5  ;;  %v16503_v40 = vpop.permute.xlu1 %10741  ;;  %v17925_v45 = vld [vmem:[#allocation126_spill] sm:$0xff] }
 0x323   : > { %v10705_v30 = vrot.slane %v10697_v17, %v12260_v5  ;;  %v11186_v59 = vrot.slane %v11178_v52, %v12260_v5  ;;  %v11193_v9 = vrot.slane %v11179_v31, %v12260_v5  ;;  %v10712_v48 = vrot.slane %v11861_v50, %v12260_v5 }
 0x324   : > { %v10639_v41 = vrot.slane %v10631_v32, %v12260_v5  ;;  %v7732_v25 = vcombine.high %v16453_v12, %v16453_v12  ;;  %10222 = vrot.lane.b32.xlu1 %v10173_v38, %s12166_s11  ;;  %v10658_v62 = vrot.slane %v10648_v7, %v12260_v5  ;;  %v10665_v23 = vrot.slane %v11859_v47, %v12260_v5  ;;  %v17909_v7 = vld [vmem:[#allocation59_spill] sm:$0xff] }
 0x325   : > { %v10672_v2 = vrot.slane %v10650_v60, %v12260_v5  ;;  %v17908_v52 = vcombine.low %v15882_v26, %v16007_v13  ;;  %v11194_v31 = vcombine.low %v11186_v59, %v11193_v9  ;;  %v10713_v50 = vcombine.low %v10705_v30, %v10712_v48  ;;  %v16524_v26 = vpop.permute.xlu0 %11288  ;;  %v17913_v13 = vld [vmem:[#allocation41_spill] sm:$0xff]  ;;  %v17916_v59 = vld [vmem:[#allocation118_spill] sm:$0xff] }
 0x326   : > { %v10647_v32 = vcombine.low %v10639_v41, %v10646_v24  ;;  %v10679_v22 = vrot.slane %v11860_v27, %v12260_v5  ;;  %v10680_v38 = vcombine.low %v10658_v62, %v10665_v23  ;;  %v17911_v47 = vcombine.high %v17909_v7, %v17910_v33  ;;  %v17914_v24 = vld [vmem:[#allocation131_spill] sm:$0xff] }
 0x327   : > { %v16509_v17 = vrot.slane %v17908_v52, %v12260_v5  ;;  %v17912_v60 = vcombine.low %v15895_v37, %v15838_v29  ;;  %v11259_v27 = vrot.slane %v11245_v53, %v12260_v5  ;;  %v17915_v41 = vld [vmem:[#allocation67_spill] sm:$0xff]  ;;  %v17917_v48 = vcombine.high %v15895_v37, %v15838_v29 }
 0x328   : > { %v16516_v46 = vrot.slane %v17911_v47, %v12260_v5  ;;  %10765 = vrot.lane.b32.xlu0 %v10647_v32, %s12171_s26  ;;  %v8174_v9 = vcombine.low %v17916_v59, %v17915_v41  ;;  %11312 = vrot.lane.b32.xlu1 %v11194_v31, %s12170_s25  ;;  %v10681_v23 = vcombine.low %v10672_v2, %v10679_v22  ;;  %v17918_v41 = vld [vmem:[#allocation109_spill] sm:$0xff]  ;;  %v17919_v59 = vld [vmem:[#allocation62_spill] sm:$0xff] }
 0x329   : > { %v16522_v36 = vrot.slane %v17912_v60, %v12260_v5  ;;  %v16536_v62 = vrot.slane %v17917_v48, %v12260_v5  ;;  %v10688_v52 = vrot.slane %v10680_v38, %v12260_v5  ;;  %v11244_v53 = vcombine.low %v16365_v8, %v7732_v25  ;;  %v17920_v8 = vld [vmem:[#allocation128_spill] sm:$0xff] }
 0x32a   : > { %v7731_v32 = vcombine.high %v16233_v6, %v16233_v6  ;;  %v10720_v60 = vrot.slane %v10713_v50, %v12260_v5  ;;  %v8173_v29 = vcombine.low %v17919_v59, %v17918_v41  ;;  %v7733_v22 = vcombine.high %v16444_v63, %v16444_v63  ;;  %v16558_v6 = vpop.permute.xlu1 %10200  ;;  %v17921_v41 = vld [vmem:[#allocation58_spill] sm:$0xff]  ;;  %v17922_v59 = vld [vmem:[#allocation108_spill] sm:$0xff] }
 0x32b   : > { %v10589_v47 = vcombine.low %v16516_v46, %v16522_v36  ;;  %v10590_v37 = vcombine.low %v16536_v62, %v16509_v17  ;;  %v10695_v2 = vrot.slane %v10681_v23, %v12260_v5  ;;  %v11252_v31 = vrot.slane %v11244_v53, %v12260_v5 }
 0x32c   : > { %v16556_v25 = vrot.slane %v17920_v8, %v12260_v5  ;;  %10769 = vrot.lane.b32.xlu0 %v10720_v60, %s12171_s26  ;;  %v8188_v50 = vrot.slane %v8174_v9, %v12260_v5  ;;  %v17923_v23 = vcombine.high %v17921_v41, %v17922_v59  ;;  %v17926_v39 = vcombine.low %v17924_v1, %v17925_v45 }
 0x32d   : > { %v10597_v38 = vrot.slane %v10589_v47, %v12260_v5  ;;  %v10604_v48 = vrot.slane %v10590_v37, %v12260_v5  ;;  %v10696_v53 = vcombine.low %v10688_v52, %v10695_v2  ;;  %v11260_v8 = vcombine.low %v11252_v31, %v11259_v27  ;;  %v16582_v37 = vpop.permute.xlu0 %10743  ;;  %v17929_v31 = vld [vmem:[#allocation129_spill] sm:$0xff] }
 0x32e   : > { %v16568_v30 = vrot.slane %v17923_v23, %v12260_v5  ;;  %v16574_v60 = vrot.slane %v17926_v39, %v12260_v5  ;;  %v17927_v9 = vcombine.high %v17924_v1, %v17925_v45  ;;  %v7683_v23 = vcombine.high %v16239_v11, %v16239_v11  ;;  %v17928_v1 = vld [vmem:[#allocation79_spill] sm:$0xff] }
 0x32f   : > { %v8181_v52 = vrot.slane %v8173_v29, %v12260_v5  ;;  %v10605_v27 = vcombine.low %v10597_v38, %v10604_v48  ;;  %10767 = vrot.lane.b32.xlu1 %v10696_v53, %s12171_s26  ;;  %v17931_v11 = vcombine.high %v17928_v1, %v17929_v31  ;;  %v17932_v38 = vld [vmem:[#allocation127_spill] sm:$0xff]  ;;  %v17933_v48 = vld [vmem:[#allocation132_spill] sm:$0xff]  ;;  %v11197_v42 = vcombine.low %v16444_v63, %v7731_v32  ;;  %v16622_v63 = vpop.permute.xlu1 %11290 }
 0x330   : > { %v16580_v47 = vrot.slane %v17927_v9, %v12260_v5  ;;  %v9937_v2 = vcombine.low %v16556_v25, %v16568_v30  ;;  %v17930_v9 = vcombine.low %v17928_v1, %v17929_v31  ;;  %v17934_v61 = vcombine.low %v17932_v38, %v17933_v48 }
 0x331   : > { %v16602_v29 = vrot.slane %v17931_v11, %v12260_v5  ;;  %v8189_v0 = vcombine.low %v8181_v52, %v8188_v50  ;;  %10761 = vrot.lane.b32.xlu0 %v10605_v27, %s12171_s26  ;;  %v17935_v35 = vcombine.high %v17932_v38, %v17933_v48  ;;  %v11198_v11 = vcombine.low %v7733_v22, %v16453_v12 }
 0x332   : > { %v9938_v39 = vcombine.low %v16574_v60, %v16580_v47  ;;  %v16596_v51 = vrot.slane %v17930_v9, %v12260_v5  ;;  %v16608_v53 = vrot.slane %v17934_v61, %v12260_v5  ;;  %v9945_v9 = vrot.slane %v9937_v2, %v12260_v5  ;;  %v16636_v2 = vpop.permute.xlu0 %11292 }
 0x333   : > { %v9985_v44 = vrot.slane %v17935_v35, %v12260_v5  ;;  %v11267_v15 = vrot.slane %v11260_v8, %v12260_v5  ;;  %v11351_v32 = vsel %vm5938_vm1, %v8189_v0, %v16225_v34  ;;  %v11120_v35 = vcombine.low %v16317_v3, %v16325_v55 }
 0x334   : > { %v9952_v10 = vrot.slane %v9938_v39, %v12260_v5  ;;  %v9986_v61 = vcombine.low %v16596_v51, %v16602_v29  ;;  %v11376_v8 = vsel %vm6007_vm4, %v11351_v32, %v16375_v58  ;;  %v11136_v27 = vcombine.low %v16329_v16, %v16344_v56 }
 0x335   : > { %v9987_v50 = vcombine.low %v16608_v53, %v9985_v44  ;;  %v11119_v52 = vcombine.low %v9985_v44, %v16313_v19  ;;  %11316 = vrot.lane.b32.xlu1 %v11267_v15, %s12170_s25  ;;  %v11134_v19 = vrot.slane %v11120_v35, %v12260_v5  ;;  %v11137_v3 = vcombine.low %v16157_v28, %v16348_v21  ;;  %v17940_v35 = vld [vmem:[#allocation95_spill] sm:$0xff] }
 0x336   : > { %v9953_v12 = vcombine.low %v9945_v9, %v9952_v10  ;;  %v9994_v22 = vrot.slane %v9986_v61, %v12260_v5  ;;  %v11831_v10 = vcombine.high %v17914_v24, %v17913_v13  ;;  %v11144_v58 = vrot.slane %v11136_v27, %v12260_v5  ;;  %v17938_v61 = vld [vmem:[#allocation40_spill] sm:$0xff] }
 0x337   : > { %v10001_v34 = vrot.slane %v9987_v50, %v12260_v5  ;;  %v11127_v0 = vrot.slane %v11119_v52, %v12260_v5  ;;  %v16649_v55 = vsel %vm11393_vm5, %v11376_v8, %v16377_v14  ;;  %v11195_v16 = vcombine.low %v16180_v57, %v7683_v23  ;;  %v16660_v14 = vpop.permute.xlu1 %10745  ;;  %v17941_v8 = vld [vmem:[#allocation106_spill] sm:$0xff] }
 0x338   : > { %10212 = vrot.lane.b32.xlu0 %v9953_v12, %s12166_s11  ;;  %v8780_v56 = vcombine.low %v17909_v7, %v17910_v33  ;;  %v11151_v44 = vrot.slane %v11137_v3, %v12260_v5  ;;  %v11212_v28 = vrot.slane %v16247_v54, %v12260_v5  ;;  %v11219_v48 = vrot.slane %v11197_v42, %v12260_v5 }
 0x339   : > { %v10002_v15 = vcombine.low %v9994_v22, %v10001_v34  ;;  %v11135_v21 = vcombine.low %v11127_v0, %v11134_v19  ;;  %v11205_v39 = vrot.slane %v11195_v16, %v12260_v5  ;;  %v11226_v9 = vrot.slane %v11198_v11, %v12260_v5  ;;  %v17943_v34 = vld [vmem:[#allocation119_spill] sm:$0xff] }
 0x33a   : > { %v17936_v57 = vcombine.high %v17925_v45, %v17925_v45  ;;  %v17937_v7 = vcombine.high %v17929_v31, %v17929_v31  ;;  %v11152_v54 = vcombine.low %v11144_v58, %v11151_v44  ;;  %v16673_v42 = vrot.slane %v17938_v61, %v12260_v5 }
 0x33b   : > { %10214 = vrot.lane.b32.xlu1 %v10002_v15, %s12166_s11  ;;  %v11227_v11 = vcombine.low %v11205_v39, %v11212_v28  ;;  %v11228_v32 = vcombine.low %v11219_v48, %v11226_v9  ;;  %v17939_v45 = vcombine.low %v17914_v24, %v17913_v13  ;;  %v16683_v52 = vrot.slane %v11831_v10, %v12260_v5  ;;  %v17944_v10 = vld [vmem:[#allocation130_spill] sm:$0xff]  ;;  %v16718_v39 = vpop.permute.xlu1 %11294 }
 0x33c   : > { %v8729_v33 = vcombine.low %v17936_v57, %v17928_v1  ;;  %v8731_v23 = vcombine.low %v17937_v7, %v17932_v38  ;;  %11306 = vrot.lane.b32.xlu0 %v11135_v21, %s12170_s25  ;;  %v16685_v38 = vpop.permute.xlu0 %10202  ;;  %v7340_v12 = vcombine.high %v17940_v35, %v17940_v35  ;;  %v16690_v22 = vrot.slane %v8780_v56, %v12260_v5 }
 0x33d   : > { %v16680_v50 = vrot.slane %v17939_v45, %v12260_v5  ;;  %v17942_v27 = vcombine.high %v17941_v8, %v17941_v8  ;;  %v11235_v13 = vrot.slane %v11227_v11, %v12260_v5  ;;  %v11242_v24 = vrot.slane %v11228_v32, %v12260_v5 }
 0x33e   : > { %v10573_v3 = vcombine.low %v16683_v52, %v16690_v22  ;;  %v16705_v58 = vrot.slane %v17944_v10, %v12260_v5  ;;  %v17945_v16 = vcombine.high %v17928_v1, %v17928_v1  ;;  %v16712_v15 = vrot.slane %v8729_v33, %v12260_v5  ;;  %v17947_v33 = vld [vmem:[#allocation98_spill] sm:$0xff]  ;;  %v17950_v10 = vld [vmem:[#allocation124_spill] sm:$0xff] }
 0x33f   : > { %v9859_v0 = vcombine.low %v17943_v34, %v17942_v27  ;;  %v10572_v19 = vcombine.low %v16673_v42, %v16680_v50  ;;  %11308 = vrot.lane.b32.xlu1 %v11152_v54, %s12170_s25  ;;  %v11243_v44 = vcombine.low %v11235_v13, %v11242_v24  ;;  %v16716_v21 = vrot.slane %v8731_v23, %v12260_v5  ;;  %v17948_v23 = vld [vmem:[#allocation107_spill] sm:$0xff] }
 0x340   : > { %v8730_v56 = vcombine.low %v17929_v31, %v17945_v16  ;;  %v10587_v48 = vrot.slane %v10573_v3, %v12260_v5  ;;  %v10555_v1 = vcombine.low %v16705_v58, %v16712_v15  ;;  %v17946_v31 = vld [vmem:[#allocation96_spill] sm:$0xff]  ;;  %v16730_v7 = vrot.slane %v17947_v33, %v12260_v5  ;;  %v16737_v11 = vpop.permute.xlu0 %10747  ;;  %v17951_v16 = vld [vmem:[#allocation123_spill] sm:$0xff] }
 0x341   : > { %v10580_v28 = vrot.slane %v10572_v19, %v12260_v5  ;;  %11314 = vrot.lane.b32.xlu0 %v11243_v44, %s12170_s25  ;;  %v9857_v57 = vcombine.low %v17946_v31, %v7340_v12  ;;  %v16734_v54 = vrot.slane %v17948_v23, %v12260_v5  ;;  %v9887_v61 = vrot.slane %v9859_v0, %v12260_v5  ;;  %v17949_v19 = vld [vmem:[#allocation97_spill] sm:$0xff] }
 0x342   : > { %v16722_v9 = vrot.slane %v8730_v56, %v12260_v5  ;;  %v10563_v27 = vrot.slane %v10555_v1, %v12260_v5  ;;  %v7389_v12 = vcombine.high %v17921_v41, %v17921_v41  ;;  %v9838_v3 = vrot.slane %v17949_v19, %v12260_v5  ;;  %v16758_v1 = vpop.permute.xlu1 %10204 }
 0x343   : > { %v10588_v32 = vcombine.low %v10580_v28, %v10587_v48  ;;  %v16745_v13 = vrot.slane %v9857_v57, %v12260_v5  ;;  %v9889_v24 = vcombine.low %v16734_v54, %v9887_v61  ;;  %v9839_v56 = vcombine.low %v17951_v16, %v17950_v10  ;;  %v17952_v28 = vld [vmem:[#allocation125_spill] sm:$0xff] }
 0x344   : > { %v10556_v45 = vcombine.low %v16722_v9, %v16716_v21  ;;  %v9840_v48 = vcombine.low %v17952_v28, %v9838_v3  ;;  %v8634_v57 = vcombine.low %v17941_v8, %v17943_v34  ;;  %v11102_v23 = vcombine.low %v16580_v47, %v16596_v51  ;;  %v16771_v16 = vpop.permute.xlu0 %11296 }
 0x345   : > { %10759 = vrot.lane.b32.xlu1 %v10588_v32, %s12171_s26  ;;  %v9888_v44 = vcombine.low %v16730_v7, %v16745_v13  ;;  %v9903_v41 = vrot.slane %v9889_v24, %v12260_v5  ;;  %v11103_v32 = vcombine.low %v16602_v29, %v16608_v53  ;;  %v8681_v19 = vcombine.low %v17922_v59, %v7389_v12 }
 0x346   : > { %v10570_v0 = vrot.slane %v10556_v45, %v12260_v5  ;;  %v11830_v45 = vcombine.high %v17941_v8, %v17943_v34  ;;  %v9854_v10 = vrot.slane %v9840_v48, %v12260_v5  ;;  %v11085_v47 = vcombine.low %v9887_v61, %v16556_v25 }
 0x347   : > { %v9896_v24 = vrot.slane %v9888_v44, %v12260_v5  ;;  %v11117_v51 = vrot.slane %v11103_v32, %v12260_v5  ;;  %v11086_v29 = vcombine.low %v16568_v30, %v16574_v60  ;;  %v8632_v59 = vcombine.low %v17940_v35, %v17946_v31 }
 0x348   : > { %v10571_v33 = vcombine.low %v10563_v27, %v10570_v0  ;;  %v9847_v27 = vrot.slane %v9839_v56, %v12260_v5  ;;  %v11829_v53 = vcombine.high %v17940_v35, %v17946_v31  ;;  %v11110_v12 = vrot.slane %v11102_v23, %v12260_v5  ;;  %v16796_v35 = vpop.permute.xlu1 %10749  ;;  %v10752_v31 = vpop.permute.xlu0 %10751 }
 0x349   : > { %v9904_v8 = vcombine.low %v9896_v24, %v9903_v41  ;;  %v11093_v0 = vrot.slane %v11085_v47, %v12260_v5  ;;  %v11100_v56 = vrot.slane %v11086_v29, %v12260_v5  ;;  %v16788_v25 = vrot.slane %v8634_v57, %v12260_v5  ;;  %v17953_v41 = vld [vmem:[#allocation114_spill] sm:$0xff]  ;;  %v17954_v57 = vld [vmem:[#allocation93_spill] sm:$0xff] }
 0x34a   : > { %10757 = vrot.lane.b32.xlu0 %v10571_v33, %s12171_s26  ;;  %v9855_v34 = vcombine.low %v9847_v27, %v9854_v10  ;;  %v16791_v30 = vrot.slane %v11830_v45, %v12260_v5  ;;  %v16794_v60 = vrot.slane %v8681_v19, %v12260_v5  ;;  %v11118_v61 = vcombine.low %v11110_v12, %v11117_v51  ;;  %v17955_v33 = vld [vmem:[#allocation94_spill] sm:$0xff] }
 0x34b   : > { %10210 = vrot.lane.b32.xlu1 %v9904_v8, %s12166_s11  ;;  %v11101_v44 = vcombine.low %v11093_v0, %v11100_v56  ;;  %v16801_v28 = vrot.slane %v17953_v41, %v12260_v5  ;;  %v17956_v23 = vcombine.low %v17954_v57, %v17955_v33  ;;  %v17958_v45 = vcombine.high %v17954_v57, %v17955_v33  ;;  %v17959_v29 = vld [vmem:[#allocation122_spill] sm:$0xff]  ;;  %v17960_v8 = vld [vmem:[#allocation105_spill] sm:$0xff]  ;;  %v17962_v56 = vld [vmem:[#allocation103_spill] sm:$0xff] }
 0x34c   : > { %v10538_v48 = vcombine.low %v16788_v25, %v16791_v30  ;;  %v16818_v24 = vrot.slane %v8632_v59, %v12260_v5  ;;  %v16823_v27 = vrot.slane %v11829_v53, %v12260_v5  ;;  %v11299_v12 = vpop.permute.xlu1 %11298  ;;  %v17961_v53 = vld [vmem:[#allocation104_spill] sm:$0xff]  ;;  %v16839_v57 = vpop.permute.xlu0 %11280 }
 0x34d   : > { %v16809_v32 = vrot.slane %v17956_v23, %v12260_v5  ;;  %v16815_v19 = vrot.slane %v17958_v45, %v12260_v5  ;;  %v10539_v10 = vcombine.low %v16794_v60, %v16801_v28  ;;  %v9790_v41 = vcombine.low %v17962_v56, %v17961_v53  ;;  %17963 = vst [vmem:[#allocation45_spill] sm:$0xff] %v16839_v57  ;;  %v17968_v53 = vld [vmem:[#allocation85_spill] sm:$0xff]  ;;  %v17970_v57 = vld [vmem:[#allocation110_spill] sm:$0xff] }
 0x34e   : > { %10208 = vrot.lane.b32.xlu0 %v9855_v34, %s12166_s11  ;;  %v10546_v51 = vrot.slane %v10538_v48, %v12260_v5  ;;  %v9791_v34 = vcombine.low %v17960_v8, %v17959_v29  ;;  %v10522_v0 = vcombine.low %v16818_v24, %v16823_v27  ;;  %v11068_v48 = vcombine.low %v9838_v3, %v16730_v7  ;;  %v17964_v29 = vld [vmem:[#allocation99_spill] sm:$0xff] }
 0x34f   : > { %17957 = vst [vmem:[#allocation14_spill] sm:$0xff] %v16809_v32  ;;  %11304 = vrot.lane.b32.xlu1 %v11118_v61, %s12170_s25  ;;  %v10521_v47 = vcombine.low %v16809_v32, %v16815_v19  ;;  %v10553_v59 = vrot.slane %v10539_v10, %v12260_v5  ;;  %v17965_v8 = vld [vmem:[#allocation91_spill] sm:$0xff]  ;;  %v9798_v7 = vrot.slane %v9790_v41, %v12260_v5 }
 0x350   : > { %v10536_v23 = vrot.slane %v10522_v0, %v12260_v5  ;;  %v9805_v45 = vrot.slane %v9791_v34, %v12260_v5  ;;  %v11076_v10 = vrot.slane %v11068_v48, %v12260_v5  ;;  %v8468_v32 = vcombine.low %v17965_v8, %v17964_v29  ;;  %v17969_v34 = vld [vmem:[#allocation84_spill] sm:$0xff]  ;;  %v16857_v48 = vpop.permute.xlu1 %10733 }
 0x351   : > { %v10529_v61 = vrot.slane %v10521_v47, %v12260_v5  ;;  %v10554_v33 = vcombine.low %v10546_v51, %v10553_v59  ;;  %v17966_v51 = vld [vmem:[#allocation101_spill] sm:$0xff]  ;;  %v17967_v59 = vld [vmem:[#allocation100_spill] sm:$0xff]  ;;  %v8467_v56 = vcombine.low %v17969_v34, %v17968_v53  ;;  %17972 = vst [vmem:[#allocation16_spill] sm:$0xff] %v16857_v48  ;;  %v17977_v53 = vld [vmem:[#allocation87_spill] sm:$0xff] }
 0x352   : > { %11302 = vrot.lane.b32.xlu0 %v11101_v44, %s12170_s25  ;;  %v11069_v44 = vcombine.low %v16745_v13, %v16734_v54  ;;  %v8516_v0 = vcombine.low %v17967_v59, %v17966_v51  ;;  %v17971_v54 = vld [vmem:[#allocation102_spill] sm:$0xff]  ;;  %v9806_v29 = vcombine.low %v9798_v7, %v9805_v45  ;;  %v16865_v59 = vpop.permute.xlu0 %10731 }
 0x353   : > { %10755 = vrot.lane.b32.xlu1 %v10554_v33, %s12171_s26  ;;  %v10537_v47 = vcombine.low %v10529_v61, %v10536_v23  ;;  %v8517_v13 = vcombine.low %v17971_v54, %v17970_v57  ;;  %v17973_v61 = vld [vmem:[#allocation92_spill] sm:$0xff]  ;;  %v17974_v23 = vld [vmem:[#allocation89_spill] sm:$0xff]  ;;  %17975 = vst [vmem:[#allocation38_spill] sm:$0xff] %v16865_v59  ;;  %v17979_v7 = vld [vmem:[#allocation82_spill] sm:$0xff] }
 0x354   : > { %v11083_v3 = vrot.slane %v11069_v44, %v12260_v5  ;;  %v8419_v41 = vcombine.low %v17974_v23, %v17973_v61  ;;  %v8482_v44 = vrot.slane %v8468_v32, %v12260_v5  ;;  %v8524_v8 = vrot.slane %v8516_v0, %v12260_v5  ;;  %v17976_v57 = vld [vmem:[#allocation88_spill] sm:$0xff]  ;;  %v17982_v61 = vld [vmem:[#allocation7_spill] sm:$0xff] }
 0x355   : > { %v8531_v51 = vrot.slane %v8517_v13, %v12260_v5  ;;  %v8418_v34 = vcombine.low %v17977_v53, %v17976_v57  ;;  %v16876_v13 = vpop.permute.xlu1 %10184 }
 0x356   : > { %10753 = vrot.lane.b32.xlu0 %v10537_v47, %s12171_s26  ;;  %v11084_v33 = vcombine.low %v11076_v10, %v11083_v3  ;;  %v8475_v47 = vrot.slane %v8467_v56, %v12260_v5  ;;  %v17978_v10 = vld [vmem:[#allocation90_spill] sm:$0xff]  ;;  %v8433_v54 = vrot.slane %v8419_v41, %v12260_v5  ;;  %17980 = vst [vmem:[#allocation39_spill] sm:$0xff] %v16876_v13  ;;  %v17985_v41 = vld [vmem:[#allocation83_spill] sm:$0xff] }
 0x357   : > { %10206 = vrot.lane.b32.xlu1 %v9806_v29, %s12166_s11  ;;  %v8532_v45 = vcombine.low %v8524_v8, %v8531_v51  ;;  %v8370_v3 = vcombine.low %v17979_v7, %v17978_v10  ;;  %v17981_v29 = vld [vmem:[#allocation5_spill] sm:$0xff]  ;;  %v8426_v53 = vrot.slane %v8418_v34, %v12260_v5  ;;  %v16898_v10 = vpop.permute.xlu0 %10182  ;;  %v18003_v13 = vld [vmem:[#allocation78_spill] sm:$0xff]  ;;  %s17288_s11 = scalar_lea.hbm %s17337_s5, %s11895_s8 }
 0x358   : > { %v8483_v32 = vcombine.low %v8475_v47, %v8482_v44  ;;  %v17983_v23 = vcombine.low %v17981_v29, %v17982_v61  ;;  %v17984_v56 = vcombine.high %v17981_v29, %v17982_v61  ;;  %v17986_v44 = vld [vmem:[#allocation81_spill] sm:$0xff]  ;;  %17987 = vst [vmem:[#allocation30_spill] sm:$0xff] %v16898_v10  ;;  %v17989_v29 = vld [vmem:[#allocation72_spill] sm:$0xff] }
 0x359   : > { %v11358_v0 = vsel %vm5938_vm1, %v8532_v45, %v16758_v1  ;;  %v8369_v51 = vcombine.low %v17986_v44, %v17985_v41  ;;  %v17988_v7 = vld [vmem:[#allocation73_spill] sm:$0xff]  ;;  %v8434_v41 = vcombine.low %v8426_v53, %v8433_v54  ;;  %v17995_v44 = vmov 0.0   ;;  %v18001_v10 = vld [vmem:[#allocation76_spill] sm:$0xff] }
 0x35a   : > { %v16882_v57 = vrot.slane %v17983_v23, %v12260_v5  ;;  %v16888_v8 = vrot.slane %v17984_v56, %v12260_v5  ;;  %v11383_v1 = vsel %vm6007_vm4, %v11358_v0, %v10752_v31  ;;  %v11357_v47 = vsel %vm5938_vm1, %v8483_v32, %v16685_v38  ;;  %v17990_v31 = vld [vmem:[#allocation6_spill] sm:$0xff]  ;;  %v17993_v38 = vld [vmem:[#allocation75_spill] sm:$0xff] }
 0x35b   : > { %11300 = vrot.lane.b32.xlu1 %v11084_v33, %s12170_s25  ;;  %v11409_v45 = vsel %vm11393_vm5, %v11383_v1, %v11299_v12  ;;  %v8271_v61 = vcombine.low %v17989_v29, %v17988_v7  ;;  %v8384_v23 = vrot.slane %v8370_v3, %v12260_v5  ;;  %v11382_v56 = vsel %vm6007_vm4, %v11357_v47, %v16796_v35  ;;  %v17991_v33 = vld [vmem:[#allocation8_spill] sm:$0xff]  ;;  %v17994_v32 = vld [vmem:[#allocation74_spill] sm:$0xff]  ;;  %v17997_v35 = vld [vmem:[#allocation9_spill] sm:$0xff]  ;;  %s215_s25 = sand.u32 1, %s12154_s19  }
 0x35c   : > { %11862 = vmatpush1.xpose.msk.msra.mxu1 %vm11467_vm6, %v11409_v45  ;;  %v17992_v34 = vcombine.low %v17990_v31, %v17991_v33  ;;  %v8272_v12 = vcombine.low %v17994_v32, %v17993_v38  ;;  %v17996_v3 = vcombine.high %v17990_v31, %v17991_v33  ;;  %v17998_v47 = vld [vmem:[#allocation10_spill] sm:$0xff]  ;;  %v18000_v29 = vld [vmem:[#allocation77_spill] sm:$0xff]  ;;  %v8377_v54 = vrot.slane %v8369_v51, %v12260_v5  ;;  %v16932_v38 = vpop.permute.xlu1 %11278  ;;  %s11715_s30 = sshll.u32 %s215_s25, 5  ;;  %s17291_s12 = scalar_lea.sflag [#allocation3], %s215_s25 }
 0x35d   : > { %11551 = vmatprep.subr.mxu1 %v17995_v44  ;;  %v17999_v45 = vcombine.low %v17997_v35, %v17998_v47  ;;  %v8320_v59 = vcombine.low %v18001_v10, %v18000_v29  ;;  %v7781_v53 = vcombine.low %v16882_v57, %v16888_v8  ;;  %v11356_v31 = vsel %vm5938_vm1, %v8434_v41, %v16558_v6  ;;  %v18004_v35 = vld [vmem:[#allocation71_spill] sm:$0xff]  ;;  %v18005_v47 = vld [vmem:[#allocation70_spill] sm:$0xff]  ;;  %s217_s6 = scalar_lea.vmem [#allocation2], %s11715_s30 }
 0x35e   : > { %v7808_v0 = vrot.slane %v17992_v34, %v12260_v5  ;;  %v7815_v1 = vrot.slane %v17996_v3, %v12260_v5  ;;  %v18002_v34 = vld [vmem:[#allocation80_spill] sm:$0xff]  ;;  %v11408_v33 = vsel %vm11393_vm5, %v11382_v56, %v16771_v16  ;;  %v8385_v10 = vcombine.low %v8377_v54, %v8384_v23  ;;  %v16943_v16 = vpop.permute.xlu0 %11276  ;;  %s11649_s7 = sshll.u32 %s217_s6, 4  ;;  %s17283_s7 = int_to_ptr.vmem [resolvable:$true] %s11649_s7 }
 0x35f   : > { %v7822_v7 = vrot.slane %v17999_v45, %v12260_v5  ;;  %v8321_v48 = vcombine.low %v18003_v13, %v18002_v34  ;;  %v11381_v13 = vsel %vm6007_vm4, %v11356_v31, %v16737_v11  ;;  %v8810_v51 = vcombine.low %v16680_v50, %v16683_v52  ;;  %s12102_s22 = scalar_lea.vmem %s17283_s7, 512  ;;  %p12109_p0 = scmp.lt.s32.totalorder %s17283_s7, %s12107_s14 }
 0x360   : > { %v7830_v32 = vcombine.low %v7808_v0, %v7815_v1  ;;  %11863 = vmatpush1.xpose.msk.msra.mxu1 %vm11467_vm6, %v11408_v33  ;;  %v8811_v6 = vcombine.low %v16690_v22, %v16516_v46  ;;  %v8859_v11 = vcombine.low %v16522_v36, %v16536_v62  ;;  %v8860_v23 = vcombine.low %v16509_v17, %v16383_v4  ;;  %v16982_v41 = vpop.permute.xlu1 %10729  ;;  %p12103_p11 = scmp.ne.s32.totalorder %s17283_s7, %s12102_s22  ;;  %p12110_p1 = scmp.lt.s32.totalorder %s12108_s15, %s12102_s22 }
 0x361   : > { %v7831_v3 = vcombine.low %v7822_v7, %v16287_v20  ;;  %11553 = vmatprep.subr.mxu1 %v17995_v44  ;;  %v8335_v50 = vrot.slane %v8321_v48, %v12260_v5  ;;  %v11355_v46 = vsel %vm5938_vm1, %v8385_v10, %v16482_v43  ;;  %v16959_v52 = vrot.slane %v8810_v51, %v12260_v5 }
 0x362   : > { %v16946_v56 = vrot.slane %v7830_v32, %v12260_v5  ;;  %v16962_v22 = vrot.slane %v8811_v6, %v12260_v5  ;;  %v11407_v0 = vsel %vm11393_vm5, %v11381_v13, %v16718_v39  ;;  %v16969_v62 = vrot.slane %v8859_v11, %v12260_v5  ;;  %v16995_v34 = vpop.permute.xlu0 %10727  ;;  %v18008_v6 = vld [vmem:[#allocation63_spill] sm:$0xff]  ;;  %v18009_v11 = vld [vmem:[#allocation66_spill] sm:$0xff]  ;;  %p12104_p12 = pnand %p12103_p11, %p12243_p5  ;;  %p12111_p2 = por %p12110_p1, %p12109_p0 }
 0x363   : > { %v16949_v20 = vrot.slane %v7831_v3, %v12260_v5  ;;  %v16972_v4 = vrot.slane %v8860_v23, %v12260_v5  ;;  %v8328_v43 = vrot.slane %v8320_v59, %v12260_v5  ;;  %v11380_v17 = vsel %vm6007_vm4, %v11355_v46, %v16660_v14  ;;  %v18011_v46 = vld [vmem:[#allocation64_spill] sm:$0xff] }
 0x364   : > { %11864 = vmatpush1.xpose.msk.msra.mxu1 %vm11467_vm6, %v11407_v0  ;;  %v8826_v48 = vcombine.low %v16959_v52, %v16962_v22  ;;  %v8286_v39 = vrot.slane %v8272_v12, %v12260_v5  ;;  %v8712_v59 = vcombine.low %v16791_v30, %v16794_v60  ;;  %v8713_v14 = vcombine.low %v16801_v28, %v16705_v58  ;;  %v18006_v30 = vld [vmem:[#allocation69_spill] sm:$0xff]  ;;  %v18007_v60 = vld [vmem:[#allocation68_spill] sm:$0xff]  ;;  %v17038_v10 = vpop.permute.xlu1 %10180  ;;  %v18051_v52 = vld [vmem:[#allocation14_spill] sm:$0xff]  ;;  %p12105_p13 = pneg %p12104_p12 }
 0x365   : > { %v7846_v36 = vcombine.low %v16946_v56, %v16949_v20  ;;  %11555 = vmatprep.subr.mxu1 %v17995_v44  ;;  %v8875_v1 = vcombine.low %v16969_v62, %v16972_v4  ;;  %v8223_v45 = vcombine.low %v18005_v47, %v18004_v35  ;;  %v8279_v7 = vrot.slane %v8271_v61, %v12260_v5  ;;  %v18013_v47 = vld [vmem:[#allocation12_spill] sm:$0xff]  ;;  %v18052_v22 = vld [vmem:[#allocation121_spill] sm:$0xff] }
 0x366   : > { %v8336_v29 = vcombine.low %v8328_v43, %v8335_v50  ;;  %v11406_v12 = vsel %vm11393_vm5, %v11380_v17, %v16636_v2  ;;  %v16998_v54 = vrot.slane %v8712_v59, %v12260_v5  ;;  %v17001_v31 = vrot.slane %v8713_v14, %v12260_v5  ;;  %v18010_v50 = vld [vmem:[#allocation65_spill] sm:$0xff]  ;;  %p12112_p3 = pnand %p12111_p2, %p12105_p13 }
 0x367   : > { %v8761_v58 = vcombine.low %v16712_v15, %v16722_v9  ;;  %v8222_v28 = vcombine.low %v18007_v60, %v18006_v30  ;;  %v8762_v61 = vcombine.low %v16716_v21, %v16673_v42  ;;  %v8663_v2 = vcombine.low %v16815_v19, %v16818_v24  ;;  %v11419_v17 = vld [vmem:[%s17334_s2] sm:$0xff] }
 0x368   : > { %11865 = vmatpush1.xpose.msk.msra.mxu1 %vm11467_vm6, %v11406_v12  ;;  %v8664_v33 = vcombine.low %v16823_v27, %v16788_v25  ;;  %v8287_v32 = vcombine.low %v8279_v7, %v8286_v39  ;;  %v11354_v3 = vsel %vm5938_vm1, %v8336_v29, %v16412_v18  ;;  %v8728_v15 = vcombine.low %v16998_v54, %v17001_v31  ;;  %v18012_v59 = vld [vmem:[#allocation17_spill] sm:$0xff]  ;;  %v17064_v35 = vpop.permute.xlu1 %11274  ;;  %v18014_v7 = vld [vmem:[#allocation15_spill] sm:$0xff]  ;;  %v11420_v12 = vld [vmem:[%s17334_s2 + $0x8] sm:$0xff] }
 0x369   : > { %11557 = vmatprep.subr.mxu1 %v17995_v44  ;;  %v17020_v9 = vrot.slane %v8761_v58, %v12260_v5  ;;  %v11379_v42 = vsel %vm6007_vm4, %v11354_v3, %v16582_v37  ;;  %v17025_v21 = vrot.slane %v8762_v61, %v12260_v5  ;;  %v17028_v25 = vrot.slane %v8663_v2, %v12260_v5  ;;  %v11423_v30 = vld [vmem:[%s17336_s4] sm:$0xff]  ;;  %v18015_v61 = vld [vmem:[#allocation42_spill] sm:$0xff] }
 0x36a   : > { %v17031_v19 = vrot.slane %v8664_v33, %v12260_v5  ;;  %v8237_v18 = vrot.slane %v8223_v45, %v12260_v5  ;;  %v11353_v24 = vsel %vm5938_vm1, %v8287_v32, %v16321_v49  ;;  %v11405_v27 = vsel %vm11393_vm5, %v11379_v42, %v16622_v63  ;;  %v17051_v63 = vpop.permute.xlu0 %10178  ;;  %v18016_v2 = vld [vmem:[#allocation86_spill] sm:$0xff] }
 0x36b   : > { %v11378_v37 = vsel %vm6007_vm4, %v11353_v24, %v16503_v40  ;;  %v8777_v13 = vcombine.low %v17020_v9, %v17025_v21  ;;  %v8125_v23 = vcombine.low %v18009_v11, %v18008_v6  ;;  %v8230_v49 = vrot.slane %v8222_v28, %v12260_v5  ;;  %v11424_v32 = vld [vmem:[%s17336_s4 + $0x8] sm:$0xff]  ;;  %v18019_v24 = vld [vmem:[#allocation36_spill] sm:$0xff]  ;;  %v18020_v11 = vld [vmem:[#allocation27_spill] sm:$0xff] }
 0x36c   : > { %11866 = vmatpush1.xpose.msk.msra.mxu1 %vm11467_vm6, %v11405_v27  ;;  %v8679_v51 = vcombine.low %v17028_v25, %v17031_v19  ;;  %v8124_v40 = vcombine.low %v18011_v46, %v18010_v50  ;;  %v11404_v43 = vsel %vm11393_vm5, %v11378_v37, %v16524_v26  ;;  %v12172_v60 = vmov 0   ;;  %v18017_v3 = vld [vmem:[#allocation34_spill] sm:$0xff]  ;;  %v11421_v37 = vld [vmem:[%s17334_s2 + $0x10] sm:$0xff] }
 0x36d   : > { %11559 = vmatprep.subr.mxu1 %v17995_v44  ;;  %v8238_v0 = vcombine.low %v8230_v49, %v8237_v18  ;;  %v8139_v39 = vrot.slane %v8125_v23, %v12260_v5  ;;  %12067 = vset.pattern.permute.xlu1 %v12172_v60  ;;  %v8027_v33 = vcombine.low %v18016_v2, %v18015_v61  ;;  %v18018_v18 = vld [vmem:[#allocation57_spill] sm:$0xff]  ;;  %v18021_v50 = vld [vmem:[#allocation55_spill] sm:$0xff]  ;;  %v18022_v46 = vld [vmem:[#allocation50_spill] sm:$0xff] }
 0x36e   : > { %v8132_v26 = vrot.slane %v8124_v40, %v12260_v5  ;;  %v17075_v58 = vpop.permute.xlu0 %11272  ;;  %11427 = vperm.xlu1 %12067, %v11423_v30   ;;  %v8026_v27 = vcombine.low %v18019_v24, %v18018_v18  ;;  %v7978_v40 = vcombine.low %v18022_v46, %v18021_v50  ;;  %v18030_v30 = vld [vmem:[#allocation16_spill] sm:$0xff]  ;;  %v18031_v61 = vld [vmem:[#allocation51_spill] sm:$0xff]  ;;  %v18036_v46 = vld [vmem:[#allocation45_spill] sm:$0xff] }
 0x36f   : > { %v11352_v14 = vsel %vm5938_vm1, %v8238_v0, %v18012_v59  ;;  %v10726_v6 = vpop.permute.xlu1 %10725  ;;  %v8041_v49 = vrot.slane %v8027_v33, %v12260_v5  ;;  %v18032_v2 = vld [vmem:[#allocation60_spill] sm:$0xff]  ;;  %v18033_v18 = vld [vmem:[#allocation39_spill] sm:$0xff] }
 0x370   : > { %11867 = vmatpush1.xpose.msk.msra.mxu1 %vm11467_vm6, %v11404_v43  ;;  %v11377_v45 = vsel %vm6007_vm4, %v11352_v14, %v18013_v47  ;;  %v8140_v28 = vcombine.low %v8132_v26, %v8139_v39  ;;  %v18023_v43 = vld [vmem:[#allocation43_spill] sm:$0xff]  ;;  %v18025_v39 = vld [vmem:[#allocation53_spill] sm:$0xff]  ;;  %v8034_v47 = vrot.slane %v8026_v27, %v12260_v5  ;;  %v7929_v33 = vcombine.low %v18032_v2, %v18031_v61  ;;  %v18043_v61 = vld [vmem:[#allocation56_spill] sm:$0xff] }
 0x371   : > { %11561 = vmatprep.subr.mxu1 %v17995_v44  ;;  %v11403_v29 = vsel %vm11393_vm5, %v11377_v45, %v18014_v7  ;;  %v18028_v45 = vld [vmem:[#allocation49_spill] sm:$0xff]  ;;  %v11422_v7 = vld [vmem:[%s17334_s2 + $0x18] sm:$0xff]  ;;  %v18044_v2 = vld [vmem:[#allocation54_spill] sm:$0xff] }
 0x372   : > { %v11350_v42 = vsel %vm5938_vm1, %v8140_v28, %v18017_v3  ;;  %11432 = vperm.xlu1 %12067, %v11424_v32   ;;  %v8042_v32 = vcombine.low %v8034_v47, %v8041_v49  ;;  %v7992_v3 = vrot.slane %v7978_v40, %v12260_v5  ;;  %v7943_v49 = vrot.slane %v7929_v33, %v12260_v5  ;;  %v18040_v47 = vld [vmem:[#allocation19_spill] sm:$0xff] }
 0x373   : > { %v11375_v23 = vsel %vm6007_vm4, %v11350_v42, %v18020_v11  ;;  %v18035_v11 = vld [vmem:[#allocation47_spill] sm:$0xff]  ;;  %v7879_v33 = vcombine.low %v18044_v2, %v18043_v61 }
 0x374   : > { %11435 = vxpose.xlu0.b32.start [1/4] (short) (narrow) %v11419_v17, 16  ;;  %11868 = vmatpush1.xpose.msk.msra.mxu1 %vm11467_vm6, %v11403_v29  ;;  %v17102_v0 = vpop.permute.xlu0 %10723  ;;  %v18024_v17 = vld [vmem:[#allocation28_spill] sm:$0xff]  ;;  %v11348_v24 = vsel %vm5938_vm1, %v8042_v32, %v18033_v18 }
 0x375   : > { %11563 = vmatprep.subr.mxu1 %v17995_v44  ;;  %v18026_v59 = vcombine.low %v18024_v17, %v18025_v39  ;;  %v18029_v29 = vld [vmem:[#allocation44_spill] sm:$0xff]  ;;  %v18038_v39 = vld [vmem:[#allocation37_spill] sm:$0xff] }
 0x376   : > { %v18037_v17 = vld [vmem:[#allocation48_spill] sm:$0xff] }
 0x377   : > { %v11349_v14 = vsel %vm5938_vm1, %v18026_v59, %v18023_v43  ;;  %v7880_v59 = vcombine.low %v18038_v39, %v18037_v17 }
 0x378   : > { %11436 = vxpose.xlu0.b32.cont [2/4] (short) (narrow) %v11420_v12, 16  ;;  %11869 = vmatpush1.xpose.msk.msra.mxu1 %vm11467_vm6, %v16649_v55  ;;  %v18027_v55 = vld [vmem:[#allocation52_spill] sm:$0xff]  ;;  %v11401_v12 = vsel %vm11393_vm5, %v11375_v23, %v18029_v29  ;;  %v11374_v28 = vsel %vm6007_vm4, %v11349_v14, %v18030_v30  ;;  %v18039_v14 = vld [vmem:[#allocation21_spill] sm:$0xff]  ;;  %v18042_v29 = vld [vmem:[#allocation30_spill] sm:$0xff] }
 0x379   : > { %11565 = vmatprep.subr.mxu1 %v17995_v44  ;;  %v7977_v26 = vcombine.low %v18028_v45, %v18027_v55  ;;  %v10177_v42 = vpop.permute.xlu1 %10176  ;;  %v11400_v43 = vsel %vm11393_vm5, %v11374_v28, %v18036_v46  ;;  %v7751_v55 = vcombine.low %v18040_v47, %v18039_v14  ;;  %v11811_v45 = vcombine.high %v18040_v47, %v18039_v14 }
 0x37b   : > { %v7985_v27 = vrot.slane %v7977_v26, %v12260_v5  ;;  %v18041_v26 = vld [vmem:[#allocation38_spill] sm:$0xff] }
 0x37c   : > { %11437 = vxpose.xlu0.b32.cont [3/4] (short) (narrow) %v11421_v37, 16  ;;  %11870 = vmatpush1.xpose.msk.msra.mxu1 %vm11467_vm6, %v11401_v12  ;;  %v18034_v37 = vld [vmem:[#allocation46_spill] sm:$0xff]  ;;  %v10175_v50 = vpop.permute.xlu0 %10174 }
 0x37d   : > { %11567 = vmatprep.subr.mxu1 %v17995_v44  ;;  %v7928_v23 = vcombine.low %v18035_v11, %v18034_v37  ;;  %v7993_v40 = vcombine.low %v7985_v27, %v7992_v3  ;;  %v11271_v32 = vpop.permute.xlu1 %11270  ;;  %v7773_v37 = vrot.slane %v7751_v55, %v12260_v5  ;;  %v7780_v11 = vrot.slane %v11811_v45, %v12260_v5  ;;  %v18046_v45 = vld [vmem:[#allocation11_spill] sm:$0xff] }
 0x37f   : > { %v11347_v12 = vsel %vm5938_vm1, %v7993_v40, %v18042_v29  ;;  %v7936_v28 = vrot.slane %v7928_v23, %v12260_v5  ;;  %v7887_v23 = vrot.slane %v7879_v33, %v12260_v5  ;;  %v18047_v33 = vld [vmem:[#allocation23_spill] sm:$0xff] }
 0x380   : > { %11438 = vxpose.xlu0.b32.end [4/4] (short) (narrow) %v11422_v7, 16  ;;  %11871 = vmatpush1.xpose.msk.msra.mxu1 %vm11467_vm6, %v11400_v43  ;;  %v11373_v7 = vsel %vm6007_vm4, %v11348_v24, %v18041_v26  ;;  %v11372_v3 = vsel %vm6007_vm4, %v11347_v12, %v16982_v41  ;;  %v11269_v18 = vpop.permute.xlu0 %11268  ;;  %v7894_v24 = vrot.slane %v7880_v59, %v12260_v5 }
 0x381   : > { %11569 = vmatprep.subr.mxu1 %v17995_v44  ;;  %v11399_v30 = vsel %vm11393_vm5, %v11373_v7, %v16932_v38  ;;  %v7944_v27 = vcombine.low %v7936_v28, %v7943_v49  ;;  %v11398_v41 = vsel %vm11393_vm5, %v11372_v3, %v16943_v16  ;;  %v7782_v43 = vcombine.low %v7773_v37, %v7780_v11 }
 0x382   : > { %v7895_v46 = vcombine.low %v7887_v23, %v7894_v24 }
 0x383   : > { %v11346_v38 = vsel %vm5938_vm1, %v7944_v27, %v17038_v10  ;;  %v7796_v16 = vrot.slane %v7782_v43, %v12260_v5  ;;  %v18050_v27 = vld [vmem:[#allocation31_spill] sm:$0xff] }
 0x384   : > { %11872 = vmatpush1.xpose.msk.msra.mxu1 %vm11467_vm6, %v11399_v30  ;;  %v11371_v40 = vsel %vm6007_vm4, %v11346_v38, %v16995_v34  ;;  %v11345_v39 = vsel %vm5938_vm1, %v7895_v46, %v17051_v63  ;;  %v11344_v34 = vsel %vm5938_vm1, %v7846_v36, %v10177_v42  ;;  %v7789_v63 = vrot.slane %v7781_v53, %v12260_v5 }
 0x385   : > { %11571 = vmatprep.subr.mxu1 %v17995_v44  ;;  %v11397_v10 = vsel %vm11393_vm5, %v11371_v40, %v17064_v35  ;;  %v11370_v59 = vsel %vm6007_vm4, %v11345_v39, %v10726_v6  ;;  %v11369_v55 = vsel %vm6007_vm4, %v11344_v34, %v17102_v0 }
 0x386   : > { %v11396_v6 = vsel %vm11393_vm5, %v11370_v59, %v17075_v58  ;;  %v7797_v47 = vcombine.low %v7789_v63, %v7796_v16  ;;  %v11395_v20 = vsel %vm11393_vm5, %v11369_v55, %v11271_v32  ;;  %v18048_v32 = vld [vmem:[#allocation22_spill] sm:$0xff]  ;;  %v18054_v55 = vld [vmem:[#allocation116_spill] sm:$0xff] }
 0x387   : > { %v10722_v49 = vpop.permute.xlu1 %10721  ;;  %v10217_v17 = vpop.permute.xlu0 %10216  ;;  %v8908_v3 = vcombine.low %v18048_v32, %v18047_v33 }
 0x388   : > { %11873 = vmatpush1.xpose.msk.msra.mxu1 %vm11467_vm6, %v11398_v41  ;;  %v11343_v56 = vsel %vm5938_vm1, %v7797_v47, %v10175_v50  ;;  %v18045_v50 = vld [vmem:[#allocation61_spill] sm:$0xff]  ;;  %v11364_v63 = vsel %vm5938_vm1, %v8826_v48, %v10217_v17  ;;  %v8615_v48 = vcombine.low %v18052_v22, %v18051_v52 }
 0x389   : > { %11573 = vmatprep.subr.mxu1 %v17995_v44  ;;  %v11368_v57 = vsel %vm6007_vm4, %v11343_v56, %v10722_v49  ;;  %v8941_v26 = vcombine.low %v18046_v45, %v18045_v50  ;;  %v8916_v38 = vrot.slane %v8908_v3, %v12260_v5 }
 0x38a   : > { %v11394_v58 = vsel %vm11393_vm5, %v11368_v57, %v11269_v18  ;;  %v18049_v18 = vld [vmem:[#allocation24_spill] sm:$0xff] }
 0x38b   : > { %v10219_v14 = vpop.permute.xlu1 %10218  ;;  %v8948_v12 = vrot.slane %v8941_v26, %v12260_v5  ;;  %v8909_v24 = vcombine.low %v18050_v27, %v18049_v18 }
 0x38c   : > { %11874 = vmatpush1.xpose.msk.msra.mxu1 %vm11467_vm6, %v11397_v10 }
 0x38d   : > { %11575 = vmatprep.subr.mxu1 %v17995_v44  ;;  %v11311_v35 = vpop.permute.xlu0 %11310  ;;  %v8923_v23 = vrot.slane %v8909_v24, %v12260_v5 }
 0x38f   : > { %v8924_v43 = vcombine.low %v8916_v38, %v8923_v23 }
 0x390   : > { %11875 = vmatpush1.xpose.msk.msra.mxu1 %vm11467_vm6, %v11396_v6 }
 0x391   : > { %11577 = vmatprep.subr.mxu1 %v17995_v44 }
 0x392   : > { %v10764_v36 = vpop.permute.xlu1 %10763 }
 0x393   : > { %v10221_v8 = vpop.permute.xlu0 %10220  ;;  %v11389_v62 = vsel %vm6007_vm4, %v11364_v63, %v10764_v36  ;;  %v8629_v36 = vrot.slane %v8615_v48, %v12260_v5 }
 0x394   : > { %11876 = vmatpush1.xpose.msk.msra.mxu1 %vm11467_vm6, %v11395_v20  ;;  %v11366_v40 = vsel %vm5938_vm1, %v8924_v43, %v10221_v8  ;;  %v18055_v8 = vld [vmem:[#allocation117_spill] sm:$0xff] }
 0x395   : > { %11579 = vmatprep.subr.mxu1 %v17995_v44 }
 0x396   : > { %v10223_v53 = vpop.permute.xlu1 %10222 }
 0x397   : > { %v11367_v28 = vsel %vm5938_vm1, %v8948_v12, %v10223_v53  ;;  %v18056_v53 = vld [vmem:[#allocation115_spill] sm:$0xff] }
 0x398   : > { %11877 = vmatpush1.xpose.msk.msra.mxu1 %vm11467_vm6, %v11394_v58  ;;  %v8566_v54 = vcombine.low %v18056_v53, %v18055_v8  ;;  %v18057_v58 = vld [vmem:[#allocation113_spill] sm:$0xff] }
 0x399   : > { %11595 = vmatprep.subr.mxu1 %v17995_v44 }
 0x39a   : > { %v10766_v0 = vpop.permute.xlu0 %10765  ;;  %v11313_v42 = vpop.permute.xlu1 %11312 }
 0x39e   : > { %v10770_v7 = vpop.permute.xlu0 %10769 }
 0x39f   : > { %v11392_v61 = vsel %vm6007_vm4, %v11367_v28, %v10770_v7  ;;  %v8580_v7 = vrot.slane %v8566_v54, %v12260_v5 }
 0x3a1   : > { %v10768_v29 = vpop.permute.xlu1 %10767 }
 0x3a2   : > { %v11391_v39 = vsel %vm6007_vm4, %v11366_v40, %v10768_v29 }
 0x3a3   : > { %v10762_v30 = vpop.permute.xlu0 %10761 }
 0x3a7   : > { %v11317_v2 = vpop.permute.xlu1 %11316 }
 0x3a8   : > { %v11418_v37 = vsel %vm11393_vm5, %v11392_v61, %v11317_v2 }
 0x3a9   : > { %11878 = vmatpush2.xpose.msk.msra.mxu1 %vm11467_vm6, %v11418_v37  ;;  %12068 = vset.pattern.permute.xlu0 %v12172_v60  ;;  %v11365_v60 = vsel %vm5938_vm1, %v8875_v1, %v10219_v14  ;;  %v11415_v14 = vsel %vm11393_vm5, %v11389_v62, %v11311_v35 }
 0x3aa   : > { %v10213_v11 = vpop.permute.xlu0 %10212  ;;  %11597 = vmatprep.subr.mxu1 %v17995_v44  ;;  %v11390_v16 = vsel %vm6007_vm4, %v11365_v60, %v10766_v0  ;;  %v18058_v0 = vld [vmem:[#allocation112_spill] sm:$0xff] }
 0x3ab   : > { %v11416_v6 = vsel %vm11393_vm5, %v11390_v16, %v11313_v42  ;;  %v11362_v9 = vsel %vm5938_vm1, %v8728_v15, %v10213_v11  ;;  %v8565_v42 = vcombine.low %v18058_v0, %v18057_v58 }
 0x3ad   : > { %v10215_v41 = vpop.permute.xlu1 %10214  ;;  %v8573_v12 = vrot.slane %v8565_v42, %v12260_v5 }
 0x3ae   : > { %v11307_v46 = vpop.permute.xlu0 %11306  ;;  %v11363_v4 = vsel %vm5938_vm1, %v8777_v13, %v10215_v41  ;;  %v18053_v13 = vld [vmem:[#allocation120_spill] sm:$0xff] }
 0x3af   : > { %v11388_v17 = vsel %vm6007_vm4, %v11363_v4, %v10762_v30  ;;  %v8614_v35 = vcombine.low %v18054_v55, %v18053_v13  ;;  %v8581_v28 = vcombine.low %v8573_v12, %v8580_v7 }
 0x3b1   : > { %v11309_v49 = vpop.permute.xlu1 %11308  ;;  %v8622_v15 = vrot.slane %v8614_v35, %v12260_v5 }
 0x3b2   : > { %v11414_v21 = vsel %vm11393_vm5, %v11388_v17, %v11309_v49 }
 0x3b3   : > { %v11315_v10 = vpop.permute.xlu0 %11314  ;;  %v8630_v45 = vcombine.low %v8622_v15, %v8629_v36 }
 0x3b4   : > { %v11417_v59 = vsel %vm11393_vm5, %v11391_v39, %v11315_v10 }
 0x3b5   : > { %11879 = vmatpush2.xpose.msk.msra.mxu1 %vm11467_vm6, %v11417_v59 }
 0x3b6   : > { %11599 = vmatprep.subr.mxu1 %v17995_v44 }
 0x3b7   : > { %v10760_v34 = vpop.permute.xlu1 %10759 }
 0x3b8   : > { %v11387_v56 = vsel %vm6007_vm4, %v11362_v9, %v10760_v34 }
 0x3b9   : > { %11880 = vmatpush2.xpose.msk.msra.mxu1 %vm11467_vm6, %v11416_v6  ;;  %v11413_v50 = vsel %vm11393_vm5, %v11387_v56, %v11307_v46 }
 0x3ba   : > { %11601 = vmatprep.subr.mxu1 %v17995_v44 }
 0x3bc   : > { %v10758_v1 = vpop.permute.xlu0 %10757 }
 0x3bd   : > { %v10211_v47 = vpop.permute.xlu1 %10210  ;;  %11881 = vmatpush2.xpose.msk.msra.mxu1 %vm11467_vm6, %v11415_v14 }
 0x3be   : > { %11603 = vmatprep.subr.mxu1 %v17995_v44  ;;  %v11361_v31 = vsel %vm5938_vm1, %v8679_v51, %v10211_v47 }
 0x3bf   : > { %v11386_v29 = vsel %vm6007_vm4, %v11361_v31, %v10758_v1 }
 0x3c0   : > { %v10209_v57 = vpop.permute.xlu0 %10208 }
 0x3c1   : > { %v11305_v20 = vpop.permute.xlu1 %11304  ;;  %11882 = vmatpush2.xpose.msk.msra.mxu1 %vm11467_vm6, %v11414_v21  ;;  %v11360_v25 = vsel %vm5938_vm1, %v8630_v45, %v10209_v57 }
 0x3c2   : > { %11605 = vmatprep.subr.mxu1 %v17995_v44  ;;  %v11412_v19 = vsel %vm11393_vm5, %v11386_v29, %v11305_v20 }
 0x3c4   : > { %v11303_v51 = vpop.permute.xlu0 %11302 }
 0x3c5   : > { %11883 = vmatpush2.xpose.msk.msra.mxu1 %vm11467_vm6, %v11413_v50  ;;  %v10756_v26 = vpop.permute.xlu1 %10755 }
 0x3c6   : > { %11607 = vmatprep.subr.mxu1 %v17995_v44  ;;  %v11385_v30 = vsel %vm6007_vm4, %v11360_v25, %v10756_v26 }
 0x3c7   : > { %v11411_v33 = vsel %vm11393_vm5, %v11385_v30, %v11303_v51 }
 0x3c8   : > { %v10754_v32 = vpop.permute.xlu0 %10753 }
 0x3c9   : > { %11884 = vmatpush2.xpose.msk.msra.mxu1 %vm11467_vm6, %v11412_v19  ;;  %v10207_v61 = vpop.permute.xlu1 %10206 }
 0x3ca   : > { %11609 = vmatprep.subr.mxu1 %v17995_v44  ;;  %v11359_v2 = vsel %vm5938_vm1, %v8581_v28, %v10207_v61 }
 0x3cb   : > { %v11384_v5 = vsel %vm6007_vm4, %v11359_v2, %v10754_v32 }
 0x3cd   : > { %11885 = vmatpush2.xpose.msk.msra.mxu1 %vm11467_vm6, %v11411_v33  ;;  %v11301_v3 = vpop.permute.xlu1 %11300 }
 0x3ce   : > { %11611 = vmatprep.subr.mxu1 %v17995_v44  ;;  %v11410_v18 = vsel %vm11393_vm5, %v11384_v5, %v11301_v3 }
 0x3d1   : > { %11886 = vmatpush2.xpose.msk.msra.mxu1 %vm11467_vm6, %v11410_v18 }
 0x3e9   : > { %v11428_v37 = vpop.permute.xlu1 %11427 }
 0x3ed   : > { %v11433_v43 = vpop.permute.xlu1 %11432 }
 0x3f0   : > { %v11451_v27 = vpop.trf.xlu0 }
 0x3f1   : > { %11887 = vmatmul.mubr.msk.f32.vlgmr.msra.gmra.mxu1 %vm11467_vm6, %v11451_v27 }
 0x3f2   : > { %11619 = vmatprep.mubr.f32.mxu1 %v17995_v44 }
 0x3f4   : > { %v11452_v24 = vpop.trf.xlu0 }
 0x3f5   : > { %11888 = vmatmul.mubr.msk.f32.gmra.mxu1 %vm11467_vm6, %v11452_v24 }
 0x4b1   : > { %v11615_v11 = vpop.f32.mrf.mxu1 }
 0x4b2   : > { %v11616_v38 = vadd.f32 %v11615_v11, %v11428_v37 }
 0x4b3   : > { %v11617_v23 = vpop.f32.mrf.mxu1 }
 0x4b4   : > { %v11626_v41 = vmax.f32 %v11616_v38, 0.0  ;;  %v11618_v46 = vadd.f32 %v11617_v23, %v11428_v37 }
 0x4b5   : > { %v11621_v49 = vpop.f32.mrf.mxu1 }
 0x4b6   : > { %11630 = vst [vmem:[%s217_s6] sm:$0xff] %v11626_v41  ;;  %v11627_v44 = vmax.f32 %v11618_v46, 0.0  ;;  %v11622_v40 = vadd.f32 %v11621_v49, %v11433_v43 }
 0x4b7   : > { %v11623_v39 = vpop.f32.mrf.mxu1 }
 0x4b8   : > { %11632 = vst.msk [vmem:[%s217_s6 + $0x8] sm:$0xff] %vm11631_vm7, %v11627_v44  ;;  %v11628_v10 = vmax.f32 %v11622_v40, 0.0  ;;  %v11624_v60 = vadd.f32 %v11623_v39, %v11433_v43 }
 0x4ba   : > { %11633 = vst [vmem:[%s217_s6 + $0x10] sm:$0xff] %v11628_v10  ;;  %v11629_v59 = vmax.f32 %v11624_v60, 0.0 }
 0x4bc   : > { %11634 = vst.msk [vmem:[%s217_s6 + $0x18] sm:$0xff] %vm11631_vm7, %v11629_v59 }
 0x4bd   : > { %12115 = shalt.err (!%p12112_p3)
}
 0x4be   : > { %s12116_s16 = scalar_lea.hbm %s17288_s11, 512  ;;  %s12120_s25 = scalar_lea.hbm %s17337_s5, 1024 }
 0x4bf   : > { %p12117_p4 = scmp.ne.s32.totalorder %s17288_s11, %s12116_s16  ;;  %p12121_p9 = scmp.lt.s32.totalorder %s17288_s11, %s17337_s5 }
 0x4c0   : > { %p12122_p10 = scmp.lt.s32.totalorder %s12120_s25, %s12116_s16 }
 0x4c1   : > { %p12118_p7 = pnand %p12117_p4, %p12243_p5 }
 0x4c2   : > { %p12123_p11 = por %p12122_p10, %p12121_p9 }
 0x4c3   : > { %p12119_p8 = pneg %p12118_p7 }
 0x4c5   : > { %p12124_p12 = pnand %p12123_p11, %p12119_p8 }
 0x4c7   : > { %12127 = shalt.err (!%p12124_p12)
}
 0x4c8   : > { %s12174_s8 = smov 256  }
 0x4c9   : > { %12018 = dma.vmem_to_hbm [thread:$0]  (%p12243_p5), %s17283_s7, 512, %s17288_s11, %s17291_s12, %s12174_s8, %s12174_s8, %s12171_s26  }
 0x4ca PF: > { %p12024_p13 = scmp.ge.s32.totalorder %s12162_s21, 2  ;;  %s11664_s9 = sand.u32 1, %s12150_s18  }
 0x4cb   : > { %s11665_s10 = scalar_lea.sflag [#allocation3], %s11664_s9 }
 0x4cc   : > { %p12021_p0 = pnand %p12024_p13, %p12247_p6 }
 0x4ce   : > { %p12022_p1 = pneg %p12021_p0 }
 0x4d0   : > { %12145 = dma.done.wait (%p12022_p1), %s11665_s10, 512  }
 0x4d1   : > { %12147 = vsyncadd (%p12022_p1), %s11665_s10, 4294966784  ;;  %p15_p2 = scmp.ge.s32.totalorder %s12230_s24, 4   ;;  %s18059_s18 = smov %s12154_s19 }
 0x4d2   : > { %s18060_s19 = smov %s12158_s20  ;;  %s18061_s20 = smov %s12241_s27 }
 0x4d3   : > { %s18062_s21 = smov %s12230_s24  ;;  %17 = sbr.rel (!%p15_p2) target bundleno = 3 (0x3), region = 75 }
 0x4d8   :  { %11670 = vsyncpa [#allocation3], 1 }
 0x4d9   :  { %11672 = vsyncpa [#allocation3 + $0x1], 1 }

</bundles_post_ra>
